<compile_context>
chip_gen: v6e
topology: v6e:2x2x1
jax: 0.10.0
libtpu: 0.0.40
codegen_flags: <defaults>
</compile_context>

<pallas_src>
import jax
import jax.numpy as jnp
from jax.experimental import pallas as pl
from jax.experimental.pallas import tpu as pltpu


# ---------------------------------------------------------------------------
# Fused kernel: conv5x5(pad=2) + bias + ReLU + maxpool2x2 + Linear head
# ---------------------------------------------------------------------------
def _make_fused_kernel(b_tile, h, k, ho, lane_out, n_pad):
  half = lane_out // 2  # = (w//2) * c_out = 256

  def kernel(xp_ref, wrow_ref, bconv_ref, wfc_ref, bfc_ref, out_ref, conv_ref):
    # xp_ref   : (b_tile, h+k-1, 288)  bf16   padded input, lanes = (x_pad, c)
    # wrow_ref : (k, 288, 512)         bf16   per-dy structured conv weight
    # bconv_ref: (1, 512)              f32    conv bias tiled over x
    # wfc_ref  : (ho, 256, n_pad)      bf16   FC weight, rows permuted to match
    # bfc_ref  : (1, n_pad)            f32
    # out_ref  : (1, b_tile, n_pad)    f32    logits (lane dense, padded)
    # conv_ref : (b_tile*h, 512)       f32    scratch: conv map, cols=(par,x/2,c)

    # ---- convolution: k row-structured matmuls accumulated in the scratch ----
    for dy in range(k):
      if b_tile == 1:
        lhs = xp_ref[0, dy:dy + h, :]                       # (32, 288) bf16
      else:
        lhs = jnp.concatenate(
            [xp_ref[bb, dy:dy + h, :] for bb in range(b_tile)], axis=0)
      contrib = jnp.dot(lhs, wrow_ref[dy],
                        preferred_element_type=jnp.float32)  # (b_tile*32, 512)
      if dy == 0:
        conv_ref[...] = contrib
      else:
        conv_ref[...] = conv_ref[...] + contrib

    # Bias + ReLU on the fully lane-dense (b_tile*32, 512) map.
    conv_ref[...] = jnp.maximum(conv_ref[...] + bconv_ref[...], 0.0)

    # ---- 2x2 max pool + FC head, accumulated over the 16 pooled rows ----
    # y-pairs: strided sublane loads; x-pairs: the two 256-lane halves
    # (column order is (x-parity, x/2, c_out) by weight construction).
    logits = jnp.zeros((b_tile, n_pad), jnp.float32)
    for yo in range(ho):
      if b_tile == 1:
        r0 = conv_ref[pl.ds(2 * yo, 1), :]                  # (1, 512)
        r1 = conv_ref[pl.ds(2 * yo + 1, 1), :]
      else:
        r0 = conv_ref[pl.ds(2 * yo, b_tile, h), :]          # (b_tile, 512)
        r1 = conv_ref[pl.ds(2 * yo + 1, b_tile, h), :]
      m = jnp.maximum(r0, r1)
      pooled = jnp.maximum(m[:, :half], m[:, half:]).astype(jnp.bfloat16)
      logits = logits + jnp.dot(pooled, wfc_ref[yo],
                                preferred_element_type=jnp.float32)

    out_ref[...] = (logits + bfc_ref[...]).reshape(1, b_tile, n_pad)

  return kernel


# ---------------------------------------------------------------------------
# One-time parameter preparation (hoisted out of the forward pass)
# ---------------------------------------------------------------------------
def prepare_params(params, h=32, w=32):
  conv_w = params["conv_w"]          # (16, Cin, 5, 5)  PyTorch OIHW
  conv_b = params["conv_b"]          # (16,)
  fc_w = params["fc_w"]              # (num_classes, 16*16*16)
  fc_b = params["fc_b"]              # (num_classes,)

  c_out, c_in, k, _ = conv_w.shape
  nc = fc_w.shape[0]
  ho, wo = h // 2, w // 2
  assert fc_w.shape[1] == c_out * ho * wo, "FC expects a 32x32 input image"

  c_pad = ((c_in + 7) // 8) * 8
  wp = w + k - 1
  n_pad = ((nc + 127) // 128) * 128

  # Structured per-dy conv weight: rows = (x_pad, c), cols = (parity, x/2, co).
  wt = jnp.transpose(conv_w, (2, 3, 1, 0))                       # (dy, dx, c, co)
  wt = jnp.pad(wt, ((0, 0), (0, 0), (0, c_pad - c_in), (0, 0)))
  shifts = jnp.stack([jnp.eye(wp, w, k=-dx, dtype=conv_w.dtype)
                      for dx in range(k)])                        # (dx, x_pad, xo)
  w_struct = jnp.einsum("dpx,ydco->ypcxo", shifts, wt)            # (dy,x_pad,c,xo,co)
  w_struct = w_struct.reshape(k, wp, c_pad, wo, 2, c_out)         # xo -> (x/2, parity)
  w_struct = jnp.transpose(w_struct, (0, 1, 2, 4, 3, 5))          # (dy,x_pad,c,par,x/2,co)
  w_rows = w_struct.reshape(k, wp * c_pad, 2 * wo * c_out).astype(jnp.bfloat16)

  b_row = jnp.tile(conv_b, 2 * wo).reshape(1, 2 * wo * c_out).astype(jnp.float32)

  # FC weight permuted to the kernel's pooled layout: row = (yo, x/2, co).
  wf = fc_w.reshape(nc, c_out, ho, wo)
  wf = jnp.transpose(wf, (2, 3, 1, 0)).reshape(ho, wo * c_out, nc)
  wf = jnp.pad(wf, ((0, 0), (0, 0), (0, n_pad - nc))).astype(jnp.bfloat16)
  b_fc = jnp.pad(fc_b, (0, n_pad - nc)).reshape(1, n_pad).astype(jnp.float32)

  return dict(w_rows=w_rows, conv_bias_row=b_row, fc_w3=wf, fc_bias_row=b_fc)


def _pick_b_tile(b):
  # Largest divisor of b <= 8, preferring a grid length >= 2 (v7x has 2 TCs).
  cands = [t for t in range(1, min(b, 8) + 1) if b % t == 0]
  two_core = [t for t in cands if b // t >= 2]
  return max(two_core) if two_core else max(cands)


# ---------------------------------------------------------------------------
# Forward pass (mirrors Conv_basic.forward); returns logits padded to 128
# ---------------------------------------------------------------------------
@jax.jit
def conv_basic_forward(x_nchw, prepped):
  w_rows = prepped["w_rows"]
  b_row = prepped["conv_bias_row"]
  wfc3 = prepped["fc_w3"]
  b_fc = prepped["fc_bias_row"]

  b, c_in, h, w = x_nchw.shape
  k, lane_in, lane_out = w_rows.shape
  hp, wp = h + k - 1, w + k - 1
  c_pad = lane_in // wp
  ho = h // 2
  n_pad = wfc3.shape[-1]
  assert h == 32 and w == 32 and c_pad >= c_in

  pad = (k - 1) // 2
  # Per-call activation plumbing only: NCHW -> padded (B, 36, 36*c_pad) bf16.
  x_nhwc = jnp.transpose(x_nchw, (0, 2, 3, 1))
  xp = jnp.pad(x_nhwc, ((0, 0), (pad, pad), (pad, pad), (0, c_pad - c_in)))
  xp = xp.reshape(b, hp, lane_in).astype(jnp.bfloat16)

  b_tile = _pick_b_tile(b)
  n_steps = b // b_tile

  out = pl.pallas_call(
      _make_fused_kernel(b_tile, h, k, ho, lane_out, n_pad),
      out_shape=jax.ShapeDtypeStruct((n_steps, b_tile, n_pad), jnp.float32),
      grid=(n_steps,),
      in_specs=[
          pl.BlockSpec((b_tile, hp, lane_in), lambda i: (i, 0, 0)),
          pl.BlockSpec((k, lane_in, lane_out), lambda i: (0, 0, 0)),
          pl.BlockSpec((1, lane_out), lambda i: (0, 0)),
          pl.BlockSpec((ho, wfc3.shape[1], n_pad), lambda i: (0, 0, 0)),
          pl.BlockSpec((1, n_pad), lambda i: (0, 0)),
      ],
      out_specs=pl.BlockSpec((1, b_tile, n_pad), lambda i: (i, 0, 0)),
      scratch_shapes=[pltpu.VMEM((b_tile * h, lane_out), jnp.float32)],
      compiler_params=pltpu.CompilerParams(dimension_semantics=("parallel",)),
  )(xp, w_rows, b_row, wfc3, b_fc)

  return out.reshape(b, n_pad)


# ---------------------------------------------------------------------------
# Pure-JAX reference (emulates the kernel's bf16 operand rounding)
# ---------------------------------------------------------------------------
@jax.jit
def reference_forward(x_nchw, params):
  xb = x_nchw.astype(jnp.bfloat16).astype(jnp.float32)
  wb = params["conv_w"].astype(jnp.bfloat16).astype(jnp.float32)
  out = jax.lax.conv_general_dilated(
      xb, wb, window_strides=(1, 1), padding=((2, 2), (2, 2)),
      dimension_numbers=("NCHW", "OIHW", "NCHW"))
  out = jnp.maximum(out + params["conv_b"].reshape(1, -1, 1, 1), 0.0)
  out = jax.lax.reduce_window(out, -jnp.inf, jax.lax.max,
                              (1, 1, 2, 2), (1, 1, 2, 2), "VALID")
  out = out.astype(jnp.bfloat16).astype(jnp.float32)
  flat = out.reshape(out.shape[0], -1)
  wfc = params["fc_w"].astype(jnp.bfloat16).astype(jnp.float32)
  return flat @ wfc.T + params["fc_b"]


if __name__ == "__main__":
  key = jax.random.PRNGKey(0)
  k_x, k_w, k_b, k_fw, k_fb = jax.random.split(key, 5)

  batch, n_channels, num_classes = 2, 3, 10
  h = w = 32

  x = jax.random.normal(k_x, (batch, n_channels, h, w), jnp.float32)
  params = dict(
      conv_w=jax.random.normal(k_w, (16, n_channels, 5, 5), jnp.float32)
      / jnp.sqrt(25.0 * n_channels),
      conv_b=0.1 * jax.random.normal(k_b, (16,), jnp.float32),
      fc_w=jax.random.normal(k_fw, (num_classes, 16 * 16 * 16), jnp.float32)
      / jnp.sqrt(16.0 * 16.0 * 16.0),
      fc_b=0.1 * jax.random.normal(k_fb, (num_classes,), jnp.float32),
  )

  # One-time weight re-layout (hoisted out of the forward pass).
  prepped = jax.block_until_ready(prepare_params(params, h=h, w=w))

  logits_pad = jax.block_until_ready(conv_basic_forward(x, prepped))
  logits = logits_pad[:, :num_classes]
  ref = jax.block_until_ready(reference_forward(x, params))
  err = float(jnp.max(jnp.abs(logits - ref)))

  assert logits.shape == (batch, num_classes), logits.shape
  assert bool(jnp.all(jnp.isfinite(logits)))
  assert err < 5e-2, f"max |pallas - reference| = {err}"
  print("KERNEL_OK")
</pallas_src>

<mosaic_0001>
module attributes {stable_mosaic.version = 11 : i64} {
  func.func @kernel(%arg0: i32, %arg1: memref<1x36x288xbf16, #tpu.memory_space<vmem>>, %arg2: memref<5x288x512xbf16, #tpu.memory_space<vmem>>, %arg3: memref<1x512xf32, #tpu.memory_space<vmem>>, %arg4: memref<16x256x128xbf16, #tpu.memory_space<vmem>>, %arg5: memref<1x128xf32, #tpu.memory_space<vmem>>, %arg6: memref<1x1x128xf32, #tpu.memory_space<vmem>>, %arg7: memref<32x512xf32, #tpu.memory_space<vmem>>) attributes {dimension_semantics = [#tpu.dimension_semantics<parallel>], iteration_bounds = array<i64: 2>, scalar_prefetch = 0 : i64, scratch_operands = 1 : i64, tpu.core_type = #tpu.core_type<tc>, window_params = [{transform_indices = @transform_0, window_bounds = array<i64: 1, 36, 288>}, {pipeline_mode = #tpu.pipeline_mode<synchronous>, transform_indices = @transform_1, window_bounds = array<i64: 5, 288, 512>}, {pipeline_mode = #tpu.pipeline_mode<synchronous>, transform_indices = @transform_2, window_bounds = array<i64: 1, 512>}, {pipeline_mode = #tpu.pipeline_mode<synchronous>, transform_indices = @transform_3, window_bounds = array<i64: 16, 256, 128>}, {pipeline_mode = #tpu.pipeline_mode<synchronous>, transform_indices = @transform_4, window_bounds = array<i64: 1, 128>}, {transform_indices = @transform_5, window_bounds = array<i64: 1, 1, 128>}]} {
    %c0 = arith.constant 0 : index
    %c0_0 = arith.constant 0 : index
    %c0_1 = arith.constant 0 : index
    %0 = vector.load %arg1[%c0, %c0_0, %c0_1] : memref<1x36x288xbf16, #tpu.memory_space<vmem>>, vector<1x32x288xbf16>
    %1 = vector.shape_cast %0 : vector<1x32x288xbf16> to vector<32x288xbf16>
    %c0_2 = arith.constant 0 : index
    %c0_3 = arith.constant 0 : index
    %c0_4 = arith.constant 0 : index
    %2 = vector.load %arg2[%c0_2, %c0_3, %c0_4] : memref<5x288x512xbf16, #tpu.memory_space<vmem>>, vector<1x288x512xbf16>
    %3 = vector.shape_cast %2 : vector<1x288x512xbf16> to vector<288x512xbf16>
    %cst = arith.constant dense<0.000000e+00> : vector<32x512xf32>
    %4 = tpu.matmul %1, %3, %cst {dimension_numbers = #tpu.dot_dimension_numbers<[1], [0], [0], [1], [0, 0, 1, 1], [], []>} : vector<32x288xbf16>, vector<288x512xbf16>, vector<32x512xf32> -> vector<32x512xf32>
    %c0_5 = arith.constant 0 : index
    %c0_6 = arith.constant 0 : index
    %5 = vector.load %arg7[%c0_5, %c0_6] : memref<32x512xf32, #tpu.memory_space<vmem>>, vector<32x512xf32>
    tpu.vector_store %arg7[%c0_5, %c0_6], %4 {strides = array<i32>} : memref<32x512xf32, #tpu.memory_space<vmem>>, vector<32x512xf32>,
    %c0_7 = arith.constant 0 : index
    %c1 = arith.constant 1 : index
    %c0_8 = arith.constant 0 : index
    %6 = vector.load %arg1[%c0_7, %c1, %c0_8] : memref<1x36x288xbf16, #tpu.memory_space<vmem>>, vector<1x32x288xbf16>
    %7 = vector.shape_cast %6 : vector<1x32x288xbf16> to vector<32x288xbf16>
    %c1_9 = arith.constant 1 : index
    %c0_10 = arith.constant 0 : index
    %c0_11 = arith.constant 0 : index
    %8 = vector.load %arg2[%c1_9, %c0_10, %c0_11] : memref<5x288x512xbf16, #tpu.memory_space<vmem>>, vector<1x288x512xbf16>
    %9 = vector.shape_cast %8 : vector<1x288x512xbf16> to vector<288x512xbf16>
    %cst_12 = arith.constant dense<0.000000e+00> : vector<32x512xf32>
    %10 = tpu.matmul %7, %9, %cst_12 {dimension_numbers = #tpu.dot_dimension_numbers<[1], [0], [0], [1], [0, 0, 1, 1], [], []>} : vector<32x288xbf16>, vector<288x512xbf16>, vector<32x512xf32> -> vector<32x512xf32>
    %c0_13 = arith.constant 0 : index
    %c0_14 = arith.constant 0 : index
    %11 = vector.load %arg7[%c0_13, %c0_14] : memref<32x512xf32, #tpu.memory_space<vmem>>, vector<32x512xf32>
    %12 = arith.addf %11, %10 : vector<32x512xf32>
    %c0_15 = arith.constant 0 : index
    %c0_16 = arith.constant 0 : index
    %13 = vector.load %arg7[%c0_15, %c0_16] : memref<32x512xf32, #tpu.memory_space<vmem>>, vector<32x512xf32>
    tpu.vector_store %arg7[%c0_15, %c0_16], %12 {strides = array<i32>} : memref<32x512xf32, #tpu.memory_space<vmem>>, vector<32x512xf32>,
    %c0_17 = arith.constant 0 : index
    %c2 = arith.constant 2 : index
    %c0_18 = arith.constant 0 : index
    %14 = vector.load %arg1[%c0_17, %c2, %c0_18] : memref<1x36x288xbf16, #tpu.memory_space<vmem>>, vector<1x32x288xbf16>
    %15 = vector.shape_cast %14 : vector<1x32x288xbf16> to vector<32x288xbf16>
    %c2_19 = arith.constant 2 : index
    %c0_20 = arith.constant 0 : index
    %c0_21 = arith.constant 0 : index
    %16 = vector.load %arg2[%c2_19, %c0_20, %c0_21] : memref<5x288x512xbf16, #tpu.memory_space<vmem>>, vector<1x288x512xbf16>
    %17 = vector.shape_cast %16 : vector<1x288x512xbf16> to vector<288x512xbf16>
    %cst_22 = arith.constant dense<0.000000e+00> : vector<32x512xf32>
    %18 = tpu.matmul %15, %17, %cst_22 {dimension_numbers = #tpu.dot_dimension_numbers<[1], [0], [0], [1], [0, 0, 1, 1], [], []>} : vector<32x288xbf16>, vector<288x512xbf16>, vector<32x512xf32> -> vector<32x512xf32>
    %c0_23 = arith.constant 0 : index
    %c0_24 = arith.constant 0 : index
    %19 = vector.load %arg7[%c0_23, %c0_24] : memref<32x512xf32, #tpu.memory_space<vmem>>, vector<32x512xf32>
    %20 = arith.addf %19, %18 : vector<32x512xf32>
    %c0_25 = arith.constant 0 : index
    %c0_26 = arith.constant 0 : index
    %21 = vector.load %arg7[%c0_25, %c0_26] : memref<32x512xf32, #tpu.memory_space<vmem>>, vector<32x512xf32>
    tpu.vector_store %arg7[%c0_25, %c0_26], %20 {strides = array<i32>} : memref<32x512xf32, #tpu.memory_space<vmem>>, vector<32x512xf32>,
    %c0_27 = arith.constant 0 : index
    %c3 = arith.constant 3 : index
    %c0_28 = arith.constant 0 : index
    %22 = vector.load %arg1[%c0_27, %c3, %c0_28] : memref<1x36x288xbf16, #tpu.memory_space<vmem>>, vector<1x32x288xbf16>
    %23 = vector.shape_cast %22 : vector<1x32x288xbf16> to vector<32x288xbf16>
    %c3_29 = arith.constant 3 : index
    %c0_30 = arith.constant 0 : index
    %c0_31 = arith.constant 0 : index
    %24 = vector.load %arg2[%c3_29, %c0_30, %c0_31] : memref<5x288x512xbf16, #tpu.memory_space<vmem>>, vector<1x288x512xbf16>
    %25 = vector.shape_cast %24 : vector<1x288x512xbf16> to vector<288x512xbf16>
    %cst_32 = arith.constant dense<0.000000e+00> : vector<32x512xf32>
    %26 = tpu.matmul %23, %25, %cst_32 {dimension_numbers = #tpu.dot_dimension_numbers<[1], [0], [0], [1], [0, 0, 1, 1], [], []>} : vector<32x288xbf16>, vector<288x512xbf16>, vector<32x512xf32> -> vector<32x512xf32>
    %c0_33 = arith.constant 0 : index
    %c0_34 = arith.constant 0 : index
    %27 = vector.load %arg7[%c0_33, %c0_34] : memref<32x512xf32, #tpu.memory_space<vmem>>, vector<32x512xf32>
    %28 = arith.addf %27, %26 : vector<32x512xf32>
    %c0_35 = arith.constant 0 : index
    %c0_36 = arith.constant 0 : index
    %29 = vector.load %arg7[%c0_35, %c0_36] : memref<32x512xf32, #tpu.memory_space<vmem>>, vector<32x512xf32>
    tpu.vector_store %arg7[%c0_35, %c0_36], %28 {strides = array<i32>} : memref<32x512xf32, #tpu.memory_space<vmem>>, vector<32x512xf32>,
    %c0_37 = arith.constant 0 : index
    %c4 = arith.constant 4 : index
    %c0_38 = arith.constant 0 : index
    %30 = vector.load %arg1[%c0_37, %c4, %c0_38] : memref<1x36x288xbf16, #tpu.memory_space<vmem>>, vector<1x32x288xbf16>
    %31 = vector.shape_cast %30 : vector<1x32x288xbf16> to vector<32x288xbf16>
    %c4_39 = arith.constant 4 : index
    %c0_40 = arith.constant 0 : index
    %c0_41 = arith.constant 0 : index
    %32 = vector.load %arg2[%c4_39, %c0_40, %c0_41] : memref<5x288x512xbf16, #tpu.memory_space<vmem>>, vector<1x288x512xbf16>
    %33 = vector.shape_cast %32 : vector<1x288x512xbf16> to vector<288x512xbf16>
    %cst_42 = arith.constant dense<0.000000e+00> : vector<32x512xf32>
    %34 = tpu.matmul %31, %33, %cst_42 {dimension_numbers = #tpu.dot_dimension_numbers<[1], [0], [0], [1], [0, 0, 1, 1], [], []>} : vector<32x288xbf16>, vector<288x512xbf16>, vector<32x512xf32> -> vector<32x512xf32>
    %c0_43 = arith.constant 0 : index
    %c0_44 = arith.constant 0 : index
    %35 = vector.load %arg7[%c0_43, %c0_44] : memref<32x512xf32, #tpu.memory_space<vmem>>, vector<32x512xf32>
    %36 = arith.addf %35, %34 : vector<32x512xf32>
    %c0_45 = arith.constant 0 : index
    %c0_46 = arith.constant 0 : index
    %37 = vector.load %arg7[%c0_45, %c0_46] : memref<32x512xf32, #tpu.memory_space<vmem>>, vector<32x512xf32>
    tpu.vector_store %arg7[%c0_45, %c0_46], %36 {strides = array<i32>} : memref<32x512xf32, #tpu.memory_space<vmem>>, vector<32x512xf32>,
    %c0_47 = arith.constant 0 : index
    %c0_48 = arith.constant 0 : index
    %38 = vector.load %arg7[%c0_47, %c0_48] : memref<32x512xf32, #tpu.memory_space<vmem>>, vector<32x512xf32>
    %c0_49 = arith.constant 0 : index
    %c0_50 = arith.constant 0 : index
    %39 = vector.load %arg3[%c0_49, %c0_50] : memref<1x512xf32, #tpu.memory_space<vmem>>, vector<1x512xf32>
    %40 = vector.broadcast %39 : vector<1x512xf32> to vector<32x512xf32>
    %41 = arith.addf %38, %40 : vector<32x512xf32>
    %cst_51 = arith.constant 0.000000e+00 : f32
    %42 = vector.broadcast %cst_51 : f32 to vector<32x512xf32>
    %43 = arith.maximumf %41, %42 : vector<32x512xf32>
    %c0_52 = arith.constant 0 : index
    %c0_53 = arith.constant 0 : index
    %44 = vector.load %arg7[%c0_52, %c0_53] : memref<32x512xf32, #tpu.memory_space<vmem>>, vector<32x512xf32>
    tpu.vector_store %arg7[%c0_52, %c0_53], %43 {strides = array<i32>} : memref<32x512xf32, #tpu.memory_space<vmem>>, vector<32x512xf32>,
    %cst_54 = arith.constant 0.000000e+00 : f32
    %45 = vector.broadcast %cst_54 : f32 to vector<1x128xf32>
    %c0_55 = arith.constant 0 : index
    %c0_56 = arith.constant 0 : index
    %46 = vector.load %arg7[%c0_55, %c0_56] : memref<32x512xf32, #tpu.memory_space<vmem>>, vector<1x512xf32>
    %c1_57 = arith.constant 1 : index
    %c0_58 = arith.constant 0 : index
    %47 = vector.load %arg7[%c1_57, %c0_58] : memref<32x512xf32, #tpu.memory_space<vmem>>, vector<1x512xf32>
    %48 = arith.maximumf %46, %47 : vector<1x512xf32>
    %49 = vector.extract_strided_slice %48 {offsets = [0, 0], sizes = [1, 256], strides = [1, 1]} : vector<1x512xf32> to vector<1x256xf32>
    %50 = vector.extract_strided_slice %48 {offsets = [0, 256], sizes = [1, 256], strides = [1, 1]} : vector<1x512xf32> to vector<1x256xf32>
    %51 = arith.maximumf %49, %50 : vector<1x256xf32>
    %52 = arith.truncf %51 : vector<1x256xf32> to vector<1x256xbf16>
    %c0_59 = arith.constant 0 : index
    %c0_60 = arith.constant 0 : index
    %c0_61 = arith.constant 0 : index
    %53 = vector.load %arg4[%c0_59, %c0_60, %c0_61] : memref<16x256x128xbf16, #tpu.memory_space<vmem>>, vector<1x256x128xbf16>
    %54 = vector.shape_cast %53 : vector<1x256x128xbf16> to vector<256x128xbf16>
    %cst_62 = arith.constant dense<0.000000e+00> : vector<1x128xf32>
    %55 = tpu.matmul %52, %54, %cst_62 {dimension_numbers = #tpu.dot_dimension_numbers<[1], [0], [0], [1], [0, 0, 1, 1], [], []>} : vector<1x256xbf16>, vector<256x128xbf16>, vector<1x128xf32> -> vector<1x128xf32>
    %56 = arith.addf %45, %55 : vector<1x128xf32>
    %c2_63 = arith.constant 2 : index
    %c0_64 = arith.constant 0 : index
    %57 = vector.load %arg7[%c2_63, %c0_64] : memref<32x512xf32, #tpu.memory_space<vmem>>, vector<1x512xf32>
    %c3_65 = arith.constant 3 : index
    %c0_66 = arith.constant 0 : index
    %58 = vector.load %arg7[%c3_65, %c0_66] : memref<32x512xf32, #tpu.memory_space<vmem>>, vector<1x512xf32>
    %59 = arith.maximumf %57, %58 : vector<1x512xf32>
    %60 = vector.extract_strided_slice %59 {offsets = [0, 0], sizes = [1, 256], strides = [1, 1]} : vector<1x512xf32> to vector<1x256xf32>
    %61 = vector.extract_strided_slice %59 {offsets = [0, 256], sizes = [1, 256], strides = [1, 1]} : vector<1x512xf32> to vector<1x256xf32>
    %62 = arith.maximumf %60, %61 : vector<1x256xf32>
    %63 = arith.truncf %62 : vector<1x256xf32> to vector<1x256xbf16>
    %c1_67 = arith.constant 1 : index
    %c0_68 = arith.constant 0 : index
    %c0_69 = arith.constant 0 : index
    %64 = vector.load %arg4[%c1_67, %c0_68, %c0_69] : memref<16x256x128xbf16, #tpu.memory_space<vmem>>, vector<1x256x128xbf16>
    %65 = vector.shape_cast %64 : vector<1x256x128xbf16> to vector<256x128xbf16>
    %cst_70 = arith.constant dense<0.000000e+00> : vector<1x128xf32>
    %66 = tpu.matmul %63, %65, %cst_70 {dimension_numbers = #tpu.dot_dimension_numbers<[1], [0], [0], [1], [0, 0, 1, 1], [], []>} : vector<1x256xbf16>, vector<256x128xbf16>, vector<1x128xf32> -> vector<1x128xf32>
    %67 = arith.addf %56, %66 : vector<1x128xf32>
    %c4_71 = arith.constant 4 : index
    %c0_72 = arith.constant 0 : index
    %68 = vector.load %arg7[%c4_71, %c0_72] : memref<32x512xf32, #tpu.memory_space<vmem>>, vector<1x512xf32>
    %c5 = arith.constant 5 : index
    %c0_73 = arith.constant 0 : index
    %69 = vector.load %arg7[%c5, %c0_73] : memref<32x512xf32, #tpu.memory_space<vmem>>, vector<1x512xf32>
    %70 = arith.maximumf %68, %69 : vector<1x512xf32>
    %71 = vector.extract_strided_slice %70 {offsets = [0, 0], sizes = [1, 256], strides = [1, 1]} : vector<1x512xf32> to vector<1x256xf32>
    %72 = vector.extract_strided_slice %70 {offsets = [0, 256], sizes = [1, 256], strides = [1, 1]} : vector<1x512xf32> to vector<1x256xf32>
    %73 = arith.maximumf %71, %72 : vector<1x256xf32>
    %74 = arith.truncf %73 : vector<1x256xf32> to vector<1x256xbf16>
    %c2_74 = arith.constant 2 : index
    %c0_75 = arith.constant 0 : index
    %c0_76 = arith.constant 0 : index
    %75 = vector.load %arg4[%c2_74, %c0_75, %c0_76] : memref<16x256x128xbf16, #tpu.memory_space<vmem>>, vector<1x256x128xbf16>
    %76 = vector.shape_cast %75 : vector<1x256x128xbf16> to vector<256x128xbf16>
    %cst_77 = arith.constant dense<0.000000e+00> : vector<1x128xf32>
    %77 = tpu.matmul %74, %76, %cst_77 {dimension_numbers = #tpu.dot_dimension_numbers<[1], [0], [0], [1], [0, 0, 1, 1], [], []>} : vector<1x256xbf16>, vector<256x128xbf16>, vector<1x128xf32> -> vector<1x128xf32>
    %78 = arith.addf %67, %77 : vector<1x128xf32>
    %c6 = arith.constant 6 : index
    %c0_78 = arith.constant 0 : index
    %79 = vector.load %arg7[%c6, %c0_78] : memref<32x512xf32, #tpu.memory_space<vmem>>, vector<1x512xf32>
    %c7 = arith.constant 7 : index
    %c0_79 = arith.constant 0 : index
    %80 = vector.load %arg7[%c7, %c0_79] : memref<32x512xf32, #tpu.memory_space<vmem>>, vector<1x512xf32>
    %81 = arith.maximumf %79, %80 : vector<1x512xf32>
    %82 = vector.extract_strided_slice %81 {offsets = [0, 0], sizes = [1, 256], strides = [1, 1]} : vector<1x512xf32> to vector<1x256xf32>
    %83 = vector.extract_strided_slice %81 {offsets = [0, 256], sizes = [1, 256], strides = [1, 1]} : vector<1x512xf32> to vector<1x256xf32>
    %84 = arith.maximumf %82, %83 : vector<1x256xf32>
    %85 = arith.truncf %84 : vector<1x256xf32> to vector<1x256xbf16>
    %c3_80 = arith.constant 3 : index
    %c0_81 = arith.constant 0 : index
    %c0_82 = arith.constant 0 : index
    %86 = vector.load %arg4[%c3_80, %c0_81, %c0_82] : memref<16x256x128xbf16, #tpu.memory_space<vmem>>, vector<1x256x128xbf16>
    %87 = vector.shape_cast %86 : vector<1x256x128xbf16> to vector<256x128xbf16>
    %cst_83 = arith.constant dense<0.000000e+00> : vector<1x128xf32>
    %88 = tpu.matmul %85, %87, %cst_83 {dimension_numbers = #tpu.dot_dimension_numbers<[1], [0], [0], [1], [0, 0, 1, 1], [], []>} : vector<1x256xbf16>, vector<256x128xbf16>, vector<1x128xf32> -> vector<1x128xf32>
    %89 = arith.addf %78, %88 : vector<1x128xf32>
    %c8 = arith.constant 8 : index
    %c0_84 = arith.constant 0 : index
    %90 = vector.load %arg7[%c8, %c0_84] : memref<32x512xf32, #tpu.memory_space<vmem>>, vector<1x512xf32>
    %c9 = arith.constant 9 : index
    %c0_85 = arith.constant 0 : index
    %91 = vector.load %arg7[%c9, %c0_85] : memref<32x512xf32, #tpu.memory_space<vmem>>, vector<1x512xf32>
    %92 = arith.maximumf %90, %91 : vector<1x512xf32>
    %93 = vector.extract_strided_slice %92 {offsets = [0, 0], sizes = [1, 256], strides = [1, 1]} : vector<1x512xf32> to vector<1x256xf32>
    %94 = vector.extract_strided_slice %92 {offsets = [0, 256], sizes = [1, 256], strides = [1, 1]} : vector<1x512xf32> to vector<1x256xf32>
    %95 = arith.maximumf %93, %94 : vector<1x256xf32>
    %96 = arith.truncf %95 : vector<1x256xf32> to vector<1x256xbf16>
    %c4_86 = arith.constant 4 : index
    %c0_87 = arith.constant 0 : index
    %c0_88 = arith.constant 0 : index
    %97 = vector.load %arg4[%c4_86, %c0_87, %c0_88] : memref<16x256x128xbf16, #tpu.memory_space<vmem>>, vector<1x256x128xbf16>
    %98 = vector.shape_cast %97 : vector<1x256x128xbf16> to vector<256x128xbf16>
    %cst_89 = arith.constant dense<0.000000e+00> : vector<1x128xf32>
    %99 = tpu.matmul %96, %98, %cst_89 {dimension_numbers = #tpu.dot_dimension_numbers<[1], [0], [0], [1], [0, 0, 1, 1], [], []>} : vector<1x256xbf16>, vector<256x128xbf16>, vector<1x128xf32> -> vector<1x128xf32>
    %100 = arith.addf %89, %99 : vector<1x128xf32>
    %c10 = arith.constant 10 : index
    %c0_90 = arith.constant 0 : index
    %101 = vector.load %arg7[%c10, %c0_90] : memref<32x512xf32, #tpu.memory_space<vmem>>, vector<1x512xf32>
    %c11 = arith.constant 11 : index
    %c0_91 = arith.constant 0 : index
    %102 = vector.load %arg7[%c11, %c0_91] : memref<32x512xf32, #tpu.memory_space<vmem>>, vector<1x512xf32>
    %103 = arith.maximumf %101, %102 : vector<1x512xf32>
    %104 = vector.extract_strided_slice %103 {offsets = [0, 0], sizes = [1, 256], strides = [1, 1]} : vector<1x512xf32> to vector<1x256xf32>
    %105 = vector.extract_strided_slice %103 {offsets = [0, 256], sizes = [1, 256], strides = [1, 1]} : vector<1x512xf32> to vector<1x256xf32>
    %106 = arith.maximumf %104, %105 : vector<1x256xf32>
    %107 = arith.truncf %106 : vector<1x256xf32> to vector<1x256xbf16>
    %c5_92 = arith.constant 5 : index
    %c0_93 = arith.constant 0 : index
    %c0_94 = arith.constant 0 : index
    %108 = vector.load %arg4[%c5_92, %c0_93, %c0_94] : memref<16x256x128xbf16, #tpu.memory_space<vmem>>, vector<1x256x128xbf16>
    %109 = vector.shape_cast %108 : vector<1x256x128xbf16> to vector<256x128xbf16>
    %cst_95 = arith.constant dense<0.000000e+00> : vector<1x128xf32>
    %110 = tpu.matmul %107, %109, %cst_95 {dimension_numbers = #tpu.dot_dimension_numbers<[1], [0], [0], [1], [0, 0, 1, 1], [], []>} : vector<1x256xbf16>, vector<256x128xbf16>, vector<1x128xf32> -> vector<1x128xf32>
    %111 = arith.addf %100, %110 : vector<1x128xf32>
    %c12 = arith.constant 12 : index
    %c0_96 = arith.constant 0 : index
    %112 = vector.load %arg7[%c12, %c0_96] : memref<32x512xf32, #tpu.memory_space<vmem>>, vector<1x512xf32>
    %c13 = arith.constant 13 : index
    %c0_97 = arith.constant 0 : index
    %113 = vector.load %arg7[%c13, %c0_97] : memref<32x512xf32, #tpu.memory_space<vmem>>, vector<1x512xf32>
    %114 = arith.maximumf %112, %113 : vector<1x512xf32>
    %115 = vector.extract_strided_slice %114 {offsets = [0, 0], sizes = [1, 256], strides = [1, 1]} : vector<1x512xf32> to vector<1x256xf32>
    %116 = vector.extract_strided_slice %114 {offsets = [0, 256], sizes = [1, 256], strides = [1, 1]} : vector<1x512xf32> to vector<1x256xf32>
    %117 = arith.maximumf %115, %116 : vector<1x256xf32>
    %118 = arith.truncf %117 : vector<1x256xf32> to vector<1x256xbf16>
    %c6_98 = arith.constant 6 : index
    %c0_99 = arith.constant 0 : index
    %c0_100 = arith.constant 0 : index
    %119 = vector.load %arg4[%c6_98, %c0_99, %c0_100] : memref<16x256x128xbf16, #tpu.memory_space<vmem>>, vector<1x256x128xbf16>
    %120 = vector.shape_cast %119 : vector<1x256x128xbf16> to vector<256x128xbf16>
    %cst_101 = arith.constant dense<0.000000e+00> : vector<1x128xf32>
    %121 = tpu.matmul %118, %120, %cst_101 {dimension_numbers = #tpu.dot_dimension_numbers<[1], [0], [0], [1], [0, 0, 1, 1], [], []>} : vector<1x256xbf16>, vector<256x128xbf16>, vector<1x128xf32> -> vector<1x128xf32>
    %122 = arith.addf %111, %121 : vector<1x128xf32>
    %c14 = arith.constant 14 : index
    %c0_102 = arith.constant 0 : index
    %123 = vector.load %arg7[%c14, %c0_102] : memref<32x512xf32, #tpu.memory_space<vmem>>, vector<1x512xf32>
    %c15 = arith.constant 15 : index
    %c0_103 = arith.constant 0 : index
    %124 = vector.load %arg7[%c15, %c0_103] : memref<32x512xf32, #tpu.memory_space<vmem>>, vector<1x512xf32>
    %125 = arith.maximumf %123, %124 : vector<1x512xf32>
    %126 = vector.extract_strided_slice %125 {offsets = [0, 0], sizes = [1, 256], strides = [1, 1]} : vector<1x512xf32> to vector<1x256xf32>
    %127 = vector.extract_strided_slice %125 {offsets = [0, 256], sizes = [1, 256], strides = [1, 1]} : vector<1x512xf32> to vector<1x256xf32>
    %128 = arith.maximumf %126, %127 : vector<1x256xf32>
    %129 = arith.truncf %128 : vector<1x256xf32> to vector<1x256xbf16>
    %c7_104 = arith.constant 7 : index
    %c0_105 = arith.constant 0 : index
    %c0_106 = arith.constant 0 : index
    %130 = vector.load %arg4[%c7_104, %c0_105, %c0_106] : memref<16x256x128xbf16, #tpu.memory_space<vmem>>, vector<1x256x128xbf16>
    %131 = vector.shape_cast %130 : vector<1x256x128xbf16> to vector<256x128xbf16>
    %cst_107 = arith.constant dense<0.000000e+00> : vector<1x128xf32>
    %132 = tpu.matmul %129, %131, %cst_107 {dimension_numbers = #tpu.dot_dimension_numbers<[1], [0], [0], [1], [0, 0, 1, 1], [], []>} : vector<1x256xbf16>, vector<256x128xbf16>, vector<1x128xf32> -> vector<1x128xf32>
    %133 = arith.addf %122, %132 : vector<1x128xf32>
    %c16 = arith.constant 16 : index
    %c0_108 = arith.constant 0 : index
    %134 = vector.load %arg7[%c16, %c0_108] : memref<32x512xf32, #tpu.memory_space<vmem>>, vector<1x512xf32>
    %c17 = arith.constant 17 : index
    %c0_109 = arith.constant 0 : index
    %135 = vector.load %arg7[%c17, %c0_109] : memref<32x512xf32, #tpu.memory_space<vmem>>, vector<1x512xf32>
    %136 = arith.maximumf %134, %135 : vector<1x512xf32>
    %137 = vector.extract_strided_slice %136 {offsets = [0, 0], sizes = [1, 256], strides = [1, 1]} : vector<1x512xf32> to vector<1x256xf32>
    %138 = vector.extract_strided_slice %136 {offsets = [0, 256], sizes = [1, 256], strides = [1, 1]} : vector<1x512xf32> to vector<1x256xf32>
    %139 = arith.maximumf %137, %138 : vector<1x256xf32>
    %140 = arith.truncf %139 : vector<1x256xf32> to vector<1x256xbf16>
    %c8_110 = arith.constant 8 : index
    %c0_111 = arith.constant 0 : index
    %c0_112 = arith.constant 0 : index
    %141 = vector.load %arg4[%c8_110, %c0_111, %c0_112] : memref<16x256x128xbf16, #tpu.memory_space<vmem>>, vector<1x256x128xbf16>
    %142 = vector.shape_cast %141 : vector<1x256x128xbf16> to vector<256x128xbf16>
    %cst_113 = arith.constant dense<0.000000e+00> : vector<1x128xf32>
    %143 = tpu.matmul %140, %142, %cst_113 {dimension_numbers = #tpu.dot_dimension_numbers<[1], [0], [0], [1], [0, 0, 1, 1], [], []>} : vector<1x256xbf16>, vector<256x128xbf16>, vector<1x128xf32> -> vector<1x128xf32>
    %144 = arith.addf %133, %143 : vector<1x128xf32>
    %c18 = arith.constant 18 : index
    %c0_114 = arith.constant 0 : index
    %145 = vector.load %arg7[%c18, %c0_114] : memref<32x512xf32, #tpu.memory_space<vmem>>, vector<1x512xf32>
    %c19 = arith.constant 19 : index
    %c0_115 = arith.constant 0 : index
    %146 = vector.load %arg7[%c19, %c0_115] : memref<32x512xf32, #tpu.memory_space<vmem>>, vector<1x512xf32>
    %147 = arith.maximumf %145, %146 : vector<1x512xf32>
    %148 = vector.extract_strided_slice %147 {offsets = [0, 0], sizes = [1, 256], strides = [1, 1]} : vector<1x512xf32> to vector<1x256xf32>
    %149 = vector.extract_strided_slice %147 {offsets = [0, 256], sizes = [1, 256], strides = [1, 1]} : vector<1x512xf32> to vector<1x256xf32>
    %150 = arith.maximumf %148, %149 : vector<1x256xf32>
    %151 = arith.truncf %150 : vector<1x256xf32> to vector<1x256xbf16>
    %c9_116 = arith.constant 9 : index
    %c0_117 = arith.constant 0 : index
    %c0_118 = arith.constant 0 : index
    %152 = vector.load %arg4[%c9_116, %c0_117, %c0_118] : memref<16x256x128xbf16, #tpu.memory_space<vmem>>, vector<1x256x128xbf16>
    %153 = vector.shape_cast %152 : vector<1x256x128xbf16> to vector<256x128xbf16>
    %cst_119 = arith.constant dense<0.000000e+00> : vector<1x128xf32>
    %154 = tpu.matmul %151, %153, %cst_119 {dimension_numbers = #tpu.dot_dimension_numbers<[1], [0], [0], [1], [0, 0, 1, 1], [], []>} : vector<1x256xbf16>, vector<256x128xbf16>, vector<1x128xf32> -> vector<1x128xf32>
    %155 = arith.addf %144, %154 : vector<1x128xf32>
    %c20 = arith.constant 20 : index
    %c0_120 = arith.constant 0 : index
    %156 = vector.load %arg7[%c20, %c0_120] : memref<32x512xf32, #tpu.memory_space<vmem>>, vector<1x512xf32>
    %c21 = arith.constant 21 : index
    %c0_121 = arith.constant 0 : index
    %157 = vector.load %arg7[%c21, %c0_121] : memref<32x512xf32, #tpu.memory_space<vmem>>, vector<1x512xf32>
    %158 = arith.maximumf %156, %157 : vector<1x512xf32>
    %159 = vector.extract_strided_slice %158 {offsets = [0, 0], sizes = [1, 256], strides = [1, 1]} : vector<1x512xf32> to vector<1x256xf32>
    %160 = vector.extract_strided_slice %158 {offsets = [0, 256], sizes = [1, 256], strides = [1, 1]} : vector<1x512xf32> to vector<1x256xf32>
    %161 = arith.maximumf %159, %160 : vector<1x256xf32>
    %162 = arith.truncf %161 : vector<1x256xf32> to vector<1x256xbf16>
    %c10_122 = arith.constant 10 : index
    %c0_123 = arith.constant 0 : index
    %c0_124 = arith.constant 0 : index
    %163 = vector.load %arg4[%c10_122, %c0_123, %c0_124] : memref<16x256x128xbf16, #tpu.memory_space<vmem>>, vector<1x256x128xbf16>
    %164 = vector.shape_cast %163 : vector<1x256x128xbf16> to vector<256x128xbf16>
    %cst_125 = arith.constant dense<0.000000e+00> : vector<1x128xf32>
    %165 = tpu.matmul %162, %164, %cst_125 {dimension_numbers = #tpu.dot_dimension_numbers<[1], [0], [0], [1], [0, 0, 1, 1], [], []>} : vector<1x256xbf16>, vector<256x128xbf16>, vector<1x128xf32> -> vector<1x128xf32>
    %166 = arith.addf %155, %165 : vector<1x128xf32>
    %c22 = arith.constant 22 : index
    %c0_126 = arith.constant 0 : index
    %167 = vector.load %arg7[%c22, %c0_126] : memref<32x512xf32, #tpu.memory_space<vmem>>, vector<1x512xf32>
    %c23 = arith.constant 23 : index
    %c0_127 = arith.constant 0 : index
    %168 = vector.load %arg7[%c23, %c0_127] : memref<32x512xf32, #tpu.memory_space<vmem>>, vector<1x512xf32>
    %169 = arith.maximumf %167, %168 : vector<1x512xf32>
    %170 = vector.extract_strided_slice %169 {offsets = [0, 0], sizes = [1, 256], strides = [1, 1]} : vector<1x512xf32> to vector<1x256xf32>
    %171 = vector.extract_strided_slice %169 {offsets = [0, 256], sizes = [1, 256], strides = [1, 1]} : vector<1x512xf32> to vector<1x256xf32>
    %172 = arith.maximumf %170, %171 : vector<1x256xf32>
    %173 = arith.truncf %172 : vector<1x256xf32> to vector<1x256xbf16>
    %c11_128 = arith.constant 11 : index
    %c0_129 = arith.constant 0 : index
    %c0_130 = arith.constant 0 : index
    %174 = vector.load %arg4[%c11_128, %c0_129, %c0_130] : memref<16x256x128xbf16, #tpu.memory_space<vmem>>, vector<1x256x128xbf16>
    %175 = vector.shape_cast %174 : vector<1x256x128xbf16> to vector<256x128xbf16>
    %cst_131 = arith.constant dense<0.000000e+00> : vector<1x128xf32>
    %176 = tpu.matmul %173, %175, %cst_131 {dimension_numbers = #tpu.dot_dimension_numbers<[1], [0], [0], [1], [0, 0, 1, 1], [], []>} : vector<1x256xbf16>, vector<256x128xbf16>, vector<1x128xf32> -> vector<1x128xf32>
    %177 = arith.addf %166, %176 : vector<1x128xf32>
    %c24 = arith.constant 24 : index
    %c0_132 = arith.constant 0 : index
    %178 = vector.load %arg7[%c24, %c0_132] : memref<32x512xf32, #tpu.memory_space<vmem>>, vector<1x512xf32>
    %c25 = arith.constant 25 : index
    %c0_133 = arith.constant 0 : index
    %179 = vector.load %arg7[%c25, %c0_133] : memref<32x512xf32, #tpu.memory_space<vmem>>, vector<1x512xf32>
    %180 = arith.maximumf %178, %179 : vector<1x512xf32>
    %181 = vector.extract_strided_slice %180 {offsets = [0, 0], sizes = [1, 256], strides = [1, 1]} : vector<1x512xf32> to vector<1x256xf32>
    %182 = vector.extract_strided_slice %180 {offsets = [0, 256], sizes = [1, 256], strides = [1, 1]} : vector<1x512xf32> to vector<1x256xf32>
    %183 = arith.maximumf %181, %182 : vector<1x256xf32>
    %184 = arith.truncf %183 : vector<1x256xf32> to vector<1x256xbf16>
    %c12_134 = arith.constant 12 : index
    %c0_135 = arith.constant 0 : index
    %c0_136 = arith.constant 0 : index
    %185 = vector.load %arg4[%c12_134, %c0_135, %c0_136] : memref<16x256x128xbf16, #tpu.memory_space<vmem>>, vector<1x256x128xbf16>
    %186 = vector.shape_cast %185 : vector<1x256x128xbf16> to vector<256x128xbf16>
    %cst_137 = arith.constant dense<0.000000e+00> : vector<1x128xf32>
    %187 = tpu.matmul %184, %186, %cst_137 {dimension_numbers = #tpu.dot_dimension_numbers<[1], [0], [0], [1], [0, 0, 1, 1], [], []>} : vector<1x256xbf16>, vector<256x128xbf16>, vector<1x128xf32> -> vector<1x128xf32>
    %188 = arith.addf %177, %187 : vector<1x128xf32>
    %c26 = arith.constant 26 : index
    %c0_138 = arith.constant 0 : index
    %189 = vector.load %arg7[%c26, %c0_138] : memref<32x512xf32, #tpu.memory_space<vmem>>, vector<1x512xf32>
    %c27 = arith.constant 27 : index
    %c0_139 = arith.constant 0 : index
    %190 = vector.load %arg7[%c27, %c0_139] : memref<32x512xf32, #tpu.memory_space<vmem>>, vector<1x512xf32>
    %191 = arith.maximumf %189, %190 : vector<1x512xf32>
    %192 = vector.extract_strided_slice %191 {offsets = [0, 0], sizes = [1, 256], strides = [1, 1]} : vector<1x512xf32> to vector<1x256xf32>
    %193 = vector.extract_strided_slice %191 {offsets = [0, 256], sizes = [1, 256], strides = [1, 1]} : vector<1x512xf32> to vector<1x256xf32>
    %194 = arith.maximumf %192, %193 : vector<1x256xf32>
    %195 = arith.truncf %194 : vector<1x256xf32> to vector<1x256xbf16>
    %c13_140 = arith.constant 13 : index
    %c0_141 = arith.constant 0 : index
    %c0_142 = arith.constant 0 : index
    %196 = vector.load %arg4[%c13_140, %c0_141, %c0_142] : memref<16x256x128xbf16, #tpu.memory_space<vmem>>, vector<1x256x128xbf16>
    %197 = vector.shape_cast %196 : vector<1x256x128xbf16> to vector<256x128xbf16>
    %cst_143 = arith.constant dense<0.000000e+00> : vector<1x128xf32>
    %198 = tpu.matmul %195, %197, %cst_143 {dimension_numbers = #tpu.dot_dimension_numbers<[1], [0], [0], [1], [0, 0, 1, 1], [], []>} : vector<1x256xbf16>, vector<256x128xbf16>, vector<1x128xf32> -> vector<1x128xf32>
    %199 = arith.addf %188, %198 : vector<1x128xf32>
    %c28 = arith.constant 28 : index
    %c0_144 = arith.constant 0 : index
    %200 = vector.load %arg7[%c28, %c0_144] : memref<32x512xf32, #tpu.memory_space<vmem>>, vector<1x512xf32>
    %c29 = arith.constant 29 : index
    %c0_145 = arith.constant 0 : index
    %201 = vector.load %arg7[%c29, %c0_145] : memref<32x512xf32, #tpu.memory_space<vmem>>, vector<1x512xf32>
    %202 = arith.maximumf %200, %201 : vector<1x512xf32>
    %203 = vector.extract_strided_slice %202 {offsets = [0, 0], sizes = [1, 256], strides = [1, 1]} : vector<1x512xf32> to vector<1x256xf32>
    %204 = vector.extract_strided_slice %202 {offsets = [0, 256], sizes = [1, 256], strides = [1, 1]} : vector<1x512xf32> to vector<1x256xf32>
    %205 = arith.maximumf %203, %204 : vector<1x256xf32>
    %206 = arith.truncf %205 : vector<1x256xf32> to vector<1x256xbf16>
    %c14_146 = arith.constant 14 : index
    %c0_147 = arith.constant 0 : index
    %c0_148 = arith.constant 0 : index
    %207 = vector.load %arg4[%c14_146, %c0_147, %c0_148] : memref<16x256x128xbf16, #tpu.memory_space<vmem>>, vector<1x256x128xbf16>
    %208 = vector.shape_cast %207 : vector<1x256x128xbf16> to vector<256x128xbf16>
    %cst_149 = arith.constant dense<0.000000e+00> : vector<1x128xf32>
    %209 = tpu.matmul %206, %208, %cst_149 {dimension_numbers = #tpu.dot_dimension_numbers<[1], [0], [0], [1], [0, 0, 1, 1], [], []>} : vector<1x256xbf16>, vector<256x128xbf16>, vector<1x128xf32> -> vector<1x128xf32>
    %210 = arith.addf %199, %209 : vector<1x128xf32>
    %c30 = arith.constant 30 : index
    %c0_150 = arith.constant 0 : index
    %211 = vector.load %arg7[%c30, %c0_150] : memref<32x512xf32, #tpu.memory_space<vmem>>, vector<1x512xf32>
    %c31 = arith.constant 31 : index
    %c0_151 = arith.constant 0 : index
    %212 = vector.load %arg7[%c31, %c0_151] : memref<32x512xf32, #tpu.memory_space<vmem>>, vector<1x512xf32>
    %213 = arith.maximumf %211, %212 : vector<1x512xf32>
    %214 = vector.extract_strided_slice %213 {offsets = [0, 0], sizes = [1, 256], strides = [1, 1]} : vector<1x512xf32> to vector<1x256xf32>
    %215 = vector.extract_strided_slice %213 {offsets = [0, 256], sizes = [1, 256], strides = [1, 1]} : vector<1x512xf32> to vector<1x256xf32>
    %216 = arith.maximumf %214, %215 : vector<1x256xf32>
    %217 = arith.truncf %216 : vector<1x256xf32> to vector<1x256xbf16>
    %c15_152 = arith.constant 15 : index
    %c0_153 = arith.constant 0 : index
    %c0_154 = arith.constant 0 : index
    %218 = vector.load %arg4[%c15_152, %c0_153, %c0_154] : memref<16x256x128xbf16, #tpu.memory_space<vmem>>, vector<1x256x128xbf16>
    %219 = vector.shape_cast %218 : vector<1x256x128xbf16> to vector<256x128xbf16>
    %cst_155 = arith.constant dense<0.000000e+00> : vector<1x128xf32>
    %220 = tpu.matmul %217, %219, %cst_155 {dimension_numbers = #tpu.dot_dimension_numbers<[1], [0], [0], [1], [0, 0, 1, 1], [], []>} : vector<1x256xbf16>, vector<256x128xbf16>, vector<1x128xf32> -> vector<1x128xf32>
    %221 = arith.addf %210, %220 : vector<1x128xf32>
    %c0_156 = arith.constant 0 : index
    %c0_157 = arith.constant 0 : index
    %222 = vector.load %arg5[%c0_156, %c0_157] : memref<1x128xf32, #tpu.memory_space<vmem>>, vector<1x128xf32>
    %223 = arith.addf %221, %222 : vector<1x128xf32>
    %224 = vector.shape_cast %223 : vector<1x128xf32> to vector<1x1x128xf32>
    %c0_158 = arith.constant 0 : index
    %c0_159 = arith.constant 0 : index
    %c0_160 = arith.constant 0 : index
    %225 = vector.load %arg6[%c0_158, %c0_159, %c0_160] : memref<1x1x128xf32, #tpu.memory_space<vmem>>, vector<1x1x128xf32>
    tpu.vector_store %arg6[%c0_158, %c0_159, %c0_160], %224 {strides = array<i32>} : memref<1x1x128xf32, #tpu.memory_space<vmem>>, vector<1x1x128xf32>,
    return
  }
  func.func @transform_0(%arg0: i32) -> (i32, i32, i32) {
    %c0_i32 = arith.constant 0 : i32
    %c0_i32_0 = arith.constant 0 : i32
    %c0_i32_1 = arith.constant 0 : i32
    return %arg0, %c0_i32, %c0_i32_0 : i32, i32, i32
  }
  func.func @transform_1(%arg0: i32) -> (i32, i32, i32) {
    %c0_i32 = arith.constant 0 : i32
    %c0_i32_0 = arith.constant 0 : i32
    %c0_i32_1 = arith.constant 0 : i32
    %c0_i32_2 = arith.constant 0 : i32
    return %c0_i32, %c0_i32_0, %c0_i32_1 : i32, i32, i32
  }
  func.func @transform_2(%arg0: i32) -> (i32, i32) {
    %c0_i32 = arith.constant 0 : i32
    %c0_i32_0 = arith.constant 0 : i32
    %c0_i32_1 = arith.constant 0 : i32
    return %c0_i32, %c0_i32_0 : i32, i32
  }
  func.func @transform_3(%arg0: i32) -> (i32, i32, i32) {
    %c0_i32 = arith.constant 0 : i32
    %c0_i32_0 = arith.constant 0 : i32
    %c0_i32_1 = arith.constant 0 : i32
    %c0_i32_2 = arith.constant 0 : i32
    return %c0_i32, %c0_i32_0, %c0_i32_1 : i32, i32, i32
  }
  func.func @transform_4(%arg0: i32) -> (i32, i32) {
    %c0_i32 = arith.constant 0 : i32
    %c0_i32_0 = arith.constant 0 : i32
    %c0_i32_1 = arith.constant 0 : i32
    return %c0_i32, %c0_i32_0 : i32, i32
  }
  func.func @transform_5(%arg0: i32) -> (i32, i32, i32) {
    %c0_i32 = arith.constant 0 : i32
    %c0_i32_0 = arith.constant 0 : i32
    %c0_i32_1 = arith.constant 0 : i32
    return %arg0, %c0_i32, %c0_i32_0 : i32, i32, i32
  }
}

</mosaic_0001>

<bundles_post_ra>
// kernel: conv_basic_forward.1
= control target key start
LH: loop header
LB: loop body
LE: loop exit
PB: predicated region body
PF: predicated region fallthrough
CT: control target
= control target key end

     0   :  { %10 = vsyncpa [#allocation4], 0  ;;  %s10410_s0 = inlined_call_operand.vmem [shape: bf16[2,36,288], index: 0, kind: input, shape index: {}]   ;;  %s10411_s1 = inlined_call_operand.hbm [shape: bf16[5,288,512], index: 1, kind: input, shape index: {}]   ;;  %s10412_s2 = inlined_call_operand.hbm [shape: f32[1,512], index: 2, kind: input, shape index: {}]   ;;  %s10413_s3 = inlined_call_operand.hbm [shape: bf16[16,256,128], index: 3, kind: input, shape index: {}]   ;;  %s10414_s4 = inlined_call_operand.hbm [shape: f32[1,128], index: 4, kind: input, shape index: {}]   ;;  %s10415_s5 = inlined_call_operand.hbm [shape: f32[2,1,128], index: 5, kind: output, shape index: {}]  }
   0x1   :  { %11 = vsyncpa [#allocation7], 0 }
   0x2   :  { %12 = vsyncpa [#allocation10], 0 }
   0x3   :  { %13 = vsyncpa [#allocation5], 0 }
   0x4   :  { %15 = vsyncpa [#allocation5 + $0x1], 0  ;;  %s9594_s18 = smov 0   ;;  %s9596_s19 = smov 0  }
   0x5   :  { %s9598_s20 = smov 0   ;;  %s9600_s21 = smov 0  }
   0x6 LB: > { %s9615_s22 = sadd.s32 4294967295, %s9552_s21   ;;  %s7409_s23 = sadd.s32 4294967294, %s9552_s21   ;;  %s9552_s21 = sphi %s9600_s21, %s10465_s21   ;;  %s9548_s20 = sphi %s9598_s20, %s10464_s20   ;;  %s9544_s19 = sphi %s9596_s19, %s10463_s19   ;;  %s9540_s18 = sphi %s9594_s18, %s10462_s18  }
   0x7   : > { %s9619_s24 = sadd.s32 1, %s9552_s21   ;;  %s138_s25 = sadd.s32 1, %s9548_s20 }
   0x8   : > { %s135_s26 = ssub.s32 %s9552_s21, %s9619_s24  ;;  %p148_p0 = scmp.ne.s32.totalorder %s9548_s20, %s9544_s19 }
   0x9   : > { %p136_p1 = scmp.eq.s32.totalorder %s135_s26, 0  ;;  %p149_p2 = scmp.eq.s32.totalorder %s9615_s22, 1 }
   0xa   : > { %p154_p3 = scmp.ne.s32.totalorder %s9544_s19, %s9540_s18  ;;  %p155_p4 = scmp.eq.s32.totalorder %s7409_s23, 1 }
   0xb   : > { %s9630_s27 = scalar_select %p136_p1, %s9548_s20, %s138_s25  }
   0xc   : > { %p9632_p5 = por %p149_p2, %p148_p0  ;;  %p9636_p6 = por %p155_p4, %p154_p3 }
   0xd   : > { %p7410_p7 = scmp.ge.s32.totalorder %s9552_s21, 1  ;;  %p162_p8 = scmp.lt.s32.totalorder %s9552_s21, 3 }
   0xe   : > { %s10419_s28 = scalar_select %p9632_p5, 1, 0 }
   0xf   : > { %s10420_s29 = scalar_select %p9636_p6, 1, 0 }
  0x10   : > { %p10416_p9 = scmp.eq.s32.totalorder %s9615_s22, 0  ;;  %p9643_p10 = pnand %p7410_p7, %p162_p8 }
  0x11   : > { %s9554_s6 = smov [#allocation6]   ;;  %s9555_s8 = smov [#allocation3]  }
  0x12   : > { %s10421_s30 = scalar_select %p9643_p10, 1, 0 }
  0x13   : > { %s188_s7 = sshll.u32 %s9554_s6, 4  ;;  %p8474_p11 = pneg %p9643_p10  ;;  %s189_s7 = int_to_ptr.vmem [resolvable:$true] %s188_s7 }
  0x14   : > { %s174_s9 = sshll.u32 %s9555_s8, 4  ;;  %s9556_s11 = smov [#allocation8]   ;;  %s175_s9 = int_to_ptr.vmem [resolvable:$true] %s174_s9 }
  0x15   : > { %p9651_p12 = pnand %p10416_p9, %p8474_p11  ;;  %s198_s12 = sshll.u32 %s9556_s11, 4  ;;  %s199_s12 = int_to_ptr.vmem [resolvable:$true] %s198_s12 }
  0x16   : > { %s9387_s13 = scalar_lea.vmem %s189_s7, 64  ;;  %p9395_p3 = scmp.lt.s32.totalorder %s189_s7, %s189_s7 }
  0x17   : > { %p9378_p13 = pneg %p9651_p12  ;;  %p9388_p0 = scmp.ne.s32.totalorder %s189_s7, %s9387_s13 }
  0x18   : > { %p9396_p4 = scmp.lt.s32.totalorder %s9387_s13, %s9387_s13 }
  0x19   : > { %p9390_p1 = pnand %p9388_p0, %p9378_p13 }
  0x1a   : > { %p9397_p7 = por %p9396_p4, %p9395_p3 }
  0x1b   : > { %p9391_p2 = pneg %p9390_p1 }
  0x1d   : > { %p9398_p8 = pnand %p9397_p7, %p9391_p2 }
  0x1f   : > { %9401 = shalt.err (!%p9398_p8)
}
  0x20   : > { %8480 = dma.hbm_to_vmem [thread:$0]  (!%p9651_p12), %s10412_s2, 64, %s189_s7, [#allocation7]  }
  0x21   : > { %s9413_s16 = scalar_lea.vmem %s175_s9, 46080  ;;  %p9421_p0 = scmp.lt.s32.totalorder %s175_s9, %s175_s9 }
  0x22   : > { %p9414_p11 = scmp.ne.s32.totalorder %s175_s9, %s9413_s16  ;;  %p9422_p1 = scmp.lt.s32.totalorder %s9413_s16, %s9413_s16 }
  0x24   : > { %p9416_p9 = pnand %p9414_p11, %p9378_p13  ;;  %p9423_p5 = por %p9422_p1, %p9421_p0 }
  0x26   : > { %p9417_p6 = pneg %p9416_p9 }
  0x28   : > { %p9424_p10 = pnand %p9423_p5, %p9417_p6 }
  0x2a   : > { %9427 = shalt.err (!%p9424_p10)
}
  0x2b   : > { %s9557_s17 = smov 256   ;;  %s9558_s23 = smov 16  }
  0x2c   : > { %8477 = dma.hbm_to_vmem [thread:$0]  (!%p9651_p12), %s10411_s1, 46080, %s175_s9, [#allocation4], %s9557_s17, %s9557_s17, %s9558_s23  }
  0x2d   : > { %s9439_s6 = scalar_lea.vmem %s199_s12, 32768  ;;  %p9447_p4 = scmp.lt.s32.totalorder %s199_s12, %s199_s12 }
  0x2e   : > { %p9440_p2 = scmp.ne.s32.totalorder %s199_s12, %s9439_s6  ;;  %p9448_p7 = scmp.lt.s32.totalorder %s9439_s6, %s9439_s6 }
  0x30   : > { %p9442_p9 = pnand %p9440_p2, %p9378_p13  ;;  %p9449_p5 = por %p9448_p7, %p9447_p4 }
  0x32   : > { %p9443_p3 = pneg %p9442_p9 }
  0x34   : > { %p9450_p6 = pnand %p9449_p5, %p9443_p3 }
  0x36   : > { %9453 = shalt.err (!%p9450_p6)
}
  0x37   : > { %s9559_s7 = smov 64   ;;  %s9560_s8 = smov 4  }
  0x38   : > { %8483 = dma.hbm_to_vmem [thread:$0]  (!%p9651_p12), %s10413_s3, 32768, %s199_s12, [#allocation7], %s9559_s7, %s9559_s7, %s9560_s8  }
  0x39   : > { %s9561_s9 = smov [#allocation9]  }
  0x3a   : > { %s212_s14 = sshll.u32 %s9561_s9, 4  ;;  %s213_s14 = int_to_ptr.vmem [resolvable:$true] %s212_s14 }
  0x3b   : > { %s9465_s15 = scalar_lea.vmem %s213_s14, 16  ;;  %s9472_s16 = scalar_lea.vmem %s213_s14, 32 }
  0x3c   : > { %p9466_p10 = scmp.ne.s32.totalorder %s213_s14, %s9465_s15  ;;  %p9473_p0 = scmp.lt.s32.totalorder %s213_s14, %s213_s14 }
  0x3d   : > { %p9474_p1 = scmp.lt.s32.totalorder %s9472_s16, %s9465_s15 }
  0x3e   : > { %p9468_p8 = pnand %p9466_p10, %p9378_p13 }
  0x3f   : > { %p9475_p2 = por %p9474_p1, %p9473_p0 }
  0x40   : > { %p9469_p11 = pneg %p9468_p8 }
  0x42   : > { %p9476_p9 = pnand %p9475_p2, %p9469_p11 }
  0x44   : > { %9479 = shalt.err (!%p9476_p9)
}
  0x45   : > { %8486 = dma.hbm_to_vmem [thread:$0]  (!%p9651_p12), %s10414_s4, 16, %s213_s14, [#allocation10]  }
  0x46   : > { %p10423_p3 = scmp.ne.s32.totalorder %s10421_s30, 0 }
  0x48   : > { %233 = sbr.rel (%p10423_p3) target bundleno = 1149 (0x47d), region = 40 }
  0x4d   : > { %p10424_p4 = scmp.eq.s32.totalorder %s9615_s22, 0 }
  0x4f   : > { %9523 = dma.done.wait (%p10424_p4), [#allocation4], 46080   ;;  %p10425_p13 = pmov %p10424_p4 }
  0x50   : > { %p10426_p7 = pmov %p10424_p4 }
  0x51   : > { %9525 = vsyncadd (%p10425_p13), [#allocation4], 4294921216 }
  0x52   : > { %9527 = dma.done.wait (%p10426_p7), [#allocation7], 32832   ;;  %p10427_p5 = pmov %p10424_p4 }
  0x53   : > { %p10428_p6 = pmov %p10424_p4 }
  0x54   : > { %9529 = vsyncadd (%p10427_p5), [#allocation7], 4294934464 }
  0x55   : > { %9531 = dma.done.wait (%p10428_p6), [#allocation10], 16   ;;  %p10429_p12 = pmov %p10424_p4 }
  0x56   : > { %p272_p10 = scmp.lt.s32.totalorder %s9615_s22, 1  ;;  %v9562_v0 = vmov 0   ;;  %v8541_v1 = vld [vmem:[#allocation3 + $0xe4] ss:$16 sps:$4 sm:$0xff]   ;;  %v8545_v3 = vld [vmem:[#allocation3 + $0xe0] ss:$16 sps:$4 sm:$0xff]  }
  0x57   : > { %9533 = vsyncadd (%p10429_p12), [#allocation10], 4294967280  ;;  %840 = vmatprep.mubr.bf16.mxu1 %v9562_v0  ;;  %v8543_v2 = vld [vmem:[#allocation3 + $0x224] ss:$16 sps:$4 sm:$0xff]   ;;  %755 = vmatprep.subr.bf16.mxu0 %v8541_v1  ;;  %v8546_v4 = vld [vmem:[#allocation3 + $0x220] ss:$16 sps:$4 sm:$0xff]  }
  0x58   : > { %s273_s30 = scalar_select %p272_p10, %s9615_s22, 1  ;;  %820 = vmatprep.subr.bf16.mxu1 %v8543_v2  ;;  %v8547_v5 = vld [vmem:[#allocation3 + $0xc4] ss:$16 sps:$4 sm:$0xff]   ;;  %756 = vmatpush1.bf16.msra.mxu0 %v8545_v3  ;;  %v8551_v7 = vld [vmem:[#allocation3 + $0xc0] ss:$16 sps:$4 sm:$0xff]   ;;  %vm748_vm0 = vcmask 261120  }
  0x59   : > { %821 = vmatpush1.bf16.msra.mxu1 %v8546_v4  ;;  %v8549_v6 = vld [vmem:[#allocation3 + $0x204] ss:$16 sps:$4 sm:$0xff]   ;;  %757 = vmatprep.subr.bf16.mxu0 %v8547_v5  ;;  %v8552_v8 = vld [vmem:[#allocation3 + $0x200] ss:$16 sps:$4 sm:$0xff]   ;;  %v8555_v10 = vld [vmem:[#allocation3 + $0xe8] ss:$16 sps:$4 sm:$0xff]  }
  0x5a   : > { %s8455_s10 = smul.u32 60, %s273_s30  ;;  %822 = vmatprep.subr.bf16.mxu1 %v8549_v6  ;;  %v8553_v9 = vld [vmem:[#allocation3 + $0xa4] ss:$16 sps:$4 sm:$0xff]   ;;  %v8557_v11 = vld [vmem:[#allocation3 + $0xec] ss:$16 sps:$4 sm:$0xff]   ;;  %vm1908_vm2 = vcmask 1046528  }
  0x5b   : > { %v8558_v12 = vld [vmem:[#allocation3 + $0xa0] ss:$16 sps:$4 sm:$0xff]   ;;  %v8560_v14 = vld [vmem:[#allocation3 + $0x84] ss:$16 sps:$4 sm:$0xff]   ;;  %v8562_v15 = vld [vmem:[#allocation3 + $0xc8] ss:$16 sps:$4 sm:$0xff]  }
  0x5c   : > { %s9709_s26 = scalar_lea.vmem %s10410_s0, %s8455_s10  ;;  %758 = vmatpush1.bf16.msra.mxu0 %v8551_v7  ;;  %v8564_v16 = vld [vmem:[#allocation3 + $0xcc] ss:$16 sps:$4 sm:$0xff]   ;;  %v8565_v17 = vld [vmem:[#allocation3 + $0x80] ss:$16 sps:$4 sm:$0xff]   ;;  %v8566_v18 = vld [vmem:[#allocation3 + $0x64] ss:$16 sps:$4 sm:$0xff]  }
  0x5d   : > { %823 = vmatpush1.bf16.msra.mxu1 %v8552_v8  ;;  %v9712_v13 = vld [vmem:[%s9709_s26 + $0x8] ss:$12 sps:$4 sm:$0xff]   ;;  %759 = vmatprep.subr.bf16.mxu0 %v8553_v9  ;;  %v8570_v19 = vld [vmem:[#allocation3 + $0xac] ss:$16 sps:$4 sm:$0xff]   ;;  %v8571_v21 = vld [vmem:[#allocation3 + $0x60] ss:$16 sps:$4 sm:$0xff]  }
  0x5e   : > { %861 = vmatprep.subr.bf16.mxu1 %v8557_v11  ;;  %v8568_v20 = vld [vmem:[#allocation3 + $0xa8] ss:$16 sps:$4 sm:$0xff]   ;;  %v8572_v22 = vld [vmem:[#allocation3 + $0x44] ss:$16 sps:$4 sm:$0xff]   ;;  %v8576_v23 = vld [vmem:[#allocation3 + $0x8c] ss:$16 sps:$4 sm:$0xff]  }
  0x5f   : > { %v8574_v24 = vld [vmem:[#allocation3 + $0x88] ss:$16 sps:$4 sm:$0xff]   ;;  %v8577_v25 = vld [vmem:[#allocation3 + $0x40] ss:$16 sps:$4 sm:$0xff]   ;;  %v8578_v26 = vld [vmem:[#allocation3 + $0x24] ss:$16 sps:$4 sm:$0xff]  }
  0x60   : > { %7500 = vmatmul.mubr.msk.bf16.vlgmr.msra.gmra.mxu1 %vm748_vm0, %v9712_v13  ;;  %760 = vmatpush1.bf16.msra.mxu0 %v8558_v12  ;;  %v8582_v27 = vld [vmem:[#allocation3 + $0x6c] ss:$16 sps:$4 sm:$0xff]   ;;  %v8580_v28 = vld [vmem:[#allocation3 + $0x68] ss:$16 sps:$4 sm:$0xff]   ;;  %v8583_v29 = vld [vmem:[#allocation3 + $0x20] ss:$16 sps:$4 sm:$0xff]  }
  0x61   : > { %862 = vmatpush1.bf16.msra.mxu1 %v8555_v10  ;;  %761 = vmatprep.subr.bf16.mxu0 %v8560_v14  ;;  %v8584_v30 = vld [vmem:[#allocation3 + $0x4] ss:$16 sps:$4 sm:$0xff]   ;;  %v8588_v31 = vld [vmem:[#allocation3 + $0x4c] ss:$16 sps:$4 sm:$0xff]   ;;  %v8586_v32 = vld [vmem:[#allocation3 + $0x48] ss:$16 sps:$4 sm:$0xff]  }
  0x62   : > { %863 = vmatprep.subr.bf16.mxu1 %v8564_v16  ;;  %850 = vmatprep.mubr.bf16.mxu1 %v9562_v0  ;;  %v8589_v33 = vld [vmem:[#allocation3] ss:$16 sps:$4 sm:$0xff]   ;;  %v8590_v34 = vld [vmem:[#allocation3 + $0x1e4] ss:$16 sps:$4 sm:$0xff]   ;;  %v8594_v35 = vld [vmem:[#allocation3 + $0x2c] ss:$16 sps:$4 sm:$0xff]  }
  0x63   : > { %v8592_v36 = vld [vmem:[#allocation3 + $0x28] ss:$16 sps:$4 sm:$0xff]   ;;  %v8595_v37 = vld [vmem:[#allocation3 + $0x1e0] ss:$16 sps:$4 sm:$0xff]   ;;  %v8596_v38 = vld [vmem:[#allocation3 + $0x1c4] ss:$16 sps:$4 sm:$0xff]  }
  0x64   : > { %762 = vmatpush1.bf16.msra.mxu0 %v8565_v17  ;;  %v8600_v39 = vld [vmem:[#allocation3 + $0xc] ss:$16 sps:$4 sm:$0xff]   ;;  %v8598_v40 = vld [vmem:[#allocation3 + $0x8] ss:$16 sps:$4 sm:$0xff]   ;;  %v8601_v41 = vld [vmem:[#allocation3 + $0x1c0] ss:$16 sps:$4 sm:$0xff]  }
  0x65   : > { %864 = vmatpush1.bf16.msra.mxu1 %v8562_v15  ;;  %763 = vmatprep.subr.bf16.mxu0 %v8566_v18  ;;  %v8602_v42 = vld [vmem:[#allocation3 + $0x1a4] ss:$16 sps:$4 sm:$0xff]   ;;  %v8606_v43 = vld [vmem:[#allocation3 + $0x1ec] ss:$16 sps:$4 sm:$0xff]   ;;  %v8604_v44 = vld [vmem:[#allocation3 + $0x1e8] ss:$16 sps:$4 sm:$0xff]  }
  0x66   : > { %865 = vmatprep.subr.bf16.mxu1 %v8570_v19  ;;  %v8607_v45 = vld [vmem:[#allocation3 + $0x1a0] ss:$16 sps:$4 sm:$0xff]   ;;  %v8608_v46 = vld [vmem:[#allocation3 + $0x184] ss:$16 sps:$4 sm:$0xff]   ;;  %v8612_v47 = vld [vmem:[#allocation3 + $0x1cc] ss:$16 sps:$4 sm:$0xff]  }
  0x67   : > { %v8610_v48 = vld [vmem:[#allocation3 + $0x1c8] ss:$16 sps:$4 sm:$0xff]   ;;  %v8613_v49 = vld [vmem:[#allocation3 + $0x180] ss:$16 sps:$4 sm:$0xff]   ;;  %v8614_v50 = vld [vmem:[#allocation3 + $0x164] ss:$16 sps:$4 sm:$0xff]  }
  0x68   : > { %764 = vmatpush1.bf16.msra.mxu0 %v8571_v21  ;;  %v9718_v51 = vld [vmem:[%s9709_s26 + $0x4] ss:$12 sps:$4 sm:$0xff]   ;;  %v8618_v52 = vld [vmem:[#allocation3 + $0x1ac] ss:$16 sps:$4 sm:$0xff]   ;;  %v8616_v53 = vld [vmem:[#allocation3 + $0x1a8] ss:$16 sps:$4 sm:$0xff]  }
  0x69   : > { %866 = vmatpush1.bf16.msra.mxu1 %v8568_v20  ;;  %765 = vmatprep.subr.bf16.mxu0 %v8572_v22  ;;  %v8619_v54 = vld [vmem:[#allocation3 + $0x160] ss:$16 sps:$4 sm:$0xff]   ;;  %v8620_v56 = vld [vmem:[#allocation3 + $0x144] ss:$16 sps:$4 sm:$0xff]   ;;  %v8624_v57 = vld [vmem:[#allocation3 + $0x18c] ss:$16 sps:$4 sm:$0xff]  }
  0x6a   : > { %867 = vmatprep.subr.bf16.mxu1 %v8576_v23  ;;  %787 = vmatprep.mubr.bf16.mxu0 %v9718_v51  ;;  %v9722_v55 = vld [vmem:[%s9709_s26 + $0x20] ss:$12 sps:$4 sm:$0xff]   ;;  %v8622_v58 = vld [vmem:[#allocation3 + $0x188] ss:$16 sps:$4 sm:$0xff]   ;;  %v8626_v60 = vld [vmem:[#allocation3 + $0x124] ss:$16 sps:$4 sm:$0xff]  }
  0x6b   : > { %7501 = vmatmul.mubr.msk.bf16.gmra.mxu1 %vm748_vm0, %v9722_v55  ;;  %v8625_v59 = vld [vmem:[#allocation3 + $0x140] ss:$16 sps:$4 sm:$0xff]   ;;  %v8630_v61 = vld [vmem:[#allocation3 + $0x16c] ss:$16 sps:$4 sm:$0xff]   ;;  %v8628_v62 = vld [vmem:[#allocation3 + $0x168] ss:$16 sps:$4 sm:$0xff]  }
  0x6c   : > { %766 = vmatpush1.bf16.msra.mxu0 %v8577_v25  ;;  %893 = vmatprep.mubr.bf16.mxu1 %v9718_v51  ;;  %v8631_v63 = vld [vmem:[#allocation3 + $0x120] ss:$16 sps:$4 sm:$0xff]   ;;  %v8632_v1 = vld [vmem:[#allocation3 + $0x104] ss:$16 sps:$4 sm:$0xff]   ;;  %v8636_v2 = vld [vmem:[#allocation3 + $0x14c] ss:$16 sps:$4 sm:$0xff]  }
  0x6d   : > { %868 = vmatpush1.bf16.msra.mxu1 %v8574_v24  ;;  %767 = vmatprep.subr.bf16.mxu0 %v8578_v26  ;;  %v8634_v3 = vld [vmem:[#allocation3 + $0x148] ss:$16 sps:$4 sm:$0xff]   ;;  %v8637_v4 = vld [vmem:[#allocation3 + $0x100] ss:$16 sps:$4 sm:$0xff]   ;;  %v8643_v5 = vld [vmem:[#allocation3 + $0x12c] ss:$16 sps:$4 sm:$0xff]  }
  0x6e   : > { %869 = vmatprep.subr.bf16.mxu1 %v8582_v27  ;;  %v8646_v6 = vld [vmem:[#allocation3 + $0x22c] ss:$16 sps:$4 sm:$0xff]   ;;  %v8641_v8 = vld [vmem:[#allocation3 + $0x128] ss:$16 sps:$4 sm:$0xff]   ;;  %v8659_v16 = vld [vmem:[#allocation3 + $0x324] ss:$16 sps:$4 sm:$0xff]  }
  0x6f   : > { %v9728_v7 = vld [vmem:[%s9709_s26] ss:$12 sps:$4 sm:$0xff]   ;;  %v8644_v9 = vld [vmem:[#allocation3 + $0x228] ss:$16 sps:$4 sm:$0xff]   ;;  %v8668_v17 = vld [vmem:[#allocation3 + $0x464] ss:$16 sps:$4 sm:$0xff]  }
  0x70   : > { %768 = vmatpush1.bf16.msra.mxu0 %v8583_v29  ;;  %v8650_v10 = vld [vmem:[#allocation3 + $0x10c] ss:$16 sps:$4 sm:$0xff]   ;;  %v8648_v14 = vld [vmem:[#allocation3 + $0x108] ss:$16 sps:$4 sm:$0xff]   ;;  %v1116_v19 = vshll.u32 %v9718_v51, 16  ;;  %v1114_v22 = vshrl.u32 %v9718_v51, 16 }
  0x71   : > { %870 = vmatpush1.bf16.msra.mxu1 %v8580_v28  ;;  %769 = vmatprep.subr.bf16.mxu0 %v8584_v30  ;;  %v9731_v11 = vld [vmem:[%s9709_s26 + $0x1c] ss:$12 sps:$4 sm:$0xff]   ;;  %v9736_v18 = vld [vmem:[%s9709_s26 + $0x18] ss:$12 sps:$4 sm:$0xff]   ;;  %v8657_v20 = vld [vmem:[#allocation3 + $0x320] ss:$16 sps:$4 sm:$0xff]  }
  0x72   : > { %871 = vmatprep.subr.bf16.mxu1 %v8588_v31  ;;  %v8656_v12 = vld [vmem:[#allocation3 + $0x20c] ss:$16 sps:$4 sm:$0xff]   ;;  %v8654_v15 = vld [vmem:[#allocation3 + $0x208] ss:$16 sps:$4 sm:$0xff]   ;;  %v8662_v21 = vld [vmem:[#allocation3 + $0x304] ss:$16 sps:$4 sm:$0xff]  }
  0x73   : > { %v1118_v23 = vrot.slane %v1116_v19, 1  ;;  %v1121_v24 = vshll.u32 %v9731_v11, 16  ;;  %v8660_v25 = vld [vmem:[#allocation3 + $0x300] ss:$16 sps:$4 sm:$0xff]   ;;  %v8665_v26 = vld [vmem:[#allocation3 + $0x2e4] ss:$16 sps:$4 sm:$0xff]  }
  0x74   : > { %770 = vmatpush1.bf16.msra.mxu0 %v8589_v33  ;;  %v8663_v27 = vld [vmem:[#allocation3 + $0x2e0] ss:$16 sps:$4 sm:$0xff]   ;;  %v8687_v31 = vld [vmem:[%s9709_s26 + $0x8] ss:$12 sps:$4 sm:$0xff]   ;;  %vm1100_vm1 = vsmask.f32 7424 }
  0x75   : > { %872 = vmatpush1.bf16.msra.mxu1 %v8586_v32  ;;  %771 = vmatprep.subr.bf16.mxu0 %v8590_v34  ;;  %v8666_v28 = vld [vmem:[#allocation3 + $0x460] ss:$16 sps:$4 sm:$0xff]   ;;  %v1119_v29 = vor.u32 %v1118_v23, %v1114_v22  ;;  %v9745_v30 = vrot.slane %v1121_v24, 1  ;;  %v8671_v32 = vld [vmem:[#allocation3 + $0x2c4] ss:$16 sps:$4 sm:$0xff]   ;;  %vm3497_vm4 = vcmask 1045504  }
  0x76   : > { %873 = vmatprep.subr.bf16.mxu1 %v8594_v35  ;;  %v8669_v33 = vld [vmem:[#allocation3 + $0x2c0] ss:$16 sps:$4 sm:$0xff]   ;;  %v8677_v34 = vld [vmem:[#allocation3 + $0x444] ss:$16 sps:$4 sm:$0xff]   ;;  %v8721_v19 = vld [vmem:[#allocation3 + $0x26c] ss:$16 sps:$4 sm:$0xff]  }
  0x77   : > { %v8675_v35 = vld [vmem:[#allocation3 + $0x440] ss:$16 sps:$4 sm:$0xff]   ;;  %v8727_v23 = vld [vmem:[#allocation3 + $0x24c] ss:$16 sps:$4 sm:$0xff]   ;;  %v8730_v24 = vld [vmem:[#allocation3 + $0x384] ss:$16 sps:$4 sm:$0xff]  }
  0x78   : > { %772 = vmatpush2.bf16.msra.mxu0 %v8595_v37  ;;  %v8688_v37 = vld [vmem:[%s9709_s26 + $0x20] ss:$12 sps:$4 sm:$0xff]   ;;  %vm2671_vm3 = vsmask.f32 6400  ;;  %s270_s6 = sand.u32 1, %s9544_s19   ;;  %s8100_s7 = sshll.u32 %s9615_s22, 4 }
  0x79   : > { %874 = vmatpush1.bf16.msra.mxu1 %v8592_v36  ;;  %773 = vmatprep.subr.bf16.mxu0 %v8596_v38  ;;  %v9753_v36 = vsel %vm1100_vm1, %v1119_v29, %v9745_v30  ;;  %v1128_v38 = vshll.u32 %v8687_v31, 16  ;;  %v8722_v22 = vld [vmem:[#allocation3 + $0x3a0] ss:$16 sps:$4 sm:$0xff]   ;;  %v8733_v29 = vld [vmem:[#allocation3 + $0x42c] ss:$16 sps:$4 sm:$0xff]   ;;  %s271_s8 = scalar_lea.vmem [#allocation11], %s270_s6  ;;  %s7311_s14 = scalar_lea.hbm %s10415_s5, %s8100_s7 }
  0x7a   : > { %875 = vmatprep.subr.bf16.mxu1 %v8600_v39  ;;  %v8674_v39 = vld [vmem:[#allocation3 + $0x2a4] ss:$16 sps:$4 sm:$0xff]   ;;  %s7313_s11 = sshll.u32 %s271_s8, 4  ;;  %s7301_s15 = scalar_lea.sflag [#allocation5], %s270_s6  ;;  %s7314_s11 = int_to_ptr.vmem [resolvable:$true] %s7313_s11 }
  0x7b   : > { %s9480_s16 = scalar_lea.vmem %s7314_s11, 16  ;;  %p10460_p11 = scmp.ne.s32.totalorder %s10419_s28, 0 }
  0x7c   : > { %774 = vmatpush2.bf16.msra.mxu0 %v8601_v41  ;;  %v1126_v41 = vshrl.u32 %v8687_v31, 16  ;;  %v8736_v31 = vld [vmem:[#allocation3 + $0x364] ss:$16 sps:$4 sm:$0xff]   ;;  %p9481_p8 = scmp.ne.s32.totalorder %s7314_s11, %s9480_s16  ;;  %s9563_s17 = smov [#allocation11]  }
  0x7d   : > { %876 = vmatpush1.bf16.msra.mxu1 %v8598_v40  ;;  %775 = vmatprep.subr.bf16.mxu0 %v8602_v42  ;;  %v8683_v40 = vld [vmem:[#allocation3 + $0x32c] ss:$16 sps:$4 sm:$0xff]   ;;  %v1130_v42 = vrot.slane %v1128_v38, 1  ;;  %v1145_v38 = vshrl.u32 %v9731_v11, 16  ;;  %s9484_s23 = sshll.u32 %s9563_s17, 4  ;;  %s9485_s23 = int_to_ptr.vmem [resolvable:$false] %s9484_s23 }
  0x7e   : > { %877 = vmatprep.subr.bf16.mxu1 %v8606_v43  ;;  %v1133_v43 = vshll.u32 %v8688_v37, 16  ;;  %p9482_p0 = pnand %p9481_p8, %p10460_p11  ;;  %s9486_s22 = scalar_lea.vmem %s9485_s23, 32 }
  0x7f   : > { %p9487_p2 = scmp.lt.s32.totalorder %s7314_s11, %s9485_s23  ;;  %p9488_p9 = scmp.lt.s32.totalorder %s9486_s22, %s9480_s16 }
  0x80   : > { %776 = vmatpush2.bf16.msra.mxu0 %v8607_v45  ;;  %v8678_v45 = vld [vmem:[#allocation3 + $0x280] ss:$16 sps:$4 sm:$0xff]   ;;  %p9483_p1 = pneg %p9482_p0 }
  0x81   : > { %878 = vmatpush2.bf16.msra.mxu1 %v8604_v44  ;;  %777 = vmatprep.subr.bf16.mxu0 %v8608_v46  ;;  %v8680_v44 = vld [vmem:[#allocation3 + $0x284] ss:$16 sps:$4 sm:$0xff]   ;;  %v1131_v46 = vor.u32 %v1130_v42, %v1126_v41  ;;  %v8737_v41 = vld [vmem:[#allocation3 + $0x408] ss:$16 sps:$4 sm:$0xff]   ;;  %v8740_v42 = vld [vmem:[#allocation3 + $0x340] ss:$16 sps:$4 sm:$0xff]   ;;  %p9489_p3 = por %p9488_p9, %p9487_p2 }
  0x82   : > { %879 = vmatprep.subr.bf16.mxu1 %v8612_v47  ;;  %v1135_v47 = vrot.slane %v1133_v43, 1 }
  0x83   : > { %p9490_p4 = pnand %p9489_p3, %p9483_p1 }
  0x84   : > { %778 = vmatpush2.bf16.msra.mxu0 %v8613_v49  ;;  %v8681_v49 = vld [vmem:[#allocation3 + $0x328] ss:$16 sps:$4 sm:$0xff]   ;;  %v9762_v51 = vsel %vm1100_vm1, %v1131_v46, %v1135_v47  ;;  %v1147_v46 = vor.u32 %v1145_v38, %v9745_v30 }
  0x85   : > { %880 = vmatpush2.bf16.msra.mxu1 %v8610_v48  ;;  %779 = vmatprep.subr.bf16.mxu0 %v8614_v50  ;;  %v8686_v48 = vld [vmem:[#allocation3 + $0x264] ss:$16 sps:$4 sm:$0xff]   ;;  %v8684_v50 = vld [vmem:[#allocation3 + $0x260] ss:$16 sps:$4 sm:$0xff]   ;;  %v8746_v30 = vld [vmem:[#allocation3 + $0x3c8] ss:$16 sps:$4 sm:$0xff]  }
  0x86   : > { %881 = vmatprep.subr.bf16.mxu1 %v8618_v52  ;;  %v8691_v52 = vld [vmem:[#allocation3 + $0x30c] ss:$16 sps:$4 sm:$0xff]   ;;  %v8794_v38 = vld [vmem:[#allocation3 + $0x568] ss:$16 sps:$4 sm:$0xff]  }
  0x88   : > { %780 = vmatpush2.bf16.msra.mxu0 %v8619_v54  ;;  %v1153_v54 = vshrl.u32 %v8688_v37, 16  ;;  %v8734_v37 = vld [vmem:[#allocation3 + $0x360] ss:$16 sps:$4 sm:$0xff]  }
  0x89   : > { %882 = vmatpush2.bf16.msra.mxu1 %v8616_v53  ;;  %781 = vmatprep.subr.bf16.mxu0 %v8620_v56  ;;  %v8694_v53 = vld [vmem:[#allocation3 + $0x244] ss:$16 sps:$4 sm:$0xff]   ;;  %v8757_v56 = vld [vmem:[%s9709_s26 + $0x38] ss:$0 sps:$4 sm:$0x11]  }
  0x8a   : > { %883 = vmatprep.subr.bf16.mxu1 %v8624_v57  ;;  %v8692_v57 = vld [vmem:[#allocation3 + $0x240] ss:$16 sps:$4 sm:$0xff]  }
  0x8c   : > { %782 = vmatpush2.bf16.msra.mxu0 %v8625_v59  ;;  %v8700_v59 = vld [vmem:[#allocation3 + $0x424] ss:$16 sps:$4 sm:$0xff]  }
  0x8d   : > { %884 = vmatpush2.bf16.msra.mxu1 %v8622_v58  ;;  %783 = vmatprep.subr.bf16.mxu0 %v8626_v60  ;;  %v8697_v58 = vld [vmem:[#allocation3 + $0x2ec] ss:$16 sps:$4 sm:$0xff]   ;;  %v1155_v60 = vor.u32 %v1153_v54, %v1135_v47 }
  0x8e   : > { %885 = vmatprep.subr.bf16.mxu1 %v8630_v61  ;;  %v1157_v61 = vshll.u32 %v8757_v56, 16  ;;  %v8748_v54 = vld [vmem:[#allocation3 + $0x3cc] ss:$16 sps:$4 sm:$0xff]   ;;  %v8753_v56 = vld [vmem:[#allocation3 + $0x468] ss:$16 sps:$4 sm:$0xff]  }
  0x90   : > { %784 = vmatpush2.bf16.msra.mxu0 %v8631_v63  ;;  %v8698_v63 = vld [vmem:[#allocation3 + $0x420] ss:$16 sps:$4 sm:$0xff]  }
  0x91   : > { %886 = vmatpush2.bf16.msra.mxu1 %v8628_v62  ;;  %785 = vmatprep.subr.bf16.mxu0 %v8632_v1  ;;  %v8695_v62 = vld [vmem:[#allocation3 + $0x2e8] ss:$16 sps:$4 sm:$0xff]   ;;  %v1159_v1 = vrot.slane %v1157_v61, 1  ;;  %v8769_v61 = vld [vmem:[#allocation3 + $0x564] ss:$16 sps:$4 sm:$0xff]  }
  0x92   : > { %887 = vmatprep.subr.bf16.mxu1 %v8636_v2  ;;  %v8703_v2 = vld [vmem:[#allocation3 + $0x2cc] ss:$16 sps:$4 sm:$0xff]  }
  0x94   : > { %786 = vmatpush2.bf16.msra.mxu0 %v8637_v4  ;;  %v9769_v4 = vsel %vm1100_vm1, %v1155_v60, %v1159_v1  ;;  %v8752_v60 = vld [vmem:[#allocation3 + $0x3ac] ss:$16 sps:$4 sm:$0xff]  }
  0x95   : > { %888 = vmatpush2.bf16.msra.mxu1 %v8634_v3  ;;  %926 = vmatprep.subr.bf16.mxu0 %v8646_v6  ;;  %v8706_v3 = vld [vmem:[#allocation3 + $0x404] ss:$16 sps:$4 sm:$0xff]   ;;  %v8704_v6 = vld [vmem:[#allocation3 + $0x400] ss:$16 sps:$4 sm:$0xff]   ;;  %v8760_v1 = vld [vmem:[#allocation3 + $0x38c] ss:$16 sps:$4 sm:$0xff]  }
  0x96   : > { %889 = vmatprep.subr.bf16.mxu1 %v8643_v5  ;;  %v8701_v5 = vld [vmem:[#allocation3 + $0x2c8] ss:$16 sps:$4 sm:$0xff]  }
  0x97   : > { %788 = vmatmul.mubr.bf16.vlgmr.msra.gmra.mxu0 %v9728_v7 }
  0x98   : > { %927 = vmatpush1.bf16.msra.mxu0 %v8644_v9  ;;  %797 = vmatprep.mubr.bf16.mxu0 %v9731_v11  ;;  %v8712_v9 = vld [vmem:[#allocation3 + $0x3e4] ss:$16 sps:$4 sm:$0xff]  }
  0x99   : > { %890 = vmatpush2.bf16.msra.mxu1 %v8641_v8  ;;  %928 = vmatprep.subr.bf16.mxu0 %v8656_v12  ;;  %v8709_v8 = vld [vmem:[#allocation3 + $0x2ac] ss:$16 sps:$4 sm:$0xff]   ;;  %v8710_v12 = vld [vmem:[#allocation3 + $0x3e0] ss:$16 sps:$4 sm:$0xff]  }
  0x9a   : > { %891 = vmatprep.subr.bf16.mxu1 %v8650_v10  ;;  %v8707_v10 = vld [vmem:[#allocation3 + $0x2a8] ss:$16 sps:$4 sm:$0xff]  }
  0x9c   : > { %929 = vmatpush1.bf16.msra.mxu0 %v8654_v15  ;;  %v8718_v15 = vld [vmem:[#allocation3 + $0x3c4] ss:$16 sps:$4 sm:$0xff]  }
  0x9d   : > { %892 = vmatpush2.bf16.msra.mxu1 %v8648_v14  ;;  %1596 = vmatprep.subr.bf16.mxu0 %v8668_v17  ;;  %v8715_v14 = vld [vmem:[#allocation3 + $0x28c] ss:$16 sps:$4 sm:$0xff]   ;;  %v8716_v17 = vld [vmem:[#allocation3 + $0x3c0] ss:$16 sps:$4 sm:$0xff]  }
  0x9e   : > { %1531 = vmatprep.subr.bf16.mxu1 %v8659_v16  ;;  %v8713_v16 = vld [vmem:[#allocation3 + $0x288] ss:$16 sps:$4 sm:$0xff]  }
  0x9f   : > { %798 = vmatmul.mubr.bf16.gmra.mxu0 %v9736_v18 }
  0xa0   : > { %894 = vmatmul.mubr.bf16.vlgmr.msra.gmra.mxu1 %v9728_v7  ;;  %946 = vmatprep.mubr.bf16.mxu0 %v9562_v0 }
  0xa1   : > { %1532 = vmatpush1.bf16.msra.mxu1 %v8657_v20  ;;  %903 = vmatprep.mubr.bf16.mxu1 %v9731_v11  ;;  %v8724_v20 = vld [vmem:[#allocation3 + $0x3a4] ss:$16 sps:$4 sm:$0xff]  }
  0xa2   : > { %1533 = vmatprep.subr.bf16.mxu1 %v8662_v21  ;;  %v8719_v21 = vld [vmem:[#allocation3 + $0x268] ss:$16 sps:$4 sm:$0xff]  }
  0xa5   : > { %1534 = vmatpush1.bf16.msra.mxu1 %v8660_v25  ;;  %v991_v25 = vld [vmem:[%s9709_s26 + $0x30] sm:$0x11] }
  0xa6   : > { %1535 = vmatprep.subr.bf16.mxu1 %v8665_v26  ;;  %v1104_v26 = vshll.u32 %v9728_v7, 16 }
  0xa7   : > { %7502 = vmatmul.mubr.msk.bf16.vlgmr.msra.gmra.mxu0 %vm748_vm0, %v9712_v13  ;;  %v8672_v13 = vld [vmem:[#allocation3 + $0x2a0] ss:$16 sps:$4 sm:$0xff]  }
  0xa8   : > { %904 = vmatmul.mubr.bf16.gmra.mxu1 %v9736_v18  ;;  %1597 = vmatpush1.bf16.msra.mxu0 %v8666_v28  ;;  %v8728_v28 = vld [vmem:[#allocation3 + $0x380] ss:$16 sps:$4 sm:$0xff]  }
  0xa9   : > { %1536 = vmatpush1.bf16.msra.mxu1 %v8663_v27  ;;  %956 = vmatprep.mubr.bf16.mxu0 %v9562_v0  ;;  %v8725_v27 = vld [vmem:[#allocation3 + $0x248] ss:$16 sps:$4 sm:$0xff]  }
  0xaa   : > { %1537 = vmatprep.subr.bf16.mxu1 %v8671_v32  ;;  %1598 = vmatprep.subr.bf16.mxu0 %v8677_v34  ;;  %v7511_v32 = vcombine.high %v991_v25, %v991_v25  ;;  %v1106_v34 = vrot.slane %v1104_v26, 1 }
  0xab   : > { %1563 = vmatprep.mubr.bf16.mxu1 %v9753_v36 }
  0xac   : > { %1599 = vmatpush1.bf16.msra.mxu0 %v8675_v35  ;;  %v1109_v35 = vshll.u32 %v9736_v18, 16 }
  0xad   : > { %1538 = vmatpush1.bf16.msra.mxu1 %v8669_v33  ;;  %1637 = vmatprep.subr.bf16.mxu0 %v8683_v40  ;;  %v1102_v33 = vshrl.u32 %v9728_v7, 16  ;;  %v8742_v40 = vld [vmem:[#allocation3 + $0x344] ss:$16 sps:$4 sm:$0xff]  }
  0xae   : > { %1539 = vmatprep.subr.bf16.mxu1 %v8674_v39  ;;  %v8739_v39 = vld [vmem:[#allocation3 + $0x40c] ss:$16 sps:$4 sm:$0xff]   ;;  %v1111_v7 = vrot.slane %v1109_v35, 1 }
  0xaf   : > { %7503 = vmatmul.mubr.msk.bf16.gmra.mxu0 %vm748_vm0, %v9722_v55  ;;  %v8689_v55 = vld [vmem:[#allocation3 + $0x308] ss:$16 sps:$4 sm:$0xff]   ;;  %v1107_v43 = vor.u32 %v1106_v34, %v1102_v33  ;;  %v8791_v34 = vld [vmem:[#allocation3 + $0x4c0] ss:$16 sps:$4 sm:$0xff]  }
  0xb0   : > { %1616 = vmatprep.mubr.bf16.mxu0 %v9562_v0  ;;  %v8800_v33 = vld [vmem:[%s9709_s26 + $0x8] ss:$12 sps:$4 sm:$0xfe]  }
  0xb1   : > { %1540 = vmatpush1.bf16.msra.mxu1 %v8672_v13  ;;  %v1149_v13 = vshll.u32 %v7511_v32, 16  ;;  %v8801_v32 = vld [vmem:[%s9709_s26 + $0x20] ss:$12 sps:$4 sm:$0xff]   ;;  %v1915_v35 = vrot.slane %v8800_v33, 1 }
  0xb2   : > { %1541 = vmatprep.subr.bf16.mxu1 %v8680_v44  ;;  %v7510_v44 = vcombine.low %v991_v25, %v991_v25  ;;  %v8782_v25 = vld [vmem:[#allocation3 + $0x500] ss:$16 sps:$4 sm:$0xff]  }
  0xb3   : > { %v1151_v47 = vrot.slane %v1149_v13, 1  ;;  %v8872_v13 = vld [vmem:[%s9709_s26 + $0x38] ss:$0 sps:$4 sm:$0x11]  }
  0xb5   : > { %1542 = vmatpush1.bf16.msra.mxu1 %v8678_v45  ;;  %v8745_v45 = vld [vmem:[#allocation3 + $0x3ec] ss:$16 sps:$4 sm:$0xff]  }
  0xb6   : > { %1543 = vmatprep.subr.bf16.mxu1 %v8686_v48  ;;  %v8755_v48 = vld [vmem:[#allocation3 + $0x46c] ss:$16 sps:$4 sm:$0xff]  }
  0xb7   : > { %7585 = vmatmul.mubr.msk.bf16.vlgmr.msra.gmra.mxu0 %vm748_vm0, %v9762_v51 }
  0xb8   : > { %1638 = vmatpush1.bf16.msra.mxu0 %v8681_v49  ;;  %1626 = vmatprep.mubr.bf16.mxu0 %v9562_v0  ;;  %v8743_v49 = vld [vmem:[#allocation3 + $0x3e8] ss:$16 sps:$4 sm:$0xff]  }
  0xb9   : > { %1544 = vmatpush1.bf16.msra.mxu1 %v8684_v50  ;;  %1639 = vmatprep.subr.bf16.mxu0 %v8691_v52  ;;  %v9781_v50 = vsel %vm1100_vm1, %v1107_v43, %v1111_v7  ;;  %v1137_v52 = vshrl.u32 %v9736_v18, 16  ;;  %v8761_v18 = vld [vmem:[#allocation3 + $0x448] ss:$16 sps:$4 sm:$0xff]  }
  0xba   : > { %1545 = vmatprep.subr.bf16.mxu1 %v8694_v53  ;;  %v1141_v53 = vshll.u32 %v7510_v44, 16  ;;  %v8802_v43 = vld [vmem:[#allocation3 + $0x548] ss:$16 sps:$4 sm:$0xff]   ;;  %v1922_v44 = vrot.slane %v8872_v13, 1 }
  0xbc   : > { %1640 = vmatpush1.bf16.msra.mxu0 %v8689_v55  ;;  %v9785_v55 = vsel %vm1100_vm1, %v1147_v46, %v1151_v47  ;;  %v8813_v46 = vld [vmem:[#allocation3 + $0x664] ss:$16 sps:$4 sm:$0xff]   ;;  %v8808_v47 = vld [vmem:[#allocation3 + $0x528] ss:$16 sps:$4 sm:$0xff]  }
  0xbd   : > { %1546 = vmatpush1.bf16.msra.mxu1 %v8692_v57  ;;  %1641 = vmatprep.subr.bf16.mxu0 %v8697_v58  ;;  %v8763_v57 = vld [vmem:[#allocation3 + $0x44c] ss:$16 sps:$4 sm:$0xff]   ;;  %v1139_v58 = vor.u32 %v1137_v52, %v1111_v7  ;;  %v8805_v7 = vld [vmem:[#allocation3 + $0x480] ss:$16 sps:$4 sm:$0xff]   ;;  %v8819_v52 = vld [vmem:[#allocation3 + $0x644] ss:$16 sps:$4 sm:$0xff]  }
  0xbe   : > { %1547 = vmatprep.subr.bf16.mxu1 %v8700_v59  ;;  %v1143_v59 = vrot.slane %v1141_v53, 1  ;;  %v8814_v53 = vld [vmem:[#allocation3 + $0x508] ss:$16 sps:$4 sm:$0xff]  }
  0xbf   : > { %7586 = vmatmul.mubr.msk.bf16.gmra.mxu0 %vm748_vm0, %v9769_v4 }
  0xc0   : > { %1642 = vmatpush1.bf16.msra.mxu0 %v8695_v62  ;;  %1669 = vmatprep.mubr.bf16.mxu0 %v9753_v36  ;;  %v8731_v36 = vld [vmem:[#allocation3 + $0x428] ss:$16 sps:$4 sm:$0xff]  }
  0xc1   : > { %1548 = vmatpush2.bf16.msra.mxu1 %v8698_v63  ;;  %1643 = vmatprep.subr.bf16.mxu0 %v8703_v2  ;;  %v8750_v62 = vld [vmem:[#allocation3 + $0x3a8] ss:$16 sps:$4 sm:$0xff]   ;;  %v1144_v63 = vsel %vm1100_vm1, %v1139_v58, %v1143_v59  ;;  %v8828_v58 = vld [vmem:[#allocation3 + $0x4cc] ss:$16 sps:$4 sm:$0xff]   ;;  %v8831_v59 = vld [vmem:[#allocation3 + $0x604] ss:$16 sps:$4 sm:$0xff]  }
  0xc2   : > { %1549 = vmatprep.subr.bf16.mxu1 %v8706_v3  ;;  %v8758_v2 = vld [vmem:[#allocation3 + $0x388] ss:$16 sps:$4 sm:$0xff]   ;;  %v8766_v3 = vld [vmem:[#allocation3 + $0x36c] ss:$16 sps:$4 sm:$0xff]  }
  0xc4   : > { %1644 = vmatpush1.bf16.msra.mxu0 %v8701_v5  ;;  %v8764_v5 = vld [vmem:[#allocation3 + $0x368] ss:$16 sps:$4 sm:$0xff]  }
  0xc5   : > { %1550 = vmatpush2.bf16.msra.mxu1 %v8704_v6  ;;  %1645 = vmatprep.subr.bf16.mxu0 %v8709_v8  ;;  %v8767_v6 = vld [vmem:[#allocation3 + $0x560] ss:$16 sps:$4 sm:$0xff]  }
  0xc6   : > { %1551 = vmatprep.subr.bf16.mxu1 %v8712_v9  ;;  %v9792_v8 = vld [vmem:[%s9709_s26] sm:$0xee]  ;;  %v9795_v9 = vld [vmem:[%s9709_s26 + $0xc] sm:$0xff] }
  0xc8   : > { %1646 = vmatpush1.bf16.msra.mxu0 %v8707_v10  ;;  %v8772_v10 = vld [vmem:[#allocation3 + $0x34c] ss:$16 sps:$4 sm:$0xff]  }
  0xc9   : > { %1552 = vmatpush2.bf16.msra.mxu1 %v8710_v12  ;;  %1647 = vmatprep.subr.bf16.mxu0 %v8715_v14  ;;  %v8775_v12 = vld [vmem:[#allocation3 + $0x544] ss:$16 sps:$4 sm:$0xff]   ;;  %v8770_v14 = vld [vmem:[#allocation3 + $0x348] ss:$16 sps:$4 sm:$0xff]  }
  0xca   : > { %1553 = vmatprep.subr.bf16.mxu1 %v8718_v15  ;;  %v7590_v15 = vcombine.high %v9792_v8, %v9795_v9 }
  0xcc   : > { %1648 = vmatpush1.bf16.msra.mxu0 %v8713_v16  ;;  %v8773_v16 = vld [vmem:[#allocation3 + $0x540] ss:$16 sps:$4 sm:$0xff]  }
  0xcd   : > { %1554 = vmatpush2.bf16.msra.mxu1 %v8716_v17  ;;  %1649 = vmatprep.subr.bf16.mxu0 %v8721_v19  ;;  %v8778_v17 = vld [vmem:[#allocation3 + $0x524] ss:$16 sps:$4 sm:$0xff]  }
  0xce   : > { %1555 = vmatprep.subr.bf16.mxu1 %v8724_v20  ;;  %v8781_v19 = vld [vmem:[#allocation3 + $0x6a4] ss:$16 sps:$4 sm:$0xff]   ;;  %v8776_v20 = vld [vmem:[#allocation3 + $0x520] ss:$16 sps:$4 sm:$0xff]  }
  0xd0   : > { %1650 = vmatpush1.bf16.msra.mxu0 %v8719_v21  ;;  %v1912_v21 = vrot.slane %v7590_v15, 1  ;;  %v8844_v15 = vld [vmem:[#allocation3 + $0x668] ss:$16 sps:$4 sm:$0xff]  }
  0xd1   : > { %1556 = vmatpush2.bf16.msra.mxu1 %v8722_v22  ;;  %1651 = vmatprep.subr.bf16.mxu0 %v8727_v23  ;;  %v1913_v22 = vrot.slane %v9731_v11, 1  ;;  %v8784_v23 = vld [vmem:[#allocation3 + $0x504] ss:$16 sps:$4 sm:$0xff]  }
  0xd2   : > { %1557 = vmatprep.subr.bf16.mxu1 %v8730_v24  ;;  %v8790_v24 = vld [vmem:[#allocation3 + $0x684] ss:$16 sps:$4 sm:$0xff]  }
  0xd3   : > { %v1914_v26 = vsel %vm1908_vm2, %v1912_v21, %v1913_v22  ;;  %v8884_v11 = vld [vmem:[#allocation3 + $0x7a4] ss:$16 sps:$4 sm:$0xff]  }
  0xd4   : > { %1652 = vmatpush1.bf16.msra.mxu0 %v8725_v27  ;;  %v8788_v27 = vld [vmem:[#allocation3 + $0x680] ss:$16 sps:$4 sm:$0xff]  }
  0xd5   : > { %1558 = vmatpush2.bf16.msra.mxu1 %v8728_v28  ;;  %1653 = vmatprep.subr.bf16.mxu0 %v8733_v29  ;;  %v8787_v28 = vld [vmem:[#allocation3 + $0x4e4] ss:$16 sps:$4 sm:$0xff]   ;;  %v8796_v29 = vld [vmem:[#allocation3 + $0x56c] ss:$16 sps:$4 sm:$0xff]  }
  0xd6   : > { %1559 = vmatprep.subr.bf16.mxu1 %v8736_v31  ;;  %v8785_v31 = vld [vmem:[#allocation3 + $0x4e0] ss:$16 sps:$4 sm:$0xff]  }
  0xd8   : > { %1654 = vmatpush2.bf16.msra.mxu0 %v8731_v36  ;;  %v1916_v36 = vrot.slane %v8801_v32, 1  ;;  %v8863_v32 = vld [vmem:[#allocation3 + $0x60c] ss:$16 sps:$4 sm:$0xff]  }
  0xd9   : > { %1560 = vmatpush2.bf16.msra.mxu1 %v8734_v37  ;;  %1655 = vmatprep.subr.bf16.mxu0 %v8739_v39  ;;  %v8799_v37 = vld [vmem:[#allocation3 + $0x4a4] ss:$16 sps:$4 sm:$0xff]   ;;  %v8797_v39 = vld [vmem:[#allocation3 + $0x4a0] ss:$16 sps:$4 sm:$0xff]  }
  0xda   : > { %1561 = vmatprep.subr.bf16.mxu1 %v8742_v40  ;;  %v9814_v40 = vsel %vm1908_vm2, %v1915_v35, %v1916_v36  ;;  %v8878_v35 = vld [vmem:[#allocation3 + $0x68c] ss:$16 sps:$4 sm:$0xff]  }
  0xdc   : > { %1656 = vmatpush2.bf16.msra.mxu0 %v8737_v41  ;;  %v8804_v41 = vld [vmem:[#allocation3 + $0x54c] ss:$16 sps:$4 sm:$0xff]  }
  0xdd   : > { %1562 = vmatpush2.bf16.msra.mxu1 %v8740_v42  ;;  %1657 = vmatprep.subr.bf16.mxu0 %v8745_v45  ;;  %v8807_v42 = vld [vmem:[#allocation3 + $0x484] ss:$16 sps:$4 sm:$0xff]   ;;  %v8810_v45 = vld [vmem:[#allocation3 + $0x52c] ss:$16 sps:$4 sm:$0xff]  }
  0xde   : > { %1702 = vmatprep.subr.bf16.mxu1 %v8755_v48  ;;  %v8811_v48 = vld [vmem:[#allocation3 + $0x660] ss:$16 sps:$4 sm:$0xff]  }
  0xe0   : > { %1564 = vmatmul.mubr.bf16.vlgmr.msra.gmra.mxu1 %v9781_v50  ;;  %1658 = vmatpush2.bf16.msra.mxu0 %v8743_v49  ;;  %v9821_v49 = vsel %vm1908_vm2, %v1916_v36, %v1922_v44  ;;  %v8861_v36 = vld [vmem:[#allocation3 + $0x608] ss:$16 sps:$4 sm:$0xff]  }
  0xe1   : > { %1573 = vmatprep.mubr.bf16.mxu1 %v9785_v55  ;;  %1659 = vmatprep.subr.bf16.mxu0 %v8748_v54  ;;  %v8817_v54 = vld [vmem:[#allocation3 + $0x640] ss:$16 sps:$4 sm:$0xff]   ;;  %v8873_v44 = vld [vmem:[#allocation3 + $0x5c8] ss:$16 sps:$4 sm:$0xff]  }
  0xe2   : > { %1703 = vmatpush1.bf16.msra.mxu1 %v8753_v56  ;;  %v8825_v56 = vld [vmem:[#allocation3 + $0x624] ss:$16 sps:$4 sm:$0xff]  }
  0xe3   : > { %1704 = vmatprep.subr.bf16.mxu1 %v8763_v57  ;;  %v8820_v57 = vld [vmem:[#allocation3 + $0x4e8] ss:$16 sps:$4 sm:$0xff]  }
  0xe4   : > { %1660 = vmatpush2.bf16.msra.mxu0 %v8746_v30  ;;  %v8823_v30 = vld [vmem:[#allocation3 + $0x620] ss:$16 sps:$4 sm:$0xff]  }
  0xe5   : > { %1661 = vmatprep.subr.bf16.mxu0 %v8752_v60  ;;  %v8826_v60 = vld [vmem:[#allocation3 + $0x4c8] ss:$16 sps:$4 sm:$0xff]  }
  0xe6   : > { %1705 = vmatpush1.bf16.msra.mxu1 %v8761_v18  ;;  %v8829_v18 = vld [vmem:[#allocation3 + $0x600] ss:$16 sps:$4 sm:$0xff]  }
  0xe7   : > { %2294 = vmatprep.subr.bf16.mxu1 %v8769_v61  ;;  %v8834_v61 = vld [vmem:[#allocation3 + $0x4ac] ss:$16 sps:$4 sm:$0xff]  }
  0xe8   : > { %1574 = vmatmul.mubr.bf16.gmra.mxu1 %v1144_v63  ;;  %1662 = vmatpush2.bf16.msra.mxu0 %v8750_v62  ;;  %v8837_v62 = vld [vmem:[#allocation3 + $0x5e4] ss:$16 sps:$4 sm:$0xff]  }
  0xe9   : > { %1722 = vmatprep.mubr.bf16.mxu1 %v9562_v0  ;;  %1663 = vmatprep.subr.bf16.mxu0 %v8760_v1  ;;  %v8835_v1 = vld [vmem:[#allocation3 + $0x5e0] ss:$16 sps:$4 sm:$0xff]  }
  0xec   : > { %1664 = vmatpush2.bf16.msra.mxu0 %v8758_v2  ;;  %v8840_v2 = vld [vmem:[#allocation3 + $0x48c] ss:$16 sps:$4 sm:$0xff]  }
  0xed   : > { %1665 = vmatprep.subr.bf16.mxu0 %v8766_v3  ;;  %v8843_v3 = vld [vmem:[#allocation3 + $0x5c4] ss:$16 sps:$4 sm:$0xff]  }
  0xf0   : > { %7587 = vmatmul.mubr.msk.bf16.vlgmr.msra.gmra.mxu1 %vm748_vm0, %v9762_v51  ;;  %1666 = vmatpush2.bf16.msra.mxu0 %v8764_v5  ;;  %v8779_v51 = vld [vmem:[#allocation3 + $0x6a0] ss:$16 sps:$4 sm:$0xff]   ;;  %v8838_v5 = vld [vmem:[#allocation3 + $0x488] ss:$16 sps:$4 sm:$0xff]  }
  0xf1   : > { %2295 = vmatpush1.bf16.msra.mxu1 %v8767_v6  ;;  %1667 = vmatprep.subr.bf16.mxu0 %v8772_v10  ;;  %v8841_v6 = vld [vmem:[#allocation3 + $0x5c0] ss:$16 sps:$4 sm:$0xff]   ;;  %v8846_v10 = vld [vmem:[#allocation3 + $0x66c] ss:$16 sps:$4 sm:$0xff]  }
  0xf2   : > { %2296 = vmatprep.subr.bf16.mxu1 %v8775_v12  ;;  %1732 = vmatprep.mubr.bf16.mxu1 %v9562_v0  ;;  %v8849_v12 = vld [vmem:[#allocation3 + $0x5a4] ss:$16 sps:$4 sm:$0xff]  }
  0xf4   : > { %1668 = vmatpush2.bf16.msra.mxu0 %v8770_v14  ;;  %v1799_v14 = vld [vmem:[%s9709_s26 + $0x30] sm:$0x11] }
  0xf5   : > { %2297 = vmatpush1.bf16.msra.mxu1 %v8773_v16  ;;  %2359 = vmatprep.subr.bf16.mxu0 %v8781_v19  ;;  %v8847_v16 = vld [vmem:[#allocation3 + $0x5a0] ss:$16 sps:$4 sm:$0xff]   ;;  %v7589_v19 = vcombine.low %v9792_v8, %v9795_v9  ;;  %v7596_v21 = vcombine.high %v1799_v14, %v1799_v14  ;;  %v7595_v33 = vcombine.low %v1799_v14, %v1799_v14  ;;  %v8905_v14 = vld [vmem:[#allocation3 + $0x8c4] ss:$16 sps:$4 sm:$0xff]  }
  0xf6   : > { %2298 = vmatprep.subr.bf16.mxu1 %v8778_v17  ;;  %v8852_v17 = vld [vmem:[#allocation3 + $0x64c] ss:$16 sps:$4 sm:$0xff]  }
  0xf7   : > { %1670 = vmatmul.mubr.bf16.vlgmr.msra.gmra.mxu0 %v9781_v50  ;;  %v8816_v50 = vld [vmem:[#allocation3 + $0x50c] ss:$16 sps:$4 sm:$0xff]  }
  0xf8   : > { %7588 = vmatmul.mubr.msk.bf16.gmra.mxu1 %vm748_vm0, %v9769_v4  ;;  %2360 = vmatpush1.bf16.msra.mxu0 %v8779_v51  ;;  %v8793_v4 = vld [vmem:[#allocation3 + $0x4c4] ss:$16 sps:$4 sm:$0xff]   ;;  %v8850_v51 = vld [vmem:[#allocation3 + $0x648] ss:$16 sps:$4 sm:$0xff]  }
  0xf9   : > { %2299 = vmatpush1.bf16.msra.mxu1 %v8776_v20  ;;  %1679 = vmatprep.mubr.bf16.mxu0 %v9785_v55  ;;  %v8822_v55 = vld [vmem:[#allocation3 + $0x4ec] ss:$16 sps:$4 sm:$0xff]   ;;  %v8855_v20 = vld [vmem:[#allocation3 + $0x584] ss:$16 sps:$4 sm:$0xff]  }
  0xfa   : > { %2300 = vmatprep.subr.bf16.mxu1 %v8784_v23  ;;  %2361 = vmatprep.subr.bf16.mxu0 %v8790_v24  ;;  %v8853_v23 = vld [vmem:[#allocation3 + $0x580] ss:$16 sps:$4 sm:$0xff]   ;;  %v1909_v24 = vrot.slane %v7589_v19, 1 }
  0xfb   : > { %2326 = vmatprep.mubr.bf16.mxu1 %v1914_v26 }
  0xfc   : > { %2362 = vmatpush1.bf16.msra.mxu0 %v8788_v27  ;;  %v8860_v27 = vld [vmem:[#allocation3 + $0x62c] ss:$16 sps:$4 sm:$0xff]  }
  0xfd   : > { %2301 = vmatpush1.bf16.msra.mxu1 %v8782_v25  ;;  %2400 = vmatprep.subr.bf16.mxu0 %v8796_v29  ;;  %v9375_v25 = vld [vmem:[%s9709_s26 + $0x18] ss:$12 sps:$4 sm:$0xff]   ;;  %v8870_v29 = vld [vmem:[#allocation3 + $0x6ac] ss:$16 sps:$4 sm:$0xff]  }
  0xfe   : > { %2302 = vmatprep.subr.bf16.mxu1 %v8787_v28  ;;  %v1920_v28 = vrot.slane %v7596_v21, 1 }
  0xff   : > { %1680 = vmatmul.mubr.bf16.gmra.mxu0 %v1144_v63  ;;  %v8832_v63 = vld [vmem:[#allocation3 + $0x4a8] ss:$16 sps:$4 sm:$0xff]  }
 0x100   : > { %2379 = vmatprep.mubr.bf16.mxu0 %v9562_v0 }
 0x101   : > { %2303 = vmatpush1.bf16.msra.mxu1 %v8785_v31  ;;  %v8858_v31 = vld [vmem:[#allocation3 + $0x628] ss:$16 sps:$4 sm:$0xff]  }
 0x102   : > { %2304 = vmatprep.subr.bf16.mxu1 %v8793_v4  ;;  %v9835_v4 = vsel %vm1908_vm2, %v1913_v22, %v1920_v28  ;;  %v8865_v22 = vld [vmem:[#allocation3 + $0x5e8] ss:$16 sps:$4 sm:$0xff]  }
 0x105   : > { %2305 = vmatpush1.bf16.msra.mxu1 %v8791_v34  ;;  %v8868_v34 = vld [vmem:[#allocation3 + $0x6a8] ss:$16 sps:$4 sm:$0xff]  }
 0x106   : > { %2306 = vmatprep.subr.bf16.mxu1 %v8799_v37  ;;  %v8867_v37 = vld [vmem:[#allocation3 + $0x5ec] ss:$16 sps:$4 sm:$0xff]  }
 0x107   : > { %7670 = vmatmul.mubr.msk.bf16.vlgmr.msra.gmra.mxu0 %vm748_vm0, %v9814_v40 }
 0x108   : > { %2401 = vmatpush1.bf16.msra.mxu0 %v8794_v38  ;;  %2389 = vmatprep.mubr.bf16.mxu0 %v9562_v0  ;;  %v1918_v38 = vrot.slane %v7595_v33, 1  ;;  %v2562_v33 = vld [vmem:[%s9709_s26 + $0x30] sm:$0x33] }
 0x109   : > { %2307 = vmatpush1.bf16.msra.mxu1 %v8797_v39  ;;  %2402 = vmatprep.subr.bf16.mxu0 %v8804_v41  ;;  %v8876_v39 = vld [vmem:[#allocation3 + $0x688] ss:$16 sps:$4 sm:$0xff]   ;;  %v9843_v41 = vld [vmem:[%s9709_s26] sm:$0xee] }
 0x10a   : > { %2308 = vmatprep.subr.bf16.mxu1 %v8807_v42  ;;  %v8875_v42 = vld [vmem:[#allocation3 + $0x5cc] ss:$16 sps:$4 sm:$0xff]  }
 0x10c   : > { %2403 = vmatpush1.bf16.msra.mxu0 %v8802_v43  ;;  %v9846_v43 = vld [vmem:[%s9709_s26 + $0x1c] ss:$12 sps:$4 sm:$0xff]  }
 0x10d   : > { %2309 = vmatpush1.bf16.msra.mxu1 %v8805_v7  ;;  %2404 = vmatprep.subr.bf16.mxu0 %v8810_v45  ;;  %v7675_v7 = vcombine.high %v9843_v41, %v9795_v9  ;;  %v8881_v45 = vld [vmem:[#allocation3 + $0x5ac] ss:$16 sps:$4 sm:$0xff]  }
 0x10e   : > { %2310 = vmatprep.subr.bf16.mxu1 %v8813_v46 }
 0x10f   : > { %7671 = vmatmul.mubr.msk.bf16.gmra.mxu0 %vm748_vm0, %v9821_v49  ;;  %v2690_v46 = vshrl.u32 %v7675_v7, 16 }
 0x110   : > { %2405 = vmatpush1.bf16.msra.mxu0 %v8808_v47  ;;  %2432 = vmatprep.mubr.bf16.mxu0 %v1914_v26  ;;  %v1910_v26 = vrot.slane %v9375_v25, 1  ;;  %v2693_v47 = vshll.u32 %v7675_v7, 16  ;;  %v8900_v25 = vld [vmem:[#allocation3 + $0x720] ss:$16 sps:$4 sm:$0xff]   ;;  %v8909_v7 = vld [vmem:[#allocation3 + $0x7a8] ss:$16 sps:$4 sm:$0xff]  }
 0x111   : > { %2311 = vmatpush2.bf16.msra.mxu1 %v8811_v48  ;;  %2406 = vmatprep.subr.bf16.mxu0 %v8816_v50  ;;  %v2698_v48 = vshrl.u32 %v9846_v43, 16  ;;  %v2701_v50 = vshll.u32 %v9846_v43, 16 }
 0x112   : > { %2312 = vmatprep.subr.bf16.mxu1 %v8819_v52  ;;  %v9830_v8 = vsel %vm1908_vm2, %v1909_v24, %v1910_v26  ;;  %v9840_v13 = vsel %vm1908_vm2, %v1910_v26, %v1918_v38  ;;  %v8879_v52 = vld [vmem:[#allocation3 + $0x5a8] ss:$16 sps:$4 sm:$0xff]   ;;  %v8911_v24 = vld [vmem:[#allocation3 + $0x7ac] ss:$16 sps:$4 sm:$0xff]  }
 0x114   : > { %2407 = vmatpush1.bf16.msra.mxu0 %v8814_v53  ;;  %v8882_v53 = vld [vmem:[#allocation3 + $0x7a0] ss:$16 sps:$4 sm:$0xff]  }
 0x115   : > { %2313 = vmatpush2.bf16.msra.mxu1 %v8817_v54  ;;  %2408 = vmatprep.subr.bf16.mxu0 %v8822_v55  ;;  %v8887_v54 = vld [vmem:[#allocation3 + $0x58c] ss:$16 sps:$4 sm:$0xff]   ;;  %v8890_v55 = vld [vmem:[#allocation3 + $0x784] ss:$16 sps:$4 sm:$0xff]  }
 0x116   : > { %2314 = vmatprep.subr.bf16.mxu1 %v8825_v56  ;;  %v2692_v56 = vrot.slane %v2690_v46, 1 }
 0x118   : > { %2409 = vmatpush1.bf16.msra.mxu0 %v8820_v57  ;;  %v2695_v57 = vrot.slane %v2693_v47, 2 }
 0x119   : > { %2315 = vmatpush2.bf16.msra.mxu1 %v8823_v30  ;;  %2410 = vmatprep.subr.bf16.mxu0 %v8828_v58  ;;  %v2700_v30 = vrot.slane %v2698_v48, 1  ;;  %v2703_v58 = vrot.slane %v2701_v50, 2 }
 0x11a   : > { %2316 = vmatprep.subr.bf16.mxu1 %v8831_v59  ;;  %v8885_v59 = vld [vmem:[#allocation3 + $0x588] ss:$16 sps:$4 sm:$0xff]  }
 0x11c   : > { %2411 = vmatpush1.bf16.msra.mxu0 %v8826_v60  ;;  %v8888_v60 = vld [vmem:[#allocation3 + $0x780] ss:$16 sps:$4 sm:$0xff]  }
 0x11d   : > { %2317 = vmatpush2.bf16.msra.mxu1 %v8829_v18  ;;  %2412 = vmatprep.subr.bf16.mxu0 %v8834_v61  ;;  %v8893_v61 = vld [vmem:[#allocation3 + $0x764] ss:$16 sps:$4 sm:$0xff]  }
 0x11e   : > { %2318 = vmatprep.subr.bf16.mxu1 %v8837_v62  ;;  %v8896_v62 = vld [vmem:[#allocation3 + $0x8e4] ss:$16 sps:$4 sm:$0xff]  }
 0x120   : > { %2413 = vmatpush1.bf16.msra.mxu0 %v8832_v63  ;;  %v9856_v18 = vpop.f32.mrf.mxu1  ;;  %v8891_v63 = vld [vmem:[#allocation3 + $0x760] ss:$16 sps:$4 sm:$0xff]  }
 0x121   : > { %2319 = vmatpush2.bf16.msra.mxu1 %v8835_v1  ;;  %2414 = vmatprep.subr.bf16.mxu0 %v8840_v2  ;;  %v2696_v1 = vor.u32 %v2695_v57, %v2692_v56  ;;  %v9859_v2 = vor.u32 %v2703_v58, %v2700_v30  ;;  %v8917_v58 = vld [vmem:[#allocation3 + $0x788] ss:$16 sps:$4 sm:$0xff]  }
 0x122   : > { %2320 = vmatprep.subr.bf16.mxu1 %v8843_v3  ;;  %v8915_v3 = vld [vmem:[%s9709_s26 + $0x8] ss:$12 sps:$4 sm:$0xfe]  }
 0x123   : > { %v2710_v19 = vshll.u32 %v8915_v3, 16 }
 0x124   : > { %2415 = vmatpush1.bf16.msra.mxu0 %v8838_v5  ;;  %v8916_v5 = vld [vmem:[%s9709_s26 + $0x20] ss:$12 sps:$4 sm:$0xff]  }
 0x125   : > { %2321 = vmatpush2.bf16.msra.mxu1 %v8841_v6  ;;  %2416 = vmatprep.subr.bf16.mxu0 %v8846_v10  ;;  %v9863_v6 = vpop.f32.mrf.mxu1  ;;  %v8899_v10 = vld [vmem:[#allocation3 + $0x744] ss:$16 sps:$4 sm:$0xff]   ;;  %v2718_v21 = vshll.u32 %v8916_v5, 16 }
 0x126   : > { %2322 = vmatprep.subr.bf16.mxu1 %v8849_v12  ;;  %v8897_v12 = vld [vmem:[#allocation3 + $0x740] ss:$16 sps:$4 sm:$0xff]  }
 0x128   : > { %2417 = vmatpush2.bf16.msra.mxu0 %v8844_v15  ;;  %v8903_v15 = vld [vmem:[#allocation3 + $0x8c0] ss:$16 sps:$4 sm:$0xff]  }
 0x129   : > { %2323 = vmatpush2.bf16.msra.mxu1 %v8847_v16  ;;  %2418 = vmatprep.subr.bf16.mxu0 %v8852_v17  ;;  %v9870_v16 = vsel %vm2671_vm3, %v2696_v1, %v9859_v2  ;;  %v2707_v17 = vshrl.u32 %v8915_v3, 16  ;;  %v8928_v3 = vld [vmem:[#allocation3 + $0x8a4] ss:$16 sps:$4 sm:$0xff]  }
 0x12a   : > { %2324 = vmatprep.subr.bf16.mxu1 %v8855_v20  ;;  %v2715_v20 = vshrl.u32 %v8916_v5, 16 }
 0x12b   : > { %v2709_v26 = vrot.slane %v2707_v17, 1 }
 0x12c   : > { %2419 = vmatpush2.bf16.msra.mxu0 %v8850_v51  ;;  %v9872_v51 = vpop.f32.mrf.mxu1  ;;  %v2717_v28 = vrot.slane %v2715_v20, 1 }
 0x12d   : > { %2325 = vmatpush2.bf16.msra.mxu1 %v8853_v23  ;;  %2420 = vmatprep.subr.bf16.mxu0 %v8860_v27  ;;  %v8902_v23 = vld [vmem:[#allocation3 + $0x724] ss:$16 sps:$4 sm:$0xff]   ;;  %v2712_v27 = vrot.slane %v2710_v19, 2  ;;  %v9922_v19 = vld [vmem:[%s9709_s26] ss:$12 sps:$4 sm:$0xfc]  }
 0x12e   : > { %2465 = vmatprep.subr.bf16.mxu1 %v8870_v29  ;;  %v2720_v29 = vrot.slane %v2718_v21, 2  ;;  %v9925_v21 = vld [vmem:[%s9709_s26 + $0x4] ss:$12 sps:$4 sm:$0xfc]  }
 0x12f   : > { %v2713_v38 = vor.u32 %v2712_v27, %v2709_v26 }
 0x130   : > { %2327 = vmatmul.mubr.bf16.vlgmr.msra.gmra.mxu1 %v9830_v8  ;;  %2421 = vmatpush2.bf16.msra.mxu0 %v8858_v31  ;;  %v9877_v31 = vpop.f32.mrf.mxu1 }
 0x131   : > { %2336 = vmatprep.mubr.bf16.mxu1 %v9835_v4  ;;  %2422 = vmatprep.subr.bf16.mxu0 %v8863_v32  ;;  %v7674_v32 = vcombine.low %v9843_v41, %v9795_v9  ;;  %v7680_v41 = vcombine.low %v2562_v33, %v2562_v33 }
 0x132   : > { %2466 = vmatpush1.bf16.msra.mxu1 %v8868_v34 }
 0x133   : > { %2467 = vmatprep.subr.bf16.mxu1 %v8878_v35  ;;  %v9883_v35 = vpop.f32.mrf.mxu1  ;;  %v2676_v9 = vshll.u32 %v7674_v32, 16  ;;  %v2724_v30 = vshrl.u32 %v7680_v41, 16 }
 0x134   : > { %2423 = vmatpush2.bf16.msra.mxu0 %v8861_v36  ;;  %v9886_v36 = vld [vmem:[%s9709_s26 + $0x18] ss:$12 sps:$4 sm:$0xff]  }
 0x135   : > { %2424 = vmatprep.subr.bf16.mxu0 %v8867_v37  ;;  %v8906_v37 = vld [vmem:[#allocation3 + $0x700] ss:$16 sps:$4 sm:$0xff]   ;;  %v9889_v46 = vpop.f32.mrf.mxu1  ;;  %v2681_v47 = vshrl.u32 %v9886_v36, 16  ;;  %v2684_v48 = vshll.u32 %v9886_v36, 16  ;;  %v9898_v57 = vrot.slane %v2676_v9, 2  ;;  %v3501_v9 = vrot.slane %v9925_v21, 2 }
 0x136   : > { %2468 = vmatpush1.bf16.msra.mxu1 %v8876_v39  ;;  %v2721_v39 = vor.u32 %v2720_v29, %v2717_v28  ;;  %v9024_v21 = vld [vmem:[#allocation3 + $0x940] ss:$16 sps:$4 sm:$0xff]  }
 0x137   : > { %3120 = vmatprep.subr.bf16.mxu1 %v8884_v11  ;;  %v7681_v11 = vcombine.high %v2562_v33, %v2562_v33  ;;  %v9905_v1 = vpop.f32.mrf.mxu1  ;;  %v9907_v5 = vrot.slane %v2681_v47, 1  ;;  %v3499_v33 = vrot.slane %v9886_v36, 2  ;;  %v8940_v47 = vld [vmem:[#allocation3 + $0x864] ss:$16 sps:$4 sm:$0xff]  }
 0x138   : > { %2337 = vmatmul.mubr.bf16.gmra.mxu1 %v9840_v13  ;;  %2425 = vmatpush2.bf16.msra.mxu0 %v8865_v22  ;;  %v8914_v22 = vld [vmem:[#allocation3 + $0x6e4] ss:$16 sps:$4 sm:$0xff]   ;;  %v9894_v50 = vsel %vm2671_vm3, %v2713_v38, %v2721_v39  ;;  %v3498_v38 = vrot.slane %v9922_v19, 2  ;;  %v9109_v19 = vld [vmem:[#allocation3 + $0xa4c] ss:$16 sps:$4 sm:$0xff]  }
 0x139   : > { %2485 = vmatprep.mubr.bf16.mxu1 %v9562_v0  ;;  %2426 = vmatprep.subr.bf16.mxu0 %v8875_v42  ;;  %v2673_v42 = vshrl.u32 %v7674_v32, 16  ;;  %v858_v29 = vpop.f32.mrf.mxu1 }
 0x13b   : > { %v9896_v56 = vrot.slane %v2673_v42, 1 }
 0x13c   : > { %2427 = vmatpush2.bf16.msra.mxu0 %v8873_v44 }
 0x13d   : > { %2428 = vmatprep.subr.bf16.mxu0 %v8881_v45 }
 0x140   : > { %7672 = vmatmul.mubr.msk.bf16.vlgmr.msra.gmra.mxu1 %vm748_vm0, %v9814_v40  ;;  %2429 = vmatpush2.bf16.msra.mxu0 %v8879_v52  ;;  %v8894_v40 = vld [vmem:[#allocation3 + $0x8e0] ss:$16 sps:$4 sm:$0xff]   ;;  %v8919_v52 = vld [vmem:[#allocation3 + $0x78c] ss:$16 sps:$4 sm:$0xff]  }
 0x141   : > { %3121 = vmatpush1.bf16.msra.mxu1 %v8882_v53  ;;  %2430 = vmatprep.subr.bf16.mxu0 %v8887_v54  ;;  %v2733_v53 = vshrl.u32 %v7681_v11, 16  ;;  %v2736_v54 = vshll.u32 %v7681_v11, 16 }
 0x142   : > { %3122 = vmatprep.subr.bf16.mxu1 %v8890_v55  ;;  %2495 = vmatprep.mubr.bf16.mxu1 %v9562_v0  ;;  %v8922_v55 = vld [vmem:[#allocation3 + $0x6c4] ss:$16 sps:$4 sm:$0xff]  }
 0x143   : > { %v9919_v17 = vrot.slane %v2736_v54, 2 }
 0x144   : > { %2431 = vmatpush2.bf16.msra.mxu0 %v8885_v59  ;;  %v8920_v59 = vld [vmem:[#allocation3 + $0x6c0] ss:$16 sps:$4 sm:$0xff]  }
 0x145   : > { %3123 = vmatpush1.bf16.msra.mxu1 %v8888_v60  ;;  %3185 = vmatprep.subr.bf16.mxu0 %v8896_v62  ;;  %v2727_v60 = vshll.u32 %v7680_v41, 16  ;;  %v9901_v62 = vld [vmem:[%s9709_s26 + $0x8] ss:$12 sps:$4 sm:$0xfc]  }
 0x146   : > { %3124 = vmatprep.subr.bf16.mxu1 %v8893_v61  ;;  %v3504_v32 = vrot.slane %v9901_v62, 2 }
 0x147   : > { %2433 = vmatmul.mubr.bf16.vlgmr.msra.gmra.mxu0 %v9830_v8  ;;  %v8908_v8 = vld [vmem:[#allocation3 + $0x704] ss:$16 sps:$4 sm:$0xff]   ;;  %v9934_v26 = vrot.slane %v2727_v60, 2 }
 0x148   : > { %7673 = vmatmul.mubr.msk.bf16.gmra.mxu1 %vm748_vm0, %v9821_v49  ;;  %3186 = vmatpush1.bf16.msra.mxu0 %v8894_v40  ;;  %v8990_v49 = vld [vmem:[%s9709_s26 + $0x38] ss:$0 sps:$4 sm:$0x33]   ;;  %v8925_v40 = vld [vmem:[#allocation3 + $0x76c] ss:$16 sps:$4 sm:$0xff]  }
 0x149   : > { %3125 = vmatpush1.bf16.msra.mxu1 %v8891_v63  ;;  %2442 = vmatprep.mubr.bf16.mxu0 %v9835_v4  ;;  %v2742_v4 = vshrl.u32 %v8990_v49, 16  ;;  %v2745_v34 = vshll.u32 %v8990_v49, 16  ;;  %v8923_v49 = vld [vmem:[#allocation3 + $0x768] ss:$16 sps:$4 sm:$0xff]  }
 0x14a   : > { %3126 = vmatprep.subr.bf16.mxu1 %v8899_v10  ;;  %3187 = vmatprep.subr.bf16.mxu0 %v8905_v14  ;;  %v9909_v10 = vrot.slane %v2684_v48, 2 }
 0x14b   : > { %3152 = vmatprep.mubr.bf16.mxu1 %v9870_v16  ;;  %v2744_v44 = vrot.slane %v2742_v4, 1  ;;  %v2747_v45 = vrot.slane %v2745_v34, 2  ;;  %v3502_v4 = vrot.slane %v9846_v43, 2 }
 0x14c   : > { %3188 = vmatpush1.bf16.msra.mxu0 %v8903_v15  ;;  %v9917_v15 = vrot.slane %v2733_v53, 1 }
 0x14d   : > { %3127 = vmatpush1.bf16.msra.mxu1 %v8897_v12  ;;  %3226 = vmatprep.subr.bf16.mxu0 %v8911_v24  ;;  %v2748_v61 = vor.u32 %v2747_v45, %v2744_v44  ;;  %v9912_v12 = vld [vmem:[%s9709_s26 + $0x20] ss:$12 sps:$4 sm:$0xff]  }
 0x14e   : > { %3128 = vmatprep.subr.bf16.mxu1 %v8902_v23  ;;  %v3388_v23 = vld [vmem:[%s9709_s26 + $0x30] sm:$0x33] }
 0x14f   : > { %2443 = vmatmul.mubr.bf16.gmra.mxu0 %v9840_v13  ;;  %v8912_v13 = vld [vmem:[#allocation3 + $0x6e0] ss:$16 sps:$4 sm:$0xff]   ;;  %v9937_v27 = vsel %vm2671_vm3, %v2721_v39, %v2748_v61  ;;  %v7766_v39 = vcombine.high %v3388_v23, %v3388_v23  ;;  %v7765_v11 = vcombine.low %v3388_v23, %v3388_v23  ;;  %v8943_v61 = vld [vmem:[#allocation3 + $0x70c] ss:$16 sps:$4 sm:$0xff]  }
 0x150   : > { %3205 = vmatprep.mubr.bf16.mxu0 %v9562_v0  ;;  %v8932_v44 = vld [vmem:[#allocation3 + $0x880] ss:$16 sps:$4 sm:$0xff]  }
 0x151   : > { %3129 = vmatpush1.bf16.msra.mxu1 %v8900_v25  ;;  %v8926_v25 = vld [vmem:[#allocation3 + $0x8a0] ss:$16 sps:$4 sm:$0xff]   ;;  %v9961_v53 = vrot.slane %v7765_v11, 2  ;;  %v8947_v11 = vld [vmem:[#allocation3 + $0x6e8] ss:$16 sps:$4 sm:$0xff]  }
 0x152   : > { %3130 = vmatprep.subr.bf16.mxu1 %v8908_v8  ;;  %v8931_v8 = vld [vmem:[#allocation3 + $0x74c] ss:$16 sps:$4 sm:$0xff]  }
 0x153   : > { %v3508_v43 = vsel %vm3497_vm4, %v3499_v33, %v9961_v53 }
 0x155   : > { %3131 = vmatpush1.bf16.msra.mxu1 %v8906_v37  ;;  %v8934_v37 = vld [vmem:[#allocation3 + $0x884] ss:$16 sps:$4 sm:$0xff]  }
 0x156   : > { %3132 = vmatprep.subr.bf16.mxu1 %v8914_v22  ;;  %v9948_v22 = vld [vmem:[%s9709_s26 + $0x38] ss:$0 sps:$4 sm:$0x33]  }
 0x157   : > { %7755 = vmatmul.mubr.msk.bf16.vlgmr.msra.gmra.mxu0 %vm748_vm0, %v9894_v50  ;;  %v789_v63 = vpop.f32.mrf.mxu0 }
 0x158   : > { %3227 = vmatpush1.bf16.msra.mxu0 %v8909_v7  ;;  %v9915_v14 = vadd.f32 %v9856_v18, %v789_v63  ;;  %3215 = vmatprep.mubr.bf16.mxu0 %v9562_v0  ;;  %v9932_v18 = vrot.slane %v2724_v30, 1  ;;  %v8929_v7 = vld [vmem:[#allocation3 + $0x748] ss:$16 sps:$4 sm:$0xff]   ;;  %v8946_v63 = vld [vmem:[#allocation3 + $0x844] ss:$16 sps:$4 sm:$0xff]  }
 0x159   : > { %3133 = vmatpush1.bf16.msra.mxu1 %v8912_v13  ;;  %3228 = vmatprep.subr.bf16.mxu0 %v8919_v52  ;;  %v791_v20 = vpop.f32.mrf.mxu0  ;;  %v8937_v13 = vld [vmem:[#allocation3 + $0x72c] ss:$16 sps:$4 sm:$0xff]   ;;  %v9959_v52 = vrot.slane %v7766_v39, 2 }
 0x15a   : > { %3134 = vmatprep.subr.bf16.mxu1 %v8922_v55  ;;  %v9929_v24 = vadd.f32 %v9863_v6, %v791_v20  ;;  %v3505_v6 = vrot.slane %v9912_v12, 2 }
 0x15b   : > { %v793_v28 = vpop.f32.mrf.mxu0 }
 0x15c   : > { %3229 = vmatpush1.bf16.msra.mxu0 %v8917_v58  ;;  %v9944_v34 = vadd.f32 %v9872_v51, %v793_v28  ;;  %v8935_v58 = vld [vmem:[#allocation3 + $0x728] ss:$16 sps:$4 sm:$0xff]   ;;  %v8949_v28 = vld [vmem:[#allocation3 + $0x6ec] ss:$16 sps:$4 sm:$0xff]  }
 0x15d   : > { %3135 = vmatpush1.bf16.msra.mxu1 %v8920_v59  ;;  %3230 = vmatprep.subr.bf16.mxu0 %v8925_v40  ;;  %v795_v42 = vpop.f32.mrf.mxu0  ;;  %v8938_v59 = vld [vmem:[#allocation3 + $0x860] ss:$16 sps:$4 sm:$0xff]  }
 0x15e   : > { %3136 = vmatprep.subr.bf16.mxu1 %v8928_v3  ;;  %v9952_v41 = vadd.f32 %v9877_v31, %v795_v42  ;;  %v3511_v31 = vrot.slane %v9948_v22, 2  ;;  %v8950_v42 = vld [vmem:[#allocation3 + $0x820] ss:$16 sps:$4 sm:$0xff]   ;;  %v9053_v22 = vld [vmem:[#allocation3 + $0x968] ss:$16 sps:$4 sm:$0xff]  }
 0x15f   : > { %v799_v45 = vpop.f32.mrf.mxu0  ;;  %7756 = vmatmul.mubr.msk.bf16.gmra.mxu0 %vm748_vm0, %v9937_v27 }
 0x160   : > { %v895_v51 = vpop.f32.mrf.mxu1  ;;  %3231 = vmatpush1.bf16.msra.mxu0 %v8923_v49  ;;  %v9957_v48 = vadd.f32 %v9883_v35, %v799_v45  ;;  %3258 = vmatprep.mubr.bf16.mxu0 %v9870_v16  ;;  %v8944_v49 = vld [vmem:[#allocation3 + $0x840] ss:$16 sps:$4 sm:$0xff]   ;;  %v8952_v16 = vld [vmem:[#allocation3 + $0x824] ss:$16 sps:$4 sm:$0xff]  }
 0x161   : > { %3137 = vmatpush2.bf16.msra.mxu1 %v8926_v25  ;;  %3232 = vmatprep.subr.bf16.mxu0 %v8931_v8  ;;  %v801_v54 = vpop.f32.mrf.mxu0  ;;  %v8958_v45 = vld [vmem:[#allocation3 + $0x804] ss:$16 sps:$4 sm:$0xff]  }
 0x162   : > { %3138 = vmatprep.subr.bf16.mxu1 %v8934_v37  ;;  %v897_v55 = vpop.f32.mrf.mxu1  ;;  %v9965_v30 = vadd.f32 %v9889_v46, %v801_v54  ;;  %v8941_v46 = vld [vmem:[#allocation3 + $0x708] ss:$16 sps:$4 sm:$0xff]  }
 0x163   : > { %v803_v60 = vpop.f32.mrf.mxu0  ;;  %v8953_v54 = vld [vmem:[#allocation3 + $0x6c8] ss:$16 sps:$4 sm:$0xff]  }
 0x164   : > { %v899_v35 = vpop.f32.mrf.mxu1  ;;  %3233 = vmatpush1.bf16.msra.mxu0 %v8929_v7  ;;  %v9969_v40 = vadd.f32 %v9905_v1, %v803_v60  ;;  %v8961_v60 = vld [vmem:[#allocation3 + $0x8ac] ss:$16 sps:$4 sm:$0xff]  }
 0x165   : > { %3139 = vmatpush2.bf16.msra.mxu1 %v8932_v44  ;;  %3234 = vmatprep.subr.bf16.mxu0 %v8937_v13  ;;  %v805_v3 = vpop.f32.mrf.mxu0 }
 0x166   : > { %3140 = vmatprep.subr.bf16.mxu1 %v8940_v47  ;;  %v901_v20 = vpop.f32.mrf.mxu1  ;;  %v9971_v23 = vadd.f32 %v858_v29, %v805_v3  ;;  %v8955_v29 = vld [vmem:[#allocation3 + $0x6cc] ss:$16 sps:$4 sm:$0xff]  }
 0x167   : > { %v948_v25 = vpop.f32.mrf.mxu0 }
 0x168   : > { %v905_v8 = vpop.f32.mrf.mxu1  ;;  %3235 = vmatpush1.bf16.msra.mxu0 %v8935_v58  ;;  %v9973_v37 = vadd.f32 %v948_v25, %v895_v51  ;;  %v8956_v58 = vld [vmem:[#allocation3 + $0x800] ss:$16 sps:$4 sm:$0xff]  }
 0x169   : > { %3141 = vmatpush2.bf16.msra.mxu1 %v8938_v59  ;;  %3236 = vmatprep.subr.bf16.mxu0 %v8943_v61  ;;  %v950_v39 = vpop.f32.mrf.mxu0  ;;  %v8964_v61 = vld [vmem:[#allocation3 + $0x7e4] ss:$16 sps:$4 sm:$0xff]  }
 0x16a   : > { %3142 = vmatprep.subr.bf16.mxu1 %v8946_v63  ;;  %v9975_v1 = vadd.f32 %v950_v39, %v897_v55  ;;  %v907_v44 = vpop.f32.mrf.mxu1 }
 0x16b   : > { %v952_v7 = vpop.f32.mrf.mxu0 }
 0x16c   : > { %3237 = vmatpush1.bf16.msra.mxu0 %v8941_v46  ;;  %v9977_v13 = vadd.f32 %v952_v7, %v899_v35  ;;  %v909_v55 = vpop.f32.mrf.mxu1  ;;  %v8959_v46 = vld [vmem:[#allocation3 + $0x8a8] ss:$16 sps:$4 sm:$0xff]   ;;  %v8968_v7 = vld [vmem:[#allocation3 + $0x7c0] ss:$16 sps:$4 sm:$0xff]  }
 0x16d   : > { %3143 = vmatpush2.bf16.msra.mxu1 %v8944_v49  ;;  %3238 = vmatprep.subr.bf16.mxu0 %v8949_v28  ;;  %v954_v47 = vpop.f32.mrf.mxu0  ;;  %v8962_v49 = vld [vmem:[#allocation3 + $0x7e0] ss:$16 sps:$4 sm:$0xff]   ;;  %v8967_v28 = vld [vmem:[#allocation3 + $0x88c] ss:$16 sps:$4 sm:$0xff]  }
 0x16e   : > { %3144 = vmatprep.subr.bf16.mxu1 %v8952_v16  ;;  %v9979_v51 = vadd.f32 %v954_v47, %v901_v20  ;;  %v911_v20 = vpop.f32.mrf.mxu1  ;;  %v8970_v16 = vld [vmem:[#allocation3 + $0x7c4] ss:$16 sps:$4 sm:$0xff]   ;;  %v2687_v47 = vor.u32 %v9909_v10, %v9907_v5  ;;  %v8985_v5 = vld [vmem:[#allocation3 + $0x82c] ss:$16 sps:$4 sm:$0xff]   ;;  %v8994_v10 = vld [vmem:[#allocation3 + $0x8c8] ss:$16 sps:$4 sm:$0xff]  }
 0x16f   : > { %v958_v59 = vpop.f32.mrf.mxu0 }
 0x170   : > { %3239 = vmatpush1.bf16.msra.mxu0 %v8947_v11  ;;  %v9981_v63 = vadd.f32 %v958_v59, %v905_v8  ;;  %v8981_v59 = vld [vmem:[#allocation3 + $0x84c] ss:$16 sps:$4 sm:$0xff]  }
 0x171   : > { %3145 = vmatpush2.bf16.msra.mxu1 %v8950_v42  ;;  %3240 = vmatprep.subr.bf16.mxu0 %v8955_v29  ;;  %v960_v3 = vpop.f32.mrf.mxu0  ;;  %v8965_v42 = vld [vmem:[#allocation3 + $0x888] ss:$16 sps:$4 sm:$0xff]   ;;  %v8978_v29 = vld [vmem:[#allocation3 + $0x86c] ss:$16 sps:$4 sm:$0xff]  }
 0x172   : > { %3146 = vmatprep.subr.bf16.mxu1 %v8958_v45  ;;  %v9983_v35 = vadd.f32 %v960_v3, %v907_v44  ;;  %v8988_v44 = vld [vmem:[#allocation3 + $0x8ec] ss:$16 sps:$4 sm:$0xff]   ;;  %v2679_v45 = vor.u32 %v9898_v57, %v9896_v56  ;;  %v8979_v57 = vld [vmem:[#allocation3 + $0x848] ss:$16 sps:$4 sm:$0xff]  }
 0x173   : > { %v962_v25 = vpop.f32.mrf.mxu0  ;;  %v8983_v3 = vld [vmem:[#allocation3 + $0x828] ss:$16 sps:$4 sm:$0xff]  }
 0x174   : > { %3241 = vmatpush1.bf16.msra.mxu0 %v8953_v54  ;;  %v9985_v39 = vadd.f32 %v962_v25, %v909_v55  ;;  %v2739_v54 = vor.u32 %v9919_v17, %v9917_v15  ;;  %v8986_v55 = vld [vmem:[#allocation3 + $0x8e8] ss:$16 sps:$4 sm:$0xff]   ;;  %v2730_v15 = vor.u32 %v9934_v26, %v9932_v18  ;;  %v9002_v17 = vld [vmem:[#allocation3 + $0x9e4] ss:$16 sps:$4 sm:$0xff]   ;;  %v8999_v25 = vld [vmem:[#allocation3 + $0x7ec] ss:$16 sps:$4 sm:$0xff]  }
 0x175   : > { %3147 = vmatpush2.bf16.msra.mxu1 %v8956_v58  ;;  %3242 = vmatprep.subr.bf16.mxu0 %v8961_v60  ;;  %v964_v11 = vpop.f32.mrf.mxu0  ;;  %v8976_v58 = vld [vmem:[#allocation3 + $0x868] ss:$16 sps:$4 sm:$0xff]   ;;  %v2688_v60 = vsel %vm2671_vm3, %v2679_v45, %v2687_v47  ;;  %v9000_v26 = vld [vmem:[#allocation3 + $0x9e0] ss:$16 sps:$4 sm:$0xff]  }
 0x176   : > { %3148 = vmatprep.subr.bf16.mxu1 %v8964_v61  ;;  %v9987_v8 = vadd.f32 %v964_v11, %v911_v20  ;;  %v8996_v61 = vld [vmem:[#allocation3 + $0x8cc] ss:$16 sps:$4 sm:$0xff]   ;;  %v9998_v56 = vsel %vm2671_vm3, %v9859_v2, %v2739_v54  ;;  %v2731_v2 = vsel %vm2671_vm3, %v2687_v47, %v2730_v15  ;;  %v8997_v18 = vld [vmem:[#allocation3 + $0x7e8] ss:$16 sps:$4 sm:$0xff]   ;;  %v9006_v11 = vld [vmem:[#allocation3 + $0x9c0] ss:$16 sps:$4 sm:$0xff]  }
 0x177   : > { %v9005_v20 = vld [vmem:[#allocation3 + $0x7cc] ss:$16 sps:$4 sm:$0xff]   ;;  %v9012_v45 = vld [vmem:[#allocation3 + $0xb20] ss:$16 sps:$4 sm:$0xff]   ;;  %v9017_v47 = vld [vmem:[#allocation3 + $0x984] ss:$16 sps:$4 sm:$0xff]  }
 0x178   : > { %3243 = vmatpush2.bf16.msra.mxu0 %v8959_v46  ;;  %v8993_v46 = vld [vmem:[#allocation3 + $0x80c] ss:$16 sps:$4 sm:$0xff]   ;;  %v9023_v54 = vld [vmem:[#allocation3 + $0xb04] ss:$16 sps:$4 sm:$0xff]  }
 0x179   : > { %3149 = vmatpush2.bf16.msra.mxu1 %v8962_v49  ;;  %3244 = vmatprep.subr.bf16.mxu0 %v8967_v28  ;;  %v8991_v49 = vld [vmem:[#allocation3 + $0x808] ss:$16 sps:$4 sm:$0xff]   ;;  %v9008_v28 = vld [vmem:[#allocation3 + $0x9c4] ss:$16 sps:$4 sm:$0xff]  }
 0x17a   : > { %3150 = vmatprep.subr.bf16.mxu1 %v8970_v16  ;;  %v9003_v16 = vld [vmem:[#allocation3 + $0x7c8] ss:$16 sps:$4 sm:$0xff]   ;;  %v9032_v15 = vld [vmem:[#allocation3 + $0x924] ss:$16 sps:$4 sm:$0xff]  }
 0x17c   : > { %3245 = vmatpush2.bf16.msra.mxu0 %v8965_v42  ;;  %v9011_v42 = vld [vmem:[#allocation3 + $0x9a4] ss:$16 sps:$4 sm:$0xff]  }
 0x17d   : > { %3151 = vmatpush2.bf16.msra.mxu1 %v8968_v7  ;;  %3246 = vmatprep.subr.bf16.mxu0 %v8978_v29  ;;  %v9014_v7 = vld [vmem:[#allocation3 + $0xb24] ss:$16 sps:$4 sm:$0xff]   ;;  %v1618_v29 = vpop.f32.mrf.mxu0 }
 0x17e   : > { %3291 = vmatprep.subr.bf16.mxu1 %v8988_v44  ;;  %v9009_v44 = vld [vmem:[#allocation3 + $0x9a0] ss:$16 sps:$4 sm:$0xff]  }
 0x180   : > { %3153 = vmatmul.mubr.bf16.vlgmr.msra.gmra.mxu1 %v2688_v60  ;;  %3247 = vmatpush2.bf16.msra.mxu0 %v8976_v58  ;;  %v1620_v58 = vpop.f32.mrf.mxu0 }
 0x181   : > { %3162 = vmatprep.mubr.bf16.mxu1 %v9998_v56  ;;  %3248 = vmatprep.subr.bf16.mxu0 %v8981_v59  ;;  %v9015_v59 = vld [vmem:[#allocation3 + $0x980] ss:$16 sps:$4 sm:$0xff]  }
 0x182   : > { %3292 = vmatpush1.bf16.msra.mxu1 %v8986_v55  ;;  %v9020_v55 = vld [vmem:[#allocation3 + $0x964] ss:$16 sps:$4 sm:$0xff]  }
 0x183   : > { %3293 = vmatprep.subr.bf16.mxu1 %v8996_v61  ;;  %v9029_v61 = vld [vmem:[#allocation3 + $0x9ec] ss:$16 sps:$4 sm:$0xff]  }
 0x184   : > { %3249 = vmatpush2.bf16.msra.mxu0 %v8979_v57  ;;  %v10015_v57 = vsel %vm3497_vm4, %v3501_v9, %v3502_v4 }
 0x185   : > { %3250 = vmatprep.subr.bf16.mxu0 %v8985_v5  ;;  %v1622_v5 = vpop.f32.mrf.mxu0 }
 0x186   : > { %3294 = vmatpush1.bf16.msra.mxu1 %v8994_v10  ;;  %v9018_v10 = vld [vmem:[#allocation3 + $0x960] ss:$16 sps:$4 sm:$0xff]  }
 0x187   : > { %3883 = vmatprep.subr.bf16.mxu1 %v9002_v17 }
 0x188   : > { %3163 = vmatmul.mubr.bf16.gmra.mxu1 %v2731_v2  ;;  %3251 = vmatpush2.bf16.msra.mxu0 %v8983_v3 }
 0x189   : > { %3311 = vmatprep.mubr.bf16.mxu1 %v9562_v0  ;;  %3252 = vmatprep.subr.bf16.mxu0 %v8993_v46 }
 0x18c   : > { %3253 = vmatpush2.bf16.msra.mxu0 %v8991_v49 }
 0x18d   : > { %3254 = vmatprep.subr.bf16.mxu0 %v8999_v25  ;;  %v9027_v25 = vld [vmem:[#allocation3 + $0x9e8] ss:$16 sps:$4 sm:$0xff]  }
 0x190   : > { %7757 = vmatmul.mubr.msk.bf16.vlgmr.msra.gmra.mxu1 %vm748_vm0, %v9894_v50  ;;  %3255 = vmatpush2.bf16.msra.mxu0 %v8997_v18  ;;  %v9021_v50 = vld [vmem:[#allocation3 + $0xb00] ss:$16 sps:$4 sm:$0xff]  }
 0x191   : > { %3884 = vmatpush1.bf16.msra.mxu1 %v9000_v26  ;;  %3256 = vmatprep.subr.bf16.mxu0 %v9005_v20  ;;  %v9030_v18 = vld [vmem:[#allocation3 + $0x920] ss:$16 sps:$4 sm:$0xff]   ;;  %v9037_v20 = vld [vmem:[#allocation3 + $0x9cc] ss:$16 sps:$4 sm:$0xff]  }
 0x192   : > { %3885 = vmatprep.subr.bf16.mxu1 %v9008_v28  ;;  %3321 = vmatprep.mubr.bf16.mxu1 %v9562_v0  ;;  %v9040_v28 = vld [vmem:[#allocation3 + $0x904] ss:$16 sps:$4 sm:$0xff]  }
 0x194   : > { %3257 = vmatpush2.bf16.msra.mxu0 %v9003_v16 }
 0x195   : > { %3886 = vmatpush1.bf16.msra.mxu1 %v9006_v11  ;;  %3948 = vmatprep.subr.bf16.mxu0 %v9014_v7 }
 0x196   : > { %3887 = vmatprep.subr.bf16.mxu1 %v9011_v42  ;;  %v10031_v42 = vsel %vm3497_vm4, %v3504_v32, %v3505_v6 }
 0x197   : > { %3259 = vmatmul.mubr.bf16.vlgmr.msra.gmra.mxu0 %v2688_v60  ;;  %v1624_v60 = vpop.f32.mrf.mxu0 }
 0x198   : > { %7758 = vmatmul.mubr.msk.bf16.gmra.mxu1 %vm748_vm0, %v9937_v27  ;;  %3949 = vmatpush1.bf16.msra.mxu0 %v9012_v45  ;;  %v9026_v27 = vld [vmem:[#allocation3 + $0x944] ss:$16 sps:$4 sm:$0xff]   ;;  %v9038_v45 = vld [vmem:[#allocation3 + $0x900] ss:$16 sps:$4 sm:$0xff]  }
 0x199   : > { %3888 = vmatpush1.bf16.msra.mxu1 %v9009_v44  ;;  %3268 = vmatprep.mubr.bf16.mxu0 %v9998_v56  ;;  %v1628_v17 = vpop.f32.mrf.mxu0  ;;  %v9035_v44 = vld [vmem:[#allocation3 + $0x9c8] ss:$16 sps:$4 sm:$0xff]  }
 0x19a   : > { %3889 = vmatprep.subr.bf16.mxu1 %v9017_v47  ;;  %3950 = vmatprep.subr.bf16.mxu0 %v9023_v54  ;;  %v9043_v54 = vld [vmem:[#allocation3 + $0x9ac] ss:$16 sps:$4 sm:$0xff]  }
 0x19b   : > { %3915 = vmatprep.mubr.bf16.mxu1 %v10015_v57  ;;  %v1630_v16 = vpop.f32.mrf.mxu0 }
 0x19c   : > { %3951 = vmatpush1.bf16.msra.mxu0 %v9021_v50 }
 0x19d   : > { %3890 = vmatpush1.bf16.msra.mxu1 %v9015_v59  ;;  %3989 = vmatprep.subr.bf16.mxu0 %v9029_v61  ;;  %v1632_v47 = vpop.f32.mrf.mxu0  ;;  %v9044_v61 = vld [vmem:[#allocation3 + $0xae0] ss:$16 sps:$4 sm:$0xff]  }
 0x19e   : > { %3891 = vmatprep.subr.bf16.mxu1 %v9020_v55  ;;  %v9041_v55 = vld [vmem:[#allocation3 + $0x9a8] ss:$16 sps:$4 sm:$0xff]  }
 0x19f   : > { %3269 = vmatmul.mubr.bf16.gmra.mxu0 %v2731_v2 }
 0x1a0   : > { %v1565_v9 = vpop.f32.mrf.mxu1  ;;  %3968 = vmatprep.mubr.bf16.mxu0 %v9562_v0 }
 0x1a1   : > { %3892 = vmatpush1.bf16.msra.mxu1 %v9018_v10  ;;  %v1619_v3 = vadd.f32 %v1618_v29, %v1565_v9  ;;  %v1634_v10 = vpop.f32.mrf.mxu0 }
 0x1a2   : > { %3893 = vmatprep.subr.bf16.mxu1 %v9026_v27  ;;  %v1567_v56 = vpop.f32.mrf.mxu1  ;;  %v9049_v27 = vld [vmem:[#allocation3 + $0x98c] ss:$16 sps:$4 sm:$0xff]  }
 0x1a3   : > { %v10021_v46 = vadd.f32 %v1619_v3, %v9915_v14  ;;  %v1621_v49 = vadd.f32 %v1620_v58, %v1567_v56  ;;  %v9046_v58 = vld [vmem:[#allocation3 + $0xae4] ss:$16 sps:$4 sm:$0xff]   ;;  %v9047_v3 = vld [vmem:[#allocation3 + $0x988] ss:$16 sps:$4 sm:$0xff]   ;;  %v9050_v56 = vld [vmem:[#allocation3 + $0xac0] ss:$16 sps:$4 sm:$0xff]  }
 0x1a4   : > { %v1569_v26 = vpop.f32.mrf.mxu1 }
 0x1a5   : > { %v10024_v2 = vadd.f32 %v1621_v49, %v9929_v24  ;;  %3894 = vmatpush1.bf16.msra.mxu1 %v9024_v21  ;;  %v1623_v11 = vadd.f32 %v1622_v5, %v1569_v26  ;;  %v9055_v49 = vld [vmem:[#allocation3 + $0x96c] ss:$16 sps:$4 sm:$0xff]   ;;  %v9064_v26 = vld [vmem:[#allocation3 + $0xa84] ss:$16 sps:$4 sm:$0xff]  }
 0x1a6   : > { %3895 = vmatprep.subr.bf16.mxu1 %v9032_v15  ;;  %v1571_v14 = vpop.f32.mrf.mxu1 }
 0x1a7   : > { %v10034_v7 = vadd.f32 %v1623_v11, %v9944_v34  ;;  %v1625_v29 = vadd.f32 %v1624_v60, %v1571_v14  ;;  %7840 = vmatmul.mubr.msk.bf16.vlgmr.msra.gmra.mxu0 %vm748_vm0, %v10031_v42  ;;  %v9052_v60 = vld [vmem:[#allocation3 + $0xac4] ss:$16 sps:$4 sm:$0xff]   ;;  %v9067_v11 = vld [vmem:[#allocation3 + $0x92c] ss:$16 sps:$4 sm:$0xff]  }
 0x1a8   : > { %v1575_v24 = vpop.f32.mrf.mxu1  ;;  %3990 = vmatpush1.bf16.msra.mxu0 %v9027_v25  ;;  %3978 = vmatprep.mubr.bf16.mxu0 %v9562_v0  ;;  %v9058_v25 = vld [vmem:[#allocation3 + $0xaa4] ss:$16 sps:$4 sm:$0xff]  }
 0x1a9   : > { %v10039_v62 = vadd.f32 %v1625_v29, %v9952_v41  ;;  %3896 = vmatpush1.bf16.msra.mxu1 %v9030_v18  ;;  %v1629_v32 = vadd.f32 %v1628_v17, %v1575_v24  ;;  %3991 = vmatprep.subr.bf16.mxu0 %v9037_v20  ;;  %v9061_v18 = vld [vmem:[#allocation3 + $0x94c] ss:$16 sps:$4 sm:$0xff]   ;;  %v9070_v14 = vld [vmem:[#allocation3 + $0xa64] ss:$16 sps:$4 sm:$0xff]  }
 0x1aa   : > { %3897 = vmatprep.subr.bf16.mxu1 %v9040_v28  ;;  %v1577_v34 = vpop.f32.mrf.mxu1  ;;  %v9059_v28 = vld [vmem:[#allocation3 + $0x948] ss:$16 sps:$4 sm:$0xff]  }
 0x1ab   : > { %v10042_v59 = vadd.f32 %v1629_v32, %v9957_v48  ;;  %v1631_v50 = vadd.f32 %v1630_v16, %v1577_v34  ;;  %v10053_v48 = vsel %vm3497_vm4, %v3505_v6, %v3511_v31  ;;  %v9056_v31 = vld [vmem:[#allocation3 + $0xaa0] ss:$16 sps:$4 sm:$0xff]   ;;  %v9073_v32 = vld [vmem:[#allocation3 + $0x90c] ss:$16 sps:$4 sm:$0xff]  }
 0x1ac   : > { %v1579_v5 = vpop.f32.mrf.mxu1  ;;  %3992 = vmatpush1.bf16.msra.mxu0 %v9035_v44  ;;  %v9062_v16 = vld [vmem:[#allocation3 + $0xa80] ss:$16 sps:$4 sm:$0xff]  }
 0x1ad   : > { %v10046_v41 = vadd.f32 %v1631_v50, %v9965_v30  ;;  %3898 = vmatpush1.bf16.msra.mxu1 %v9038_v45  ;;  %v1633_v21 = vadd.f32 %v1632_v47, %v1579_v5  ;;  %3993 = vmatprep.subr.bf16.mxu0 %v9043_v54  ;;  %v9065_v47 = vld [vmem:[#allocation3 + $0x928] ss:$16 sps:$4 sm:$0xff]   ;;  %v9068_v54 = vld [vmem:[#allocation3 + $0xa60] ss:$16 sps:$4 sm:$0xff]   ;;  %v9076_v50 = vld [vmem:[#allocation3 + $0xa44] ss:$16 sps:$4 sm:$0xff]  }
 0x1ae   : > { %3899 = vmatprep.subr.bf16.mxu1 %v9046_v58  ;;  %v1581_v9 = vpop.f32.mrf.mxu1 }
 0x1af   : > { %v10056_v15 = vadd.f32 %v1633_v21, %v9969_v40  ;;  %v1635_v17 = vadd.f32 %v1634_v10, %v1581_v9  ;;  %7841 = vmatmul.mubr.msk.bf16.gmra.mxu0 %vm748_vm0, %v10053_v48 }
 0x1b0   : > { %v1724_v30 = vpop.f32.mrf.mxu1  ;;  %3994 = vmatpush1.bf16.msra.mxu0 %v9041_v55  ;;  %4021 = vmatprep.mubr.bf16.mxu0 %v10015_v57 }
 0x1b1   : > { %v10061_v12 = vadd.f32 %v1635_v17, %v9971_v23  ;;  %3900 = vmatpush2.bf16.msra.mxu1 %v9044_v61  ;;  %3995 = vmatprep.subr.bf16.mxu0 %v9049_v27  ;;  %v9071_v27 = vld [vmem:[#allocation3 + $0x908] ss:$16 sps:$4 sm:$0xff]   ;;  %v9079_v17 = vld [vmem:[#allocation3 + $0xaec] ss:$16 sps:$4 sm:$0xff]  }
 0x1b2   : > { %3901 = vmatprep.subr.bf16.mxu1 %v9052_v60  ;;  %v1726_v6 = vpop.f32.mrf.mxu1  ;;  %v9074_v60 = vld [vmem:[#allocation3 + $0xa40] ss:$16 sps:$4 sm:$0xff]  }
 0x1b4   : > { %v1728_v40 = vpop.f32.mrf.mxu1  ;;  %3996 = vmatpush1.bf16.msra.mxu0 %v9047_v3  ;;  %v9082_v3 = vld [vmem:[#allocation3 + $0xa24] ss:$16 sps:$4 sm:$0xff]  }
 0x1b5   : > { %3902 = vmatpush2.bf16.msra.mxu1 %v9050_v56  ;;  %3997 = vmatprep.subr.bf16.mxu0 %v9055_v49 }
 0x1b6   : > { %3903 = vmatprep.subr.bf16.mxu1 %v9058_v25  ;;  %v1730_v20 = vpop.f32.mrf.mxu1  ;;  %v9077_v25 = vld [vmem:[#allocation3 + $0xae8] ss:$16 sps:$4 sm:$0xff]  }
 0x1b7   : > { %v1671_v23 = vpop.f32.mrf.mxu0 }
 0x1b8   : > { %v1734_v29 = vpop.f32.mrf.mxu1  ;;  %3998 = vmatpush1.bf16.msra.mxu0 %v9053_v22  ;;  %v1725_v44 = vadd.f32 %v1724_v30, %v1671_v23  ;;  %v9086_v23 = vld [vmem:[#allocation3 + $0xa00] ss:$16 sps:$4 sm:$0xff]  }
 0x1b9   : > { %3904 = vmatpush2.bf16.msra.mxu1 %v9056_v31  ;;  %3999 = vmatprep.subr.bf16.mxu0 %v9061_v18  ;;  %v1673_v45 = vpop.f32.mrf.mxu0  ;;  %v9088_v18 = vld [vmem:[#allocation3 + $0xa04] ss:$16 sps:$4 sm:$0xff]  }
 0x1ba   : > { %3905 = vmatprep.subr.bf16.mxu1 %v9064_v26  ;;  %v10065_v57 = vadd.f32 %v1725_v44, %v9973_v37  ;;  %v1727_v24 = vadd.f32 %v1726_v6, %v1673_v45  ;;  %v1736_v34 = vpop.f32.mrf.mxu1  ;;  %v9080_v6 = vld [vmem:[#allocation3 + $0xa20] ss:$16 sps:$4 sm:$0xff]   ;;  %v9097_v44 = vld [vmem:[#allocation3 + $0xa8c] ss:$16 sps:$4 sm:$0xff]   ;;  %v9102_v45 = vld [vmem:[#allocation3 + $0xb28] ss:$16 sps:$4 sm:$0xff]  }
 0x1bb   : > { %v1675_v58 = vpop.f32.mrf.mxu0 }
 0x1bc   : > { %v10068_v55 = vadd.f32 %v1727_v24, %v9975_v1  ;;  %4000 = vmatpush1.bf16.msra.mxu0 %v9059_v28  ;;  %v1729_v61 = vadd.f32 %v1728_v40, %v1675_v58  ;;  %v1738_v9 = vpop.f32.mrf.mxu1  ;;  %v9085_v40 = vld [vmem:[#allocation3 + $0xacc] ss:$16 sps:$4 sm:$0xff]   ;;  %v9110_v58 = vld [vmem:[#allocation3 + $0xb08] ss:$16 sps:$4 sm:$0xff]  }
 0x1bd   : > { %3906 = vmatpush2.bf16.msra.mxu1 %v9062_v16  ;;  %4001 = vmatprep.subr.bf16.mxu0 %v9067_v11  ;;  %v1677_v5 = vpop.f32.mrf.mxu0  ;;  %v9083_v16 = vld [vmem:[#allocation3 + $0xac8] ss:$16 sps:$4 sm:$0xff]   ;;  %v9094_v11 = vld [vmem:[#allocation3 + $0xaac] ss:$16 sps:$4 sm:$0xff]  }
 0x1be   : > { %3907 = vmatprep.subr.bf16.mxu1 %v9070_v14  ;;  %v10071_v10 = vadd.f32 %v1729_v61, %v9977_v13  ;;  %v1731_v37 = vadd.f32 %v1730_v20, %v1677_v5  ;;  %v1740_v31 = vpop.f32.mrf.mxu1  ;;  %v9104_v14 = vld [vmem:[#allocation3 + $0xb2c] ss:$16 sps:$4 sm:$0xff]  }
 0x1bf   : > { %v1681_v21 = vpop.f32.mrf.mxu0  ;;  %v9112_v24 = vld [vmem:[#allocation3 + $0xb0c] ss:$16 sps:$4 sm:$0xff]  }
 0x1c0   : > { %v10074_v56 = vadd.f32 %v1731_v37, %v9979_v51  ;;  %4002 = vmatpush1.bf16.msra.mxu0 %v9065_v47  ;;  %v1735_v1 = vadd.f32 %v1734_v29, %v1681_v21  ;;  %v9095_v47 = vld [vmem:[#allocation3 + $0xa88] ss:$16 sps:$4 sm:$0xff]  }
 0x1c1   : > { %3908 = vmatpush2.bf16.msra.mxu1 %v9068_v54  ;;  %4003 = vmatprep.subr.bf16.mxu0 %v9073_v32  ;;  %v1683_v30 = vpop.f32.mrf.mxu0  ;;  %v9101_v54 = vld [vmem:[#allocation3 + $0xa6c] ss:$16 sps:$4 sm:$0xff]   ;;  %v9099_v32 = vld [vmem:[#allocation3 + $0xa68] ss:$16 sps:$4 sm:$0xff]  }
 0x1c2   : > { %3909 = vmatprep.subr.bf16.mxu1 %v9076_v50  ;;  %v10077_v49 = vadd.f32 %v1735_v1, %v9981_v63  ;;  %v1737_v13 = vadd.f32 %v1736_v34, %v1683_v30  ;;  %v9118_v34 = vld [vmem:[#allocation3 + $0xa0c] ss:$16 sps:$4 sm:$0xff]   ;;  %v9116_v50 = vld [vmem:[#allocation3 + $0xa08] ss:$16 sps:$4 sm:$0xff]  }
 0x1c3   : > { %v1685_v22 = vpop.f32.mrf.mxu0 }
 0x1c4   : > { %v10080_v26 = vadd.f32 %v1737_v13, %v9983_v35  ;;  %4004 = vmatpush1.bf16.msra.mxu0 %v9071_v27  ;;  %v1739_v51 = vadd.f32 %v1738_v9, %v1685_v22  ;;  %v9092_v35 = vld [vmem:[#allocation3 + $0xaa8] ss:$16 sps:$4 sm:$0xff]  }
 0x1c5   : > { %3910 = vmatpush2.bf16.msra.mxu1 %v9074_v60  ;;  %4005 = vmatprep.subr.bf16.mxu0 %v9079_v17  ;;  %v1687_v20 = vpop.f32.mrf.mxu0 }
 0x1c6   : > { %3911 = vmatprep.subr.bf16.mxu1 %v9082_v3  ;;  %v10083_v28 = vadd.f32 %v1739_v51, %v9985_v39  ;;  %v1741_v63 = vadd.f32 %v1740_v31, %v1687_v20  ;;  %v3500_v39 = vsel %vm3497_vm4, %v3498_v38, %v3499_v33  ;;  %v9115_v38 = vld [vmem:[#allocation3 + $0xa2c] ss:$16 sps:$4 sm:$0xff]  }
 0x1c7   : > { %v10107_v36 = vpop.f32.mrf.mxu0 }
 0x1c8   : > { %v10086_v29 = vadd.f32 %v1741_v63, %v9987_v8  ;;  %4006 = vmatpush2.bf16.msra.mxu0 %v9077_v25  ;;  %v3510_v8 = vsel %vm3497_vm4, %v3502_v4, %v9959_v52  ;;  %v9107_v4 = vld [vmem:[#allocation3 + $0xa48] ss:$16 sps:$4 sm:$0xff]  }
 0x1c9   : > { %3912 = vmatpush2.bf16.msra.mxu1 %v9080_v6  ;;  %4007 = vmatprep.subr.bf16.mxu0 %v9085_v40  ;;  %v9113_v52 = vld [vmem:[#allocation3 + $0xa28] ss:$16 sps:$4 sm:$0xff]   ;;  %v10109_v33 = vpop.f32.mrf.mxu0 }
 0x1ca   : > { %3913 = vmatprep.subr.bf16.mxu1 %v9088_v18 }
 0x1cc   : > { %4008 = vmatpush2.bf16.msra.mxu0 %v9083_v16 }
 0x1cd   : > { %3914 = vmatpush2.bf16.msra.mxu1 %v9086_v23  ;;  %4009 = vmatprep.subr.bf16.mxu0 %v9094_v11 }
 0x1ce   : > { %4054 = vmatprep.subr.bf16.mxu1 %v9104_v14 }
 0x1d0   : > { %3916 = vmatmul.mubr.bf16.vlgmr.msra.gmra.mxu1 %v3500_v39  ;;  %4010 = vmatpush2.bf16.msra.mxu0 %v9092_v35 }
 0x1d1   : > { %3925 = vmatprep.mubr.bf16.mxu1 %v3510_v8  ;;  %4011 = vmatprep.subr.bf16.mxu0 %v9097_v44 }
 0x1d2   : > { %4055 = vmatpush1.bf16.msra.mxu1 %v9102_v45 }
 0x1d3   : > { %4056 = vmatprep.subr.bf16.mxu1 %v9112_v24 }
 0x1d4   : > { %4012 = vmatpush2.bf16.msra.mxu0 %v9095_v47 }
 0x1d5   : > { %4013 = vmatprep.subr.bf16.mxu0 %v9101_v54 }
 0x1d6   : > { %4057 = vmatpush1.bf16.msra.mxu1 %v9110_v58 }
 0x1d8   : > { %3926 = vmatmul.mubr.bf16.gmra.mxu1 %v3508_v43  ;;  %4014 = vmatpush2.bf16.msra.mxu0 %v9099_v32 }
 0x1d9   : > { %4074 = vmatprep.mubr.bf16.mxu1 %v9562_v0  ;;  %4015 = vmatprep.subr.bf16.mxu0 %v9109_v19 }
 0x1dc   : > { %4016 = vmatpush2.bf16.msra.mxu0 %v9107_v4 }
 0x1dd   : > { %4017 = vmatprep.subr.bf16.mxu0 %v9115_v38  ;;  %v9119_v38 = vld [vmem:[#allocation8 + $0xf8] sm:$0xff]  }
 0x1de   : > { %8103 = vmatprep.subr.bf16.mxu1 %v9119_v38  ;;  %v9151_v38 = vld [vmem:[#allocation8 + $0x178] sm:$0xff]  }
 0x1e0   : > { %7842 = vmatmul.mubr.msk.bf16.vlgmr.msra.gmra.mxu1 %vm748_vm0, %v10031_v42  ;;  %4018 = vmatpush2.bf16.msra.mxu0 %v9113_v52  ;;  %v10115_v42 = vpop.f32.mrf.mxu0  ;;  %v9120_v52 = vld [vmem:[#allocation8 + $0x78] sm:$0xff]  }
 0x1e1   : > { %4084 = vmatprep.mubr.bf16.mxu1 %v9562_v0  ;;  %4019 = vmatprep.subr.bf16.mxu0 %v9118_v34  ;;  %v9121_v34 = vld [vmem:[#allocation8 + $0xb8] sm:$0xff]  }
 0x1e2   : > { %v10121_v37 = vpop.f32.mrf.mxu0  ;;  %8104 = vmatpush3.bf16.msra.mxu1 %v9121_v34 }
 0x1e4   : > { %4020 = vmatpush2.bf16.msra.mxu0 %v9116_v50  ;;  %v9123_v50 = vld [vmem:[#allocation8 + $0xf0] sm:$0xff]  }
 0x1e5   : > { %8125 = vmatprep.subr.bf16.mxu0 %v9120_v52  ;;  %8105 = vmatprep.subr.bf16.mxu1 %v9123_v50  ;;  %v9152_v52 = vld [vmem:[#allocation8 + $0x1f8] sm:$0xff]  }
 0x1e7   : > { %4022 = vmatmul.mubr.bf16.vlgmr.msra.gmra.mxu0 %v3500_v39 }
 0x1e8   : > { %7843 = vmatmul.mubr.msk.bf16.gmra.mxu1 %vm748_vm0, %v10053_v48  ;;  %4031 = vmatprep.mubr.bf16.mxu0 %v3510_v8  ;;  %v10125_v48 = vpop.f32.mrf.mxu0 }
 0x1ea   : > { %v10131_v9 = vpop.f32.mrf.mxu0 }
 0x1ec   : > { %v10135_v1 = vpop.f32.mrf.mxu0 }
 0x1ee   : > { %v10137_v25 = vpop.f32.mrf.mxu0 }
 0x1ef   : > { %4032 = vmatmul.mubr.bf16.gmra.mxu0 %v3508_v43 }
 0x1f0   : > { %v10111_v53 = vpop.f32.mrf.mxu1 }
 0x1f2   : > { %v10113_v61 = vpop.f32.mrf.mxu1 }
 0x1f4   : > { %v10117_v5 = vpop.f32.mrf.mxu1 }
 0x1f6   : > { %v10119_v0 = vpop.f32.mrf.mxu1 }
 0x1f8   : > { %v10123_v27 = vpop.f32.mrf.mxu1 }
 0x1fa   : > { %v10127_v60 = vpop.f32.mrf.mxu1 }
 0x1fc   : > { %v10129_v21 = vpop.f32.mrf.mxu1 }
 0x1fe   : > { %v10133_v17 = vpop.f32.mrf.mxu1 }
 0x200   : > { %v2487_v3 = vpop.f32.mrf.mxu1 }
 0x202   : > { %v2489_v30 = vpop.f32.mrf.mxu1 }
 0x204   : > { %v2491_v13 = vpop.f32.mrf.mxu1 }
 0x206   : > { %v2493_v6 = vpop.f32.mrf.mxu1 }
 0x207   : > { %v2434_v22 = vpop.f32.mrf.mxu0 }
 0x208   : > { %v2497_v31 = vpop.f32.mrf.mxu1  ;;  %v2488_v40 = vadd.f32 %v2487_v3, %v2434_v22  ;;  %v9125_v3 = vld [vmem:[#allocation8 + $0xb0] sm:$0xff]   ;;  %v9131_v22 = vld [vmem:[#allocation8 + $0xe0] sm:$0xff]  }
 0x209   : > { %v2436_v18 = vpop.f32.mrf.mxu0  ;;  %8106 = vmatpush3.bf16.msra.mxu1 %v9125_v3 }
 0x20a   : > { %v10140_v51 = vadd.f32 %v2488_v40, %v10065_v57  ;;  %v2490_v20 = vadd.f32 %v2489_v30, %v2436_v18  ;;  %v2499_v16 = vpop.f32.mrf.mxu1  ;;  %v9126_v30 = vld [vmem:[#allocation8 + $0x30] sm:$0xff]   ;;  %v9133_v40 = vld [vmem:[#allocation8 + $0xa0] sm:$0xff]  }
 0x20b   : > { %v2438_v63 = vpop.f32.mrf.mxu0  ;;  %v9134_v18 = vld [vmem:[#allocation8 + $0x20] sm:$0xff]  }
 0x20c   : > { %v10143_v23 = vadd.f32 %v2490_v20, %v10068_v55  ;;  %v2492_v11 = vadd.f32 %v2491_v13, %v2438_v63  ;;  %v2501_v39 = vpop.f32.mrf.mxu1  ;;  %v9128_v13 = vld [vmem:[#allocation8 + $0x68] sm:$0xff]   ;;  %v9135_v20 = vld [vmem:[#allocation8 + $0xd8] sm:$0xff]  }
 0x20d   : > { %v2440_v14 = vpop.f32.mrf.mxu0  ;;  %v9136_v63 = vld [vmem:[#allocation8 + $0x58] sm:$0xff]  }
 0x20e   : > { %10430 = vst [vmem:[#allocation16_spill] sm:$0xff] %v10143_v23  ;;  %v10146_v35 = vadd.f32 %v2492_v11, %v10071_v10  ;;  %v2494_v44 = vadd.f32 %v2493_v6, %v2440_v14  ;;  %v2503_v55 = vpop.f32.mrf.mxu1  ;;  %v9130_v6 = vld [vmem:[#allocation8 + $0x28] sm:$0xff]   ;;  %v9138_v11 = vld [vmem:[#allocation8 + $0x18] sm:$0xff]   ;;  %v9139_v14 = vld [vmem:[#allocation8 + $0xd0] sm:$0xff]  }
 0x20f   : > { %v2444_v45 = vpop.f32.mrf.mxu0 }
 0x210   : > { %10431 = vst [vmem:[#allocation17_spill] sm:$0xff] %v10146_v35  ;;  %v10149_v24 = vadd.f32 %v2494_v44, %v10074_v56  ;;  %v2498_v8 = vadd.f32 %v2497_v31, %v2444_v45  ;;  %v9132_v31 = vld [vmem:[#allocation8 + $0x60] sm:$0xff]   ;;  %v9140_v44 = vld [vmem:[#allocation8 + $0x50] sm:$0xff]   ;;  %v2386_v35 = vadd.f32 %v10115_v42, %v10117_v5 }
 0x211   : > { %v2446_v57 = vpop.f32.mrf.mxu0  ;;  %v9141_v45 = vld [vmem:[#allocation8 + $0x90] sm:$0xff]  }
 0x212   : > { %10432 = vst [vmem:[#allocation18_spill] sm:$0xff] %v10149_v24  ;;  %v10152_v47 = vadd.f32 %v2498_v8, %v10077_v49  ;;  %v2500_v54 = vadd.f32 %v2499_v16, %v2446_v57  ;;  %v9122_v49 = vld [vmem:[#allocation8 + $0x38] sm:$0xff]   ;;  %v9143_v8 = vld [vmem:[#allocation8 + $0xc8] sm:$0xff]  }
 0x213   : > { %v2448_v58 = vpop.f32.mrf.mxu0  ;;  %8126 = vmatpush3.bf16.msra.mxu0 %v9122_v49  ;;  %v9137_v16 = vld [vmem:[#allocation8 + $0x98] sm:$0xff]   ;;  %v9144_v57 = vld [vmem:[#allocation8 + $0x48] sm:$0xff]  }
 0x214   : > { %10433 = vst [vmem:[#allocation19_spill] sm:$0xff] %v10152_v47  ;;  %v10155_v32 = vadd.f32 %v2500_v54, %v10080_v26  ;;  %v2502_v19 = vadd.f32 %v2501_v39, %v2448_v58  ;;  %v9124_v26 = vld [vmem:[#allocation8 + $0x70] sm:$0xff]   ;;  %v9145_v54 = vld [vmem:[#allocation8 + $0x88] sm:$0xff]  }
 0x215   : > { %v2450_v10 = vpop.f32.mrf.mxu0  ;;  %8127 = vmatprep.subr.bf16.mxu0 %v9124_v26  ;;  %v9142_v39 = vld [vmem:[#allocation8 + $0x10] sm:$0xff]   ;;  %v9146_v58 = vld [vmem:[#allocation8 + $0x8] sm:$0xff]  }
 0x216   : > { %10434 = vst [vmem:[#allocation20_spill] sm:$0xff] %v10155_v32  ;;  %v10158_v43 = vadd.f32 %v2502_v19, %v10083_v28  ;;  %v2504_v4 = vadd.f32 %v2503_v55, %v2450_v10  ;;  %v9127_v28 = vld [vmem:[#allocation8 + $0xe8] sm:$0xff]   ;;  %v9147_v55 = vld [vmem:[#allocation8 + $0xc0] sm:$0xff]  }
 0x217   : > { %8128 = vmatpush3.bf16.msra.mxu0 %v9126_v30  ;;  %8107 = vmatprep.subr.bf16.mxu1 %v9127_v28  ;;  %v9148_v19 = vld [vmem:[#allocation8 + $0x40] sm:$0xff]   ;;  %v3207_v34 = vpop.f32.mrf.mxu0 }
 0x218   : > { %10435 = vst [vmem:[#allocation21_spill] sm:$0xff] %v10158_v43  ;;  %v10161_v56 = vadd.f32 %v2504_v4, %v10086_v29  ;;  %v9129_v29 = vld [vmem:[#allocation8 + $0xa8] sm:$0xff]   ;;  %8129 = vmatprep.subr.bf16.mxu0 %v9128_v13  ;;  %v9149_v10 = vld [vmem:[#allocation8 + $0x80] sm:$0xff]  }
 0x219   : > { %8108 = vmatpush3.bf16.msra.mxu1 %v9129_v29  ;;  %v9150_v4 = vld [vmem:[#allocation8] sm:$0xff]   ;;  %v3209_v49 = vpop.f32.mrf.mxu0 }
 0x21a   : > { %10436 = vst [vmem:[#allocation22_spill] sm:$0xff] %v10161_v56  ;;  %8109 = vmatprep.subr.bf16.mxu1 %v9131_v22 }
 0x21b   : > { %8130 = vmatpush3.bf16.msra.mxu0 %v9130_v6  ;;  %v3211_v50 = vpop.f32.mrf.mxu0 }
 0x21c   : > { %8131 = vmatprep.subr.bf16.mxu0 %v9132_v31 }
 0x21d   : > { %8110 = vmatpush3.bf16.msra.mxu1 %v9133_v40  ;;  %v3213_v26 = vpop.f32.mrf.mxu0 }
 0x21e   : > { %8111 = vmatprep.subr.bf16.mxu1 %v9135_v20 }
 0x21f   : > { %8132 = vmatpush3.bf16.msra.mxu0 %v9134_v18  ;;  %v3217_v30 = vpop.f32.mrf.mxu0 }
 0x220   : > { %8133 = vmatprep.subr.bf16.mxu0 %v9136_v63 }
 0x221   : > { %8112 = vmatpush3.bf16.msra.mxu1 %v9137_v16  ;;  %v10163_v13 = vpop.f32.mrf.mxu0 }
 0x222   : > { %8113 = vmatprep.subr.bf16.mxu1 %v9139_v14 }
 0x223   : > { %8134 = vmatpush3.bf16.msra.mxu0 %v9138_v11  ;;  %v10165_v6 = vpop.f32.mrf.mxu0 }
 0x224   : > { %8135 = vmatprep.subr.bf16.mxu0 %v9140_v44 }
 0x225   : > { %8114 = vmatpush3.bf16.msra.mxu1 %v9141_v45  ;;  %v10167_v31 = vpop.f32.mrf.mxu0 }
 0x226   : > { %8115 = vmatprep.subr.bf16.mxu1 %v9143_v8 }
 0x227   : > { %8136 = vmatpush3.bf16.msra.mxu0 %v9142_v39 }
 0x228   : > { %8137 = vmatprep.subr.bf16.mxu0 %v9144_v57 }
 0x229   : > { %8116 = vmatpush3.bf16.msra.mxu1 %v9145_v54 }
 0x22a   : > { %8117 = vmatprep.subr.bf16.mxu1 %v9147_v55 }
 0x22b   : > { %8138 = vmatpush3.bf16.msra.mxu0 %v9146_v58 }
 0x22c   : > { %8139 = vmatprep.subr.bf16.mxu0 %v9148_v19 }
 0x22d   : > { %8118 = vmatpush3.bf16.msra.mxu1 %v9149_v10 }
 0x22e   : > { %8147 = vmatprep.subr.bf16.mxu1 %v9151_v38  ;;  %v4161_v38 = vlaneseq }
 0x22f   : > { %8140 = vmatpush3.bf16.msra.mxu0 %v9150_v4 }
 0x230   : > { %8169 = vmatprep.subr.bf16.mxu0 %v9152_v52  ;;  %v10201_v43 = vshrl.u32 %v4161_v38, 7 }
 0x232   : > { %v10210_v24 = vsub.s32 0, %v10201_v43 }
 0x240   : > { %v3154_v3 = vpop.f32.mrf.mxu1 }
 0x242   : > { %v3156_v28 = vpop.f32.mrf.mxu1 }
 0x244   : > { %v3158_v29 = vpop.f32.mrf.mxu1 }
 0x245   : > { %v3212_v42 = vadd.f32 %v3211_v50, %v3158_v29 }
 0x246   : > { %v3160_v22 = vpop.f32.mrf.mxu1 }
 0x248   : > { %v3164_v18 = vpop.f32.mrf.mxu1 }
 0x249   : > { %v3218_v50 = vadd.f32 %v3217_v30, %v3164_v18 }
 0x24a   : > { %v3166_v63 = vpop.f32.mrf.mxu1 }
 0x24c   : > { %v10175_v11 = vpop.f32.mrf.mxu1 }
 0x24e   : > { %v10179_v44 = vpop.f32.mrf.mxu1 }
 0x250   : > { %v10183_v39 = vpop.f32.mrf.mxu1 }
 0x252   : > { %v10187_v57 = vpop.f32.mrf.mxu1 }
 0x254   : > { %v10191_v58 = vpop.f32.mrf.mxu1 }
 0x256   : > { %v10195_v19 = vpop.f32.mrf.mxu1 }
 0x257   : > { %v10169_v40 = vpop.f32.mrf.mxu0 }
 0x258   : > { %v10197_v10 = vpop.f32.mrf.mxu1 }
 0x259   : > { %v10171_v20 = vpop.f32.mrf.mxu0  ;;  %10441 = vst [vmem:[#allocation27_spill] sm:$0xff] %v10197_v10  ;;  %v10216_v10 = vld [vmem:[#allocation6] sm:$0xf] }
 0x25a   : > { %v10199_v52 = vpop.f32.mrf.mxu1 }
 0x25b   : > { %v10173_v16 = vpop.f32.mrf.mxu0  ;;  %10442 = vst [vmem:[#allocation28_spill] sm:$0xff] %v10199_v52 }
 0x25c   : > { %v10203_v32 = vpop.f32.mrf.mxu1 }
 0x25d   : > { %v10177_v14 = vpop.f32.mrf.mxu0  ;;  %10443 = vst [vmem:[#allocation29_spill] sm:$0xff] %v10203_v32 }
 0x25e   : > { %v10214_v52 = vpop.f32.mrf.mxu1 }
 0x25f   : > { %v10181_v45 = vpop.f32.mrf.mxu0  ;;  %10444 = vst [vmem:[#allocation30_spill] sm:$0xff] %v10214_v52  ;;  %v10227_v52 = vrot.slane %v10216_v10, %v10210_v24 }
 0x260   : > { %10437 = vst [vmem:[#allocation23_spill] sm:$0xff] %v10181_v45  ;;  %v3210_v45 = vadd.f32 %v3209_v49, %v3156_v28  ;;  %v2392_v49 = vadd.f32 %v10125_v48, %v10123_v27  ;;  %v3214_v28 = vadd.f32 %v3213_v26, %v3160_v22 }
 0x261   : > { %v10185_v8 = vpop.f32.mrf.mxu0 }
 0x262   : > { %10438 = vst [vmem:[#allocation24_spill] sm:$0xff] %v10185_v8  ;;  %v3208_v8 = vadd.f32 %v3207_v34, %v3154_v3  ;;  %v2530_v22 = vadd.f32 %v2392_v49, %v10042_v59  ;;  %v3222_v59 = vadd.f32 %v10165_v6, %v10175_v11 }
 0x263   : > { %v10189_v54 = vpop.f32.mrf.mxu0 }
 0x264   : > { %10439 = vst [vmem:[#allocation25_spill] sm:$0xff] %v10189_v54  ;;  %v2382_v54 = vadd.f32 %v10107_v36, %v10111_v53  ;;  %v10220_v36 = vsub.s32 1, %v10201_v43  ;;  %v2388_v53 = vadd.f32 %v10121_v37, %v10119_v0 }
 0x265   : > { %v10193_v55 = vpop.f32.mrf.mxu0 }
 0x266   : > { %10440 = vst [vmem:[#allocation26_spill] sm:$0xff] %v10193_v55  ;;  %v2384_v55 = vadd.f32 %v10109_v33, %v10113_v61  ;;  %v2522_v32 = vadd.f32 %v2382_v54, %v10021_v46  ;;  %v2526_v46 = vadd.f32 %v2386_v35, %v10034_v7  ;;  %v10234_v0 = vrot.slane %v10216_v10, %v10220_v36 }
 0x267   : > { %v3970_v4 = vpop.f32.mrf.mxu0  ;;  %v2527_v37 = vadd.f32 %v2388_v53, %v10039_v62 }
 0x268   : > { %v2523_v33 = vadd.f32 %v2384_v55, %v10024_v2  ;;  %v3348_v3 = vadd.f32 %v3208_v8, %v2522_v32  ;;  %v2394_v32 = vadd.f32 %v10131_v9, %v10127_v60  ;;  %v3352_v35 = vadd.f32 %v3212_v42, %v2526_v46 }
 0x269   : > { %v3972_v56 = vpop.f32.mrf.mxu0  ;;  %v3220_v8 = vadd.f32 %v10163_v13, %v3166_v63 }
 0x26a   : > { %v3349_v2 = vadd.f32 %v3210_v45, %v2523_v33  ;;  %v3353_v45 = vadd.f32 %v3214_v28, %v2527_v37  ;;  %v2531_v18 = vadd.f32 %v2394_v32, %v10046_v41  ;;  %v3224_v41 = vadd.f32 %v10167_v31, %v10179_v44 }
 0x26b   : > { %v3974_v47 = vpop.f32.mrf.mxu0 }
 0x26d   : > { %v3976_v38 = vpop.f32.mrf.mxu0 }
 0x26f   : > { %v3980_v34 = vpop.f32.mrf.mxu0 }
 0x271   : > { %v3982_v7 = vpop.f32.mrf.mxu0 }
 0x290   : > { %v3917_v61 = vpop.f32.mrf.mxu1 }
 0x291   : > { %v3971_v5 = vadd.f32 %v3970_v4, %v3917_v61 }
 0x292   : > { %v3919_v54 = vpop.f32.mrf.mxu1 }
 0x293   : > { %v4111_v55 = vadd.f32 %v3971_v5, %v3348_v3  ;;  %v3973_v23 = vadd.f32 %v3972_v56, %v3919_v54  ;;  %v2396_v56 = vadd.f32 %v10135_v1, %v10129_v21  ;;  %v3984_v21 = vpop.f32.mrf.mxu0 }
 0x294   : > { %v3921_v29 = vpop.f32.mrf.mxu1 }
 0x295   : > { %v4181_v27 = vadd.f32 %v10227_v52, %v4111_v55  ;;  %v4112_v48 = vadd.f32 %v3973_v23, %v3349_v2  ;;  %v3975_v26 = vadd.f32 %v3974_v47, %v3921_v29  ;;  %v2398_v23 = vadd.f32 %v10137_v25, %v10133_v17  ;;  %v3986_v49 = vpop.f32.mrf.mxu0 }
 0x296   : > { %v3923_v62 = vpop.f32.mrf.mxu1  ;;  %v3356_v47 = vadd.f32 %v3218_v50, %v2530_v22  ;;  %v2534_v61 = vadd.f32 %v2396_v56, %v10056_v15  ;;  %v3314_v22 = vadd.f32 %v10183_v39, %v10169_v40  ;;  %v3320_v39 = vadd.f32 %v10195_v19, %v10177_v14  ;;  %v10450_v14 = vld [vmem:[#allocation24_spill] sm:$0xff] }
 0x297   : > { %v4197_v4 = vmax.f32 %v4181_v27, 0.0  ;;  %v4182_v60 = vadd.f32 %v10234_v0, %v4112_v48  ;;  %v4115_v9 = vadd.f32 %v3975_v26, %v3352_v35  ;;  %v3977_v30 = vadd.f32 %v3976_v38, %v3923_v62  ;;  %v10451_v19 = vld [vmem:[#allocation28_spill] sm:$0xff] }
 0x298   : > { %v3927_v33 = vpop.f32.mrf.mxu1  ;;  %v3357_v38 = vadd.f32 %v3220_v8, %v2531_v18  ;;  %v2535_v42 = vadd.f32 %v2398_v23, %v10061_v12  ;;  %v3360_v5 = vadd.f32 %v3222_v59, %v2534_v61  ;;  %v3316_v62 = vadd.f32 %v10187_v57, %v10171_v20  ;;  %v10445_v23 = vld [vmem:[#allocation16_spill] sm:$0xff]  ;;  %v10446_v59 = vld [vmem:[#allocation23_spill] sm:$0xff]  ;;  %v10449_v61 = vld [vmem:[#allocation18_spill] sm:$0xff] }
 0x299   : > { %4213 = vst [vmem:[#allocation2] sm:$0xff] %v4197_v4  ;;  %v4198_v1 = vmax.f32 %v4182_v60, 0.0  ;;  %v4185_v13 = vadd.f32 %v10227_v52, %v4115_v9  ;;  %v4116_v63 = vadd.f32 %v3977_v30, %v3353_v45  ;;  %v3981_v53 = vadd.f32 %v3980_v34, %v3927_v33  ;;  %v10447_v33 = vld [vmem:[#allocation27_spill] sm:$0xff] }
 0x29a   : > { %v3929_v3 = vpop.f32.mrf.mxu1  ;;  %v3361_v2 = vadd.f32 %v3224_v41, %v2535_v42  ;;  %v4171_v45 = vsub.s32 2, %v10201_v43  ;;  %v3350_v9 = vadd.f32 %v3314_v22, %v10140_v51  ;;  %v3326_v41 = vadd.f32 %v10451_v19, %v10450_v14 }
 0x29b   : > { %4214 = vst [vmem:[#allocation2 + $0x8] sm:$0xff] %v4198_v1  ;;  %v4201_v17 = vmax.f32 %v4185_v13, 0.0  ;;  %v4186_v25 = vadd.f32 %v10234_v0, %v4116_v63  ;;  %v4119_v6 = vadd.f32 %v3981_v53, %v3356_v47  ;;  %v3983_v11 = vadd.f32 %v3982_v7, %v3929_v3  ;;  %v10448_v13 = vld [vmem:[#allocation17_spill] sm:$0xff] }
 0x29c   : > { %v3931_v46 = vpop.f32.mrf.mxu1  ;;  %v4172_v40 = vrot.slane %v10216_v10, %v4171_v45  ;;  %v3351_v47 = vadd.f32 %v3316_v62, %v10445_v23 }
 0x29d   : > { %4217 = vst [vmem:[#allocation2 + $0x20] sm:$0xff] %v4201_v17  ;;  %v4202_v34 = vmax.f32 %v4186_v25, 0.0  ;;  %v4189_v15 = vadd.f32 %v10227_v52, %v4119_v6  ;;  %v4120_v28 = vadd.f32 %v3983_v11, %v3357_v38  ;;  %v3985_v54 = vadd.f32 %v3984_v21, %v3931_v46  ;;  %v10452_v11 = vld [vmem:[#allocation19_spill] sm:$0xff]  ;;  %v10454_v46 = vld [vmem:[#allocation29_spill] sm:$0xff] }
 0x29e   : > { %v3933_v31 = vpop.f32.mrf.mxu1  ;;  %v3324_v21 = vadd.f32 %v10447_v33, %v10446_v59  ;;  %v3355_v38 = vadd.f32 %v3320_v39, %v10449_v61 }
 0x29f   : > { %4218 = vst [vmem:[#allocation2 + $0x28] sm:$0xff] %v4202_v34  ;;  %v4205_v44 = vmax.f32 %v4189_v15, 0.0  ;;  %v4190_v55 = vadd.f32 %v10234_v0, %v4120_v28  ;;  %v4123_v37 = vadd.f32 %v3985_v54, %v3360_v5  ;;  %v3987_v32 = vadd.f32 %v3986_v49, %v3933_v31  ;;  %v10453_v5 = vld [vmem:[#allocation25_spill] sm:$0xff] }
 0x2a0   : > { %v4076_v50 = vpop.f32.mrf.mxu1  ;;  %v3358_v42 = vadd.f32 %v3324_v21, %v10452_v11  ;;  %v3328_v49 = vadd.f32 %v10454_v46, %v10453_v5 }
 0x2a1   : > { %4221 = vst [vmem:[#allocation2 + $0x40] sm:$0xff] %v4205_v44  ;;  %v4206_v12 = vmax.f32 %v4190_v55, 0.0  ;;  %v4193_v29 = vadd.f32 %v10227_v52, %v4123_v37  ;;  %v4124_v7 = vadd.f32 %v3987_v32, %v3361_v2  ;;  %v4175_v52 = vsub.s32 3, %v10201_v43  ;;  %v10455_v44 = vld [vmem:[#allocation20_spill] sm:$0xff]  ;;  %v10456_v37 = vld [vmem:[#allocation26_spill] sm:$0xff] }
 0x2a2   : > { %v4078_v35 = vpop.f32.mrf.mxu1  ;;  %v3359_v55 = vadd.f32 %v3326_v41, %v10455_v44  ;;  %v10457_v32 = vld [vmem:[#allocation30_spill] sm:$0xff] }
 0x2a3   : > { %4222 = vst [vmem:[#allocation2 + $0x48] sm:$0xff] %v4206_v12  ;;  %v4209_v27 = vmax.f32 %v4193_v29, 0.0  ;;  %v4194_v48 = vadd.f32 %v10234_v0, %v4124_v7  ;;  %v3318_v0 = vadd.f32 %v10191_v58, %v10173_v16  ;;  %v4176_v43 = vrot.slane %v10216_v10, %v4175_v52  ;;  %v9155_v44 = vld [vmem:[#allocation8 + $0x170] sm:$0xff]  }
 0x2a4   : > { %v4080_v26 = vpop.f32.mrf.mxu1 }
 0x2a5   : > { %4225 = vst [vmem:[#allocation2 + $0x60] sm:$0xff] %v4209_v27  ;;  %v4210_v56 = vmax.f32 %v4194_v48, 0.0  ;;  %v3354_v16 = vadd.f32 %v3318_v0, %v10448_v13  ;;  %v10458_v48 = vld [vmem:[#allocation21_spill] sm:$0xff] }
 0x2a6   : > { %v4082_v8 = vpop.f32.mrf.mxu1 }
 0x2a7   : > { %4226 = vst [vmem:[#allocation2 + $0x68] sm:$0xff] %v4210_v56  ;;  %v4023_v4 = vpop.f32.mrf.mxu0 }
 0x2a8   : > { %v4086_v60 = vpop.f32.mrf.mxu1  ;;  %v4077_v30 = vadd.f32 %v4076_v50, %v4023_v4  ;;  %v3330_v50 = vadd.f32 %v10457_v32, %v10456_v37  ;;  %v10459_v4 = vld [vmem:[#allocation22_spill] sm:$0xff] }
 0x2a9   : > { %v4025_v18 = vpop.f32.mrf.mxu0  ;;  %v9156_v32 = vld [vmem:[#allocation8 + $0x1f0] sm:$0xff]  }
 0x2aa   : > { %v4113_v20 = vadd.f32 %v4077_v30, %v3350_v9  ;;  %v4079_v57 = vadd.f32 %v4078_v35, %v4025_v18  ;;  %v4088_v1 = vpop.f32.mrf.mxu1 }
 0x2ab   : > { %v4027_v51 = vpop.f32.mrf.mxu0 }
 0x2ac   : > { %v4183_v58 = vadd.f32 %v4172_v40, %v4113_v20  ;;  %v4114_v63 = vadd.f32 %v4079_v57, %v3351_v47  ;;  %v4081_v53 = vadd.f32 %v4080_v26, %v4027_v51  ;;  %v4090_v15 = vpop.f32.mrf.mxu1  ;;  %v3362_v26 = vadd.f32 %v3328_v49, %v10458_v48  ;;  %v9163_v48 = vld [vmem:[#allocation8 + $0x160] sm:$0xff]  }
 0x2ad   : > { %v4029_v3 = vpop.f32.mrf.mxu0 }
 0x2ae   : > { %v4199_v17 = vmax.f32 %v4183_v58, 0.0  ;;  %v4184_v25 = vadd.f32 %v4176_v43, %v4114_v63  ;;  %v4117_v6 = vadd.f32 %v4081_v53, %v3354_v16  ;;  %v4083_v10 = vadd.f32 %v4082_v8, %v4029_v3  ;;  %v4092_v56 = vpop.f32.mrf.mxu1 }
 0x2af   : > { %v4033_v34 = vpop.f32.mrf.mxu0 }
 0x2b0   : > { %4215 = vst [vmem:[#allocation2 + $0x10] sm:$0xff] %v4199_v17  ;;  %v4200_v28 = vmax.f32 %v4184_v25, 0.0  ;;  %v4187_v54 = vadd.f32 %v4172_v40, %v4117_v6  ;;  %v4118_v2 = vadd.f32 %v4083_v10, %v3355_v38  ;;  %v4087_v31 = vadd.f32 %v4086_v60, %v4033_v34  ;;  %v9153_v34 = vld [vmem:[#allocation8 + $0x138] sm:$0xff]  }
 0x2b1   : > { %v4035_v12 = vpop.f32.mrf.mxu0  ;;  %v3363_v60 = vadd.f32 %v3330_v50, %v10459_v4  ;;  %v9157_v50 = vld [vmem:[#allocation8 + $0x130] sm:$0xff]  }
 0x2b2   : > { %4216 = vst [vmem:[#allocation2 + $0x18] sm:$0xff] %v4200_v28  ;;  %v4203_v29 = vmax.f32 %v4187_v54, 0.0  ;;  %v4188_v7 = vadd.f32 %v4176_v43, %v4118_v2  ;;  %v4121_v35 = vadd.f32 %v4087_v31, %v3358_v42  ;;  %v4089_v27 = vadd.f32 %v4088_v1, %v4035_v12  ;;  %v9154_v31 = vld [vmem:[#allocation8 + $0x1b8] sm:$0xff]  }
 0x2b3   : > { %v4037_v22 = vpop.f32.mrf.mxu0 }
 0x2b4   : > { %4219 = vst [vmem:[#allocation2 + $0x30] sm:$0xff] %v4203_v29  ;;  %v4204_v45 = vmax.f32 %v4188_v7, 0.0  ;;  %v4191_v8 = vadd.f32 %v4172_v40, %v4121_v35  ;;  %v4122_v62 = vadd.f32 %v4089_v27, %v3359_v55  ;;  %v4091_v52 = vadd.f32 %v4090_v15, %v4037_v22  ;;  %v9159_v29 = vld [vmem:[#allocation8 + $0x168] sm:$0xff]   ;;  %v9158_v7 = vld [vmem:[#allocation8 + $0x1b0] sm:$0xff]   ;;  %v9164_v22 = vld [vmem:[#allocation8 + $0x1e0] sm:$0xff]  }
 0x2b5   : > { %v4039_v9 = vpop.f32.mrf.mxu0  ;;  %v9160_v35 = vld [vmem:[#allocation8 + $0x1e8] sm:$0xff]  }
 0x2b6   : > { %4220 = vst [vmem:[#allocation2 + $0x38] sm:$0xff] %v4204_v45  ;;  %v4207_v0 = vmax.f32 %v4191_v8, 0.0  ;;  %v4192_v30 = vadd.f32 %v4176_v43, %v4122_v62  ;;  %v4125_v39 = vadd.f32 %v4091_v52, %v3362_v26  ;;  %v4093_v18 = vadd.f32 %v4092_v56, %v4039_v9  ;;  %v9161_v27 = vld [vmem:[#allocation8 + $0x128] sm:$0xff]   ;;  %v9165_v56 = vld [vmem:[#allocation8 + $0x120] sm:$0xff]   ;;  %v9167_v45 = vld [vmem:[#allocation8 + $0x158] sm:$0xff]  }
 0x2b7   : > { %v9162_v26 = vld [vmem:[#allocation8 + $0x1a8] sm:$0xff]   ;;  %v9166_v8 = vld [vmem:[#allocation8 + $0x1a0] sm:$0xff]   ;;  %v9168_v62 = vld [vmem:[#allocation8 + $0x1d8] sm:$0xff]  }
 0x2b8   : > { %4223 = vst [vmem:[#allocation2 + $0x50] sm:$0xff] %v4207_v0  ;;  %v4208_v23 = vmax.f32 %v4192_v30, 0.0  ;;  %v4195_v47 = vadd.f32 %v4172_v40, %v4125_v39  ;;  %v4126_v20 = vadd.f32 %v4093_v18, %v3363_v60  ;;  %v9169_v60 = vld [vmem:[#allocation8 + $0x118] sm:$0xff]   ;;  %v9171_v9 = vld [vmem:[#allocation8 + $0x150] sm:$0xff]  }
 0x2b9   : > { %v4283_v57 = vld [vmem:[#allocation2 + $0x2] ss:$8 sm:$0xf]  ;;  %v4285_v59 = vld [vmem:[#allocation2 + $0x3] ss:$8 sm:$0xf] }
 0x2ba   : > { %4224 = vst [vmem:[#allocation2 + $0x58] sm:$0xff] %v4208_v23  ;;  %v4211_v33 = vmax.f32 %v4195_v47, 0.0  ;;  %v4196_v21 = vadd.f32 %v4176_v43, %v4126_v20  ;;  %v4286_v51 = vmax.f32 %v4283_v57, %v4285_v59  ;;  %v4229_v1 = vld [vmem:[#allocation2] ss:$8 sm:$0xf] }
 0x2bb   : > { %v4231_v13 = vld [vmem:[#allocation2 + $0x1] ss:$8 sm:$0xf]  ;;  %v4610_v16 = vld [vmem:[#allocation2 + $0x4] ss:$8 sm:$0xf] }
 0x2bc   : > { %4227 = vst [vmem:[#allocation2 + $0x70] sm:$0xff] %v4211_v33  ;;  %v4212_v58 = vmax.f32 %v4196_v21, 0.0  ;;  %v4288_v63 = vrot.slane %v4286_v51, 2  ;;  %v4232_v53 = vmax.f32 %v4229_v1, %v4231_v13  ;;  %v4612_v61 = vld [vmem:[#allocation2 + $0x5] ss:$8 sm:$0xf] }
 0x2bd   : > { %v4613_v38 = vmax.f32 %v4610_v16, %v4612_v61  ;;  %v4802_v14 = vld [vmem:[#allocation2 + $0x6] ss:$8 sm:$0xf]  ;;  %v4804_v19 = vld [vmem:[#allocation2 + $0x7] ss:$8 sm:$0xf] }
 0x2be   : > { %4228 = vst [vmem:[#allocation2 + $0x78] sm:$0xff] %v4212_v58  ;;  %v4290_v40 = vmax.f32 %v4286_v51, %v4288_v63  ;;  %v4234_v41 = vrot.slane %v4232_v53, 2  ;;  %v4805_v3 = vmax.f32 %v4802_v14, %v4804_v19  ;;  %v4994_v52 = vld [vmem:[#allocation2 + $0x20] ss:$8 sm:$0xf] }
 0x2bf   : > { %v4615_v17 = vrot.slane %v4613_v38, 2  ;;  %v4996_v4 = vld [vmem:[#allocation2 + $0x21] ss:$8 sm:$0xf] }
 0x2c0   : > { %v4295_v25 = vrot.slane %v4290_v40, %v10210_v24  ;;  %v4299_v43 = vrot.slane %v4290_v40, %v10220_v36  ;;  %v4236_v6 = vmax.f32 %v4232_v53, %v4234_v41  ;;  %v4807_v10 = vrot.slane %v4805_v3, 2  ;;  %v5186_v0 = vld [vmem:[#allocation2 + $0x22] ss:$8 sm:$0xf] }
 0x2c1   : > { %v10290_v11 = vmax.f32 %v4613_v38, %v4615_v17  ;;  %v5188_v30 = vld [vmem:[#allocation2 + $0x23] ss:$8 sm:$0xf]  ;;  %v4997_v18 = vmax.f32 %v4994_v52, %v4996_v4 }
 0x2c2   : > { %v4302_v42 = vpack.c.bf16 %v4295_v25, %v4295_v25  ;;  %v4303_v5 = vpack.c.bf16 %v4299_v43, %v4299_v43  ;;  %v4241_v46 = vrot.slane %v4236_v6, %v10210_v24  ;;  %v4245_v49 = vrot.slane %v4236_v6, %v10220_v36  ;;  %v9170_v39 = vld [vmem:[#allocation8 + $0x198] sm:$0xff]   ;;  %v9172_v23 = vld [vmem:[#allocation8 + $0x1d0] sm:$0xff]   ;;  %v9175_v57 = vld [vmem:[#allocation8 + $0x148] sm:$0xff]  }
 0x2c3   : > { %v4626_v15 = vrot.slane %v10290_v11, %v10220_v36  ;;  %v10296_v28 = vmax.f32 %v4805_v3, %v4807_v10  ;;  %v9173_v47 = vld [vmem:[#allocation8 + $0x110] sm:$0xff]   ;;  %v5189_v20 = vmax.f32 %v5186_v0, %v5188_v30  ;;  %v4999_v33 = vrot.slane %v4997_v18, 2  ;;  %v9176_v21 = vld [vmem:[#allocation8 + $0x1c8] sm:$0xff]   ;;  %v9179_v13 = vld [vmem:[#allocation8 + $0x140] sm:$0xff]  }
 0x2c4   : > { %4465 = vmatprep.mubr.bf16.mxu1 %v4303_v5  ;;  %v4248_v54 = vpack.c.bf16 %v4241_v46, %v4241_v46  ;;  %v4249_v2 = vpack.c.bf16 %v4245_v49, %v4245_v49  ;;  %v9174_v59 = vld [vmem:[#allocation8 + $0x190] sm:$0xff]   ;;  %v9177_v51 = vld [vmem:[#allocation8 + $0x108] sm:$0xff]   ;;  %v9180_v63 = vld [vmem:[#allocation8 + $0x1c0] sm:$0xff]   ;;  %v4622_v38 = vrot.slane %v10290_v11, %v10210_v24 }
 0x2c5   : > { %4466 = vmatmul.mubr.bf16.vlgmr.msra.gmra.mxu1 %v4302_v42  ;;  %v4630_v55 = vpack.c.bf16 %v4626_v15, %v4626_v15  ;;  %v4818_v37 = vrot.slane %v10296_v28, %v10220_v36  ;;  %v5191_v1 = vrot.slane %v5189_v20, 2  ;;  %v9178_v16 = vld [vmem:[#allocation8 + $0x188] sm:$0xff]   ;;  %v10300_v58 = vmax.f32 %v4997_v18, %v4999_v33  ;;  %v9181_v53 = vld [vmem:[#allocation8 + $0x100] sm:$0xff]   ;;  %v9183_v14 = vld [vmem:[#allocation8 + $0x278] sm:$0xff]  }
 0x2c6   : > { %4601 = vmatprep.mubr.bf16.mxu0 %v4249_v2  ;;  %8148 = vmatpush3.bf16.msra.mxu1 %v9153_v34  ;;  %v9182_v19 = vld [vmem:[#allocation8 + $0x180] sm:$0xff]   ;;  %v4814_v41 = vrot.slane %v10296_v28, %v10210_v24  ;;  %v9184_v3 = vld [vmem:[#allocation8 + $0x2f8] sm:$0xff]   ;;  %v4629_v43 = vpack.c.bf16 %v4622_v38, %v4622_v38  ;;  %v9187_v6 = vld [vmem:[#allocation8 + $0x270] sm:$0xff]  }
 0x2c7   : > { %4602 = vmatmul.mubr.bf16.vlgmr.msra.gmra.mxu0 %v4248_v54  ;;  %4792 = vmatprep.mubr.bf16.mxu1 %v4630_v55  ;;  %v4822_v12 = vpack.c.bf16 %v4818_v37, %v4818_v37  ;;  %v10302_v61 = vmax.f32 %v5189_v20, %v5191_v1  ;;  %v5010_v40 = vrot.slane %v10300_v58, %v10220_v36  ;;  %v9185_v17 = vld [vmem:[#allocation8 + $0x238] sm:$0xff]   ;;  %v9188_v5 = vld [vmem:[#allocation8 + $0x2f0] sm:$0xff]   ;;  %v9191_v34 = vld [vmem:[#allocation8 + $0x268] sm:$0xff]  }
 0x2c8   : > { %8170 = vmatpush3.bf16.msra.mxu0 %v9154_v31  ;;  %8149 = vmatprep.subr.bf16.mxu1 %v9155_v44  ;;  %v9186_v11 = vld [vmem:[#allocation8 + $0x2b8] sm:$0xff]   ;;  %v4821_v42 = vpack.c.bf16 %v4814_v41, %v4814_v41  ;;  %v9189_v49 = vld [vmem:[#allocation8 + $0x230] sm:$0xff]   ;;  %v9192_v28 = vld [vmem:[#allocation8 + $0x2e8] sm:$0xff]  }
 0x2c9   : > { %4984 = vmatprep.mubr.bf16.mxu0 %v4822_v12  ;;  %8171 = vmatprep.subr.bf16.mxu0 %v9156_v32  ;;  %v5202_v25 = vrot.slane %v10302_v61, %v10220_v36  ;;  %v5014_v10 = vpack.c.bf16 %v5010_v40, %v5010_v40  ;;  %v9190_v15 = vld [vmem:[#allocation8 + $0x2b0] sm:$0xff]   ;;  %v9193_v54 = vld [vmem:[#allocation8 + $0x228] sm:$0xff]   ;;  %v9195_v2 = vld [vmem:[#allocation8 + $0x260] sm:$0xff]  }
 0x2ca   : > { %8150 = vmatpush3.bf16.msra.mxu1 %v9157_v50  ;;  %v9194_v31 = vld [vmem:[#allocation8 + $0x2a8] sm:$0xff]   ;;  %v9196_v44 = vld [vmem:[#allocation8 + $0x2e0] sm:$0xff]   ;;  %v9199_v37 = vld [vmem:[#allocation8 + $0x258] sm:$0xff]  }
 0x2cb   : > { %8151 = vmatprep.subr.bf16.mxu1 %v9159_v29  ;;  %v5206_v46 = vpack.c.bf16 %v5202_v25, %v5202_v25  ;;  %v9197_v55 = vld [vmem:[#allocation8 + $0x220] sm:$0xff]   ;;  %v9200_v50 = vld [vmem:[#allocation8 + $0x2d8] sm:$0xff]   ;;  %v9206_v52 = vld [vmem:[#allocation8 + $0x290] sm:$0xff]  }
 0x2cc   : > { %8172 = vmatpush3.bf16.msra.mxu0 %v9158_v7  ;;  %v9198_v32 = vld [vmem:[#allocation8 + $0x2a0] sm:$0xff]   ;;  %v9201_v7 = vld [vmem:[#allocation8 + $0x218] sm:$0xff]   ;;  %v9223_v41 = vld [vmem:[#allocation8 + $0x368] sm:$0xff]  }
 0x2cd   : > { %8173 = vmatprep.subr.bf16.mxu0 %v9160_v35  ;;  %v5378_v12 = vld [vmem:[#allocation2 + $0x24] ss:$8 sm:$0xf]  ;;  %v5380_v29 = vld [vmem:[#allocation2 + $0x25] ss:$8 sm:$0xf] }
 0x2ce   : > { %8152 = vmatpush3.bf16.msra.mxu1 %v9161_v27  ;;  %v9203_v35 = vld [vmem:[#allocation8 + $0x250] sm:$0xff]   ;;  %v9211_v30 = vld [vmem:[#allocation8 + $0x240] sm:$0xff]   ;;  %v9216_v1 = vld [vmem:[#allocation8 + $0x3f8] sm:$0xff]  }
 0x2cf   : > { %8153 = vmatprep.subr.bf16.mxu1 %v9163_v48  ;;  %v5570_v27 = vld [vmem:[#allocation2 + $0x26] ss:$8 sm:$0xf]  ;;  %v5572_v48 = vld [vmem:[#allocation2 + $0x27] ss:$8 sm:$0xf] }
 0x2d0   : > { %8174 = vmatpush3.bf16.msra.mxu0 %v9162_v26  ;;  %v9202_v26 = vld [vmem:[#allocation8 + $0x298] sm:$0xff]   ;;  %v9214_v33 = vld [vmem:[#allocation8 + $0x280] sm:$0xff]   ;;  %v9225_v25 = vld [vmem:[#allocation8 + $0x328] sm:$0xff]  }
 0x2d1   : > { %8175 = vmatprep.subr.bf16.mxu0 %v9164_v22  ;;  %v5381_v22 = vmax.f32 %v5378_v12, %v5380_v29  ;;  %v9218_v38 = vld [vmem:[#allocation8 + $0x3b8] sm:$0xff]   ;;  %v9238_v12 = vld [vmem:[#allocation8 + $0x390] sm:$0xff]  }
 0x2d2   : > { %8154 = vmatpush3.bf16.msra.mxu1 %v9165_v56  ;;  %v9204_v56 = vld [vmem:[#allocation8 + $0x2d0] sm:$0xff]  }
 0x2d3   : > { %8155 = vmatprep.subr.bf16.mxu1 %v9167_v45  ;;  %v9205_v45 = vld [vmem:[#allocation8 + $0x210] sm:$0xff]   ;;  %v5383_v4 = vrot.slane %v5381_v22, 2 }
 0x2d4   : > { %8176 = vmatpush3.bf16.msra.mxu0 %v9166_v8  ;;  %v5573_v8 = vmax.f32 %v5570_v27, %v5572_v48  ;;  %v9243_v48 = vld [vmem:[#allocation8 + $0x340] sm:$0xff]  }
 0x2d5   : > { %8177 = vmatprep.subr.bf16.mxu0 %v9168_v62  ;;  %v9207_v62 = vld [vmem:[#allocation8 + $0x248] sm:$0xff]   ;;  %v10312_v18 = vmax.f32 %v5381_v22, %v5383_v4  ;;  %v9246_v4 = vld [vmem:[#allocation8 + $0x380] sm:$0xff]  }
 0x2d6   : > { %8156 = vmatpush3.bf16.msra.mxu1 %v9169_v60  ;;  %v9208_v60 = vld [vmem:[#allocation8 + $0x2c8] sm:$0xff]   ;;  %v5575_v0 = vrot.slane %v5573_v8, 2 }
 0x2d7   : > { %8157 = vmatprep.subr.bf16.mxu1 %v9171_v9  ;;  %v9209_v9 = vld [vmem:[#allocation8 + $0x208] sm:$0xff]  }
 0x2d8   : > { %8178 = vmatpush3.bf16.msra.mxu0 %v9170_v39  ;;  %v9210_v39 = vld [vmem:[#allocation8 + $0x288] sm:$0xff]   ;;  %v10314_v20 = vmax.f32 %v5573_v8, %v5575_v0  ;;  %v9248_v0 = vld [vmem:[#allocation8 + $0x4f8] sm:$0xff]  }
 0x2d9   : > { %8179 = vmatprep.subr.bf16.mxu0 %v9172_v23  ;;  %v9212_v23 = vld [vmem:[#allocation8 + $0x2c0] sm:$0xff]  }
 0x2da   : > { %8158 = vmatpush3.bf16.msra.mxu1 %v9173_v47  ;;  %v9213_v47 = vld [vmem:[#allocation8 + $0x200] sm:$0xff]  }
 0x2db   : > { %8159 = vmatprep.subr.bf16.mxu1 %v9175_v57  ;;  %v5006_v57 = vrot.slane %v10300_v58, %v10210_v24 }
 0x2dc   : > { %8180 = vmatpush3.bf16.msra.mxu0 %v9174_v59  ;;  %v9215_v59 = vld [vmem:[#allocation8 + $0x378] sm:$0xff]  }
 0x2dd   : > { %8181 = vmatprep.subr.bf16.mxu0 %v9176_v21  ;;  %v5394_v21 = vrot.slane %v10312_v18, %v10220_v36 }
 0x2de   : > { %8160 = vmatpush3.bf16.msra.mxu1 %v9177_v51  ;;  %v5198_v51 = vrot.slane %v10302_v61, %v10210_v24  ;;  %v9221_v61 = vld [vmem:[#allocation8 + $0x330] sm:$0xff]  }
 0x2df   : > { %8161 = vmatprep.subr.bf16.mxu1 %v9179_v13  ;;  %v9217_v13 = vld [vmem:[#allocation8 + $0x338] sm:$0xff]   ;;  %v5398_v58 = vpack.c.bf16 %v5394_v21, %v5394_v21 }
 0x2e0   : > { %8182 = vmatpush3.bf16.msra.mxu0 %v9178_v16  ;;  %v5586_v16 = vrot.slane %v10314_v20, %v10220_v36 }
 0x2e1   : > { %8183 = vmatprep.subr.bf16.mxu0 %v9180_v63  ;;  %v5013_v63 = vpack.c.bf16 %v5006_v57, %v5006_v57  ;;  %v9250_v57 = vld [vmem:[#allocation8 + $0x4b8] sm:$0xff]  }
 0x2e2   : > { %8162 = vmatpush3.bf16.msra.mxu1 %v9181_v53  ;;  %v9219_v53 = vld [vmem:[#allocation8 + $0x370] sm:$0xff]   ;;  %v5590_v40 = vpack.c.bf16 %v5586_v16, %v5586_v16  ;;  %v9257_v16 = vld [vmem:[#allocation8 + $0x428] sm:$0xff]  }
 0x2e3   : > { %8191 = vmatprep.subr.bf16.mxu1 %v9183_v14  ;;  %v5205_v14 = vpack.c.bf16 %v5198_v51, %v5198_v51  ;;  %v9255_v51 = vld [vmem:[#allocation8 + $0x468] sm:$0xff]  }
 0x2e4   : > { %8184 = vmatpush3.bf16.msra.mxu0 %v9182_v19  ;;  %v9220_v19 = vld [vmem:[#allocation8 + $0x3f0] sm:$0xff]  }
 0x2e5   : > { %4793 = vmatmul.mubr.bf16.vlgmr.msra.gmra.mxu1 %v4629_v43  ;;  %8213 = vmatprep.subr.bf16.mxu0 %v9184_v3  ;;  %v9222_v3 = vld [vmem:[#allocation8 + $0x3b0] sm:$0xff]   ;;  %v9227_v43 = vld [vmem:[#allocation8 + $0x360] sm:$0xff]  }
 0x2e6   : > { %8192 = vmatpush3.bf16.msra.mxu1 %v9185_v17  ;;  %5176 = vmatprep.mubr.bf16.mxu1 %v5014_v10  ;;  %v9224_v17 = vld [vmem:[#allocation8 + $0x3e8] sm:$0xff]   ;;  %v9228_v10 = vld [vmem:[#allocation8 + $0x3e0] sm:$0xff]  }
 0x2e7   : > { %4985 = vmatmul.mubr.bf16.vlgmr.msra.gmra.mxu0 %v4821_v42  ;;  %8193 = vmatprep.subr.bf16.mxu1 %v9187_v6  ;;  %v9226_v6 = vld [vmem:[#allocation8 + $0x3a8] sm:$0xff]   ;;  %v9231_v42 = vld [vmem:[#allocation8 + $0x358] sm:$0xff]  }
 0x2e8   : > { %8214 = vmatpush3.bf16.msra.mxu0 %v9186_v11  ;;  %5368 = vmatprep.mubr.bf16.mxu0 %v5206_v46  ;;  %v9229_v11 = vld [vmem:[#allocation8 + $0x320] sm:$0xff]   ;;  %v9232_v46 = vld [vmem:[#allocation8 + $0x3d8] sm:$0xff]  }
 0x2e9   : > { %8215 = vmatprep.subr.bf16.mxu0 %v9188_v5  ;;  %v9230_v5 = vld [vmem:[#allocation8 + $0x3a0] sm:$0xff]  }
 0x2ea   : > { %8194 = vmatpush3.bf16.msra.mxu1 %v9189_v49  ;;  %v5762_v49 = vld [vmem:[#allocation2 + $0x40] ss:$8 sm:$0xf] }
 0x2eb   : > { %8195 = vmatprep.subr.bf16.mxu1 %v9191_v34  ;;  %v5764_v34 = vld [vmem:[#allocation2 + $0x41] ss:$8 sm:$0xf] }
 0x2ec   : > { %8216 = vmatpush3.bf16.msra.mxu0 %v9190_v15  ;;  %v9233_v15 = vld [vmem:[#allocation8 + $0x318] sm:$0xff]  }
 0x2ed   : > { %8217 = vmatprep.subr.bf16.mxu0 %v9192_v28  ;;  %v9235_v28 = vld [vmem:[#allocation8 + $0x350] sm:$0xff]  }
 0x2ee   : > { %8196 = vmatpush3.bf16.msra.mxu1 %v9193_v54  ;;  %v5954_v54 = vld [vmem:[#allocation2 + $0x42] ss:$8 sm:$0xf] }
 0x2ef   : > { %8197 = vmatprep.subr.bf16.mxu1 %v9195_v2  ;;  %v5956_v2 = vld [vmem:[#allocation2 + $0x43] ss:$8 sm:$0xf] }
 0x2f0   : > { %8218 = vmatpush3.bf16.msra.mxu0 %v9194_v31  ;;  %v9234_v31 = vld [vmem:[#allocation8 + $0x398] sm:$0xff]  }
 0x2f1   : > { %8219 = vmatprep.subr.bf16.mxu0 %v9196_v44  ;;  %v5765_v44 = vmax.f32 %v5762_v49, %v5764_v34  ;;  %v9270_v49 = vld [vmem:[#allocation8 + $0x490] sm:$0xff]  }
 0x2f2   : > { %8198 = vmatpush3.bf16.msra.mxu1 %v9197_v55  ;;  %v9236_v55 = vld [vmem:[#allocation8 + $0x3d0] sm:$0xff]  }
 0x2f3   : > { %8199 = vmatprep.subr.bf16.mxu1 %v9199_v37  ;;  %v9237_v37 = vld [vmem:[#allocation8 + $0x310] sm:$0xff]   ;;  %v5767_v29 = vrot.slane %v5765_v44, 2 }
 0x2f4   : > { %8220 = vmatpush3.bf16.msra.mxu0 %v9198_v32  ;;  %v5957_v32 = vmax.f32 %v5954_v54, %v5956_v2  ;;  %v9275_v2 = vld [vmem:[#allocation8 + $0x440] sm:$0xff]  }
 0x2f5   : > { %8221 = vmatprep.subr.bf16.mxu0 %v9200_v50  ;;  %v9239_v50 = vld [vmem:[#allocation8 + $0x348] sm:$0xff]   ;;  %v10324_v22 = vmax.f32 %v5765_v44, %v5767_v29  ;;  %v9278_v29 = vld [vmem:[#allocation8 + $0x480] sm:$0xff]  }
 0x2f6   : > { %8200 = vmatpush3.bf16.msra.mxu1 %v9201_v7  ;;  %v9240_v7 = vld [vmem:[#allocation8 + $0x3c8] sm:$0xff]   ;;  %v5959_v27 = vrot.slane %v5957_v32, 2 }
 0x2f7   : > { %8201 = vmatprep.subr.bf16.mxu1 %v9203_v35  ;;  %v9241_v35 = vld [vmem:[#allocation8 + $0x308] sm:$0xff]  }
 0x2f8   : > { %8222 = vmatpush3.bf16.msra.mxu0 %v9202_v26  ;;  %v9242_v26 = vld [vmem:[#allocation8 + $0x388] sm:$0xff]   ;;  %v10326_v8 = vmax.f32 %v5957_v32, %v5959_v27  ;;  %v9280_v27 = vld [vmem:[#allocation8 + $0x5f8] sm:$0xff]  }
 0x2f9   : > { %8223 = vmatprep.subr.bf16.mxu0 %v9204_v56  ;;  %v9244_v56 = vld [vmem:[#allocation8 + $0x3c0] sm:$0xff]  }
 0x2fa   : > { %8202 = vmatpush3.bf16.msra.mxu1 %v9205_v45  ;;  %v9245_v45 = vld [vmem:[#allocation8 + $0x300] sm:$0xff]  }
 0x2fb   : > { %8203 = vmatprep.subr.bf16.mxu1 %v9207_v62  ;;  %v5390_v62 = vrot.slane %v10312_v18, %v10210_v24 }
 0x2fc   : > { %8224 = vmatpush3.bf16.msra.mxu0 %v9206_v52  ;;  %v9247_v52 = vld [vmem:[#allocation8 + $0x478] sm:$0xff]  }
 0x2fd   : > { %8225 = vmatprep.subr.bf16.mxu0 %v9208_v60  ;;  %v5778_v60 = vrot.slane %v10324_v22, %v10220_v36 }
 0x2fe   : > { %8204 = vmatpush3.bf16.msra.mxu1 %v9209_v9  ;;  %v5582_v9 = vrot.slane %v10314_v20, %v10210_v24  ;;  %v9253_v20 = vld [vmem:[#allocation8 + $0x430] sm:$0xff]  }
 0x2ff   : > { %8205 = vmatprep.subr.bf16.mxu1 %v9211_v30  ;;  %v9249_v30 = vld [vmem:[#allocation8 + $0x438] sm:$0xff]   ;;  %v5782_v18 = vpack.c.bf16 %v5778_v60, %v5778_v60 }
 0x300   : > { %8226 = vmatpush3.bf16.msra.mxu0 %v9210_v39  ;;  %v5970_v39 = vrot.slane %v10326_v8, %v10220_v36 }
 0x301   : > { %8227 = vmatprep.subr.bf16.mxu0 %v9212_v23  ;;  %v5397_v23 = vpack.c.bf16 %v5390_v62, %v5390_v62  ;;  %v9282_v62 = vld [vmem:[#allocation8 + $0x5b8] sm:$0xff]  }
 0x302   : > { %8206 = vmatpush3.bf16.msra.mxu1 %v9213_v47  ;;  %v9251_v47 = vld [vmem:[#allocation8 + $0x470] sm:$0xff]   ;;  %v5974_v21 = vpack.c.bf16 %v5970_v39, %v5970_v39  ;;  %v9289_v39 = vld [vmem:[#allocation8 + $0x528] sm:$0xff]  }
 0x303   : > { %8235 = vmatprep.subr.bf16.mxu1 %v9215_v59  ;;  %v5589_v59 = vpack.c.bf16 %v5582_v9, %v5582_v9  ;;  %v9287_v9 = vld [vmem:[#allocation8 + $0x568] sm:$0xff]  }
 0x304   : > { %8228 = vmatpush3.bf16.msra.mxu0 %v9214_v33  ;;  %v9252_v33 = vld [vmem:[#allocation8 + $0x4f0] sm:$0xff]  }
 0x305   : > { %5177 = vmatmul.mubr.bf16.vlgmr.msra.gmra.mxu1 %v5013_v63  ;;  %8257 = vmatprep.subr.bf16.mxu0 %v9216_v1  ;;  %v9254_v1 = vld [vmem:[#allocation8 + $0x4b0] sm:$0xff]   ;;  %v9259_v63 = vld [vmem:[#allocation8 + $0x460] sm:$0xff]  }
 0x306   : > { %8236 = vmatpush3.bf16.msra.mxu1 %v9217_v13  ;;  %5560 = vmatprep.mubr.bf16.mxu1 %v5398_v58  ;;  %v9256_v13 = vld [vmem:[#allocation8 + $0x4e8] sm:$0xff]   ;;  %v9260_v58 = vld [vmem:[#allocation8 + $0x4e0] sm:$0xff]  }
 0x307   : > { %5369 = vmatmul.mubr.bf16.vlgmr.msra.gmra.mxu0 %v5205_v14  ;;  %8237 = vmatprep.subr.bf16.mxu1 %v9219_v53  ;;  %v9258_v53 = vld [vmem:[#allocation8 + $0x4a8] sm:$0xff]   ;;  %v9263_v14 = vld [vmem:[#allocation8 + $0x458] sm:$0xff]  }
 0x308   : > { %8258 = vmatpush3.bf16.msra.mxu0 %v9218_v38  ;;  %5752 = vmatprep.mubr.bf16.mxu0 %v5590_v40  ;;  %v9261_v38 = vld [vmem:[#allocation8 + $0x420] sm:$0xff]   ;;  %v9264_v40 = vld [vmem:[#allocation8 + $0x4d8] sm:$0xff]  }
 0x309   : > { %8259 = vmatprep.subr.bf16.mxu0 %v9220_v19  ;;  %v9262_v19 = vld [vmem:[#allocation8 + $0x4a0] sm:$0xff]  }
 0x30a   : > { %8238 = vmatpush3.bf16.msra.mxu1 %v9221_v61  ;;  %v6146_v61 = vld [vmem:[#allocation2 + $0x44] ss:$8 sm:$0xf] }
 0x30b   : > { %8239 = vmatprep.subr.bf16.mxu1 %v9223_v41  ;;  %v6148_v41 = vld [vmem:[#allocation2 + $0x45] ss:$8 sm:$0xf] }
 0x30c   : > { %8260 = vmatpush3.bf16.msra.mxu0 %v9222_v3  ;;  %v9265_v3 = vld [vmem:[#allocation8 + $0x418] sm:$0xff]  }
 0x30d   : > { %8261 = vmatprep.subr.bf16.mxu0 %v9224_v17  ;;  %v9267_v17 = vld [vmem:[#allocation8 + $0x450] sm:$0xff]  }
 0x30e   : > { %8240 = vmatpush3.bf16.msra.mxu1 %v9225_v25  ;;  %v6338_v25 = vld [vmem:[#allocation2 + $0x46] ss:$8 sm:$0xf] }
 0x30f   : > { %8241 = vmatprep.subr.bf16.mxu1 %v9227_v43  ;;  %v6340_v43 = vld [vmem:[#allocation2 + $0x47] ss:$8 sm:$0xf] }
 0x310   : > { %8262 = vmatpush3.bf16.msra.mxu0 %v9226_v6  ;;  %v9266_v6 = vld [vmem:[#allocation8 + $0x498] sm:$0xff]  }
 0x311   : > { %8263 = vmatprep.subr.bf16.mxu0 %v9228_v10  ;;  %v6149_v10 = vmax.f32 %v6146_v61, %v6148_v41  ;;  %v9302_v61 = vld [vmem:[#allocation8 + $0x590] sm:$0xff]  }
 0x312   : > { %8242 = vmatpush3.bf16.msra.mxu1 %v9229_v11  ;;  %v9268_v11 = vld [vmem:[#allocation8 + $0x4d0] sm:$0xff]  }
 0x313   : > { %8243 = vmatprep.subr.bf16.mxu1 %v9231_v42  ;;  %v9269_v42 = vld [vmem:[#allocation8 + $0x410] sm:$0xff]   ;;  %v6151_v34 = vrot.slane %v6149_v10, 2 }
 0x314   : > { %8264 = vmatpush3.bf16.msra.mxu0 %v9230_v5  ;;  %v6341_v5 = vmax.f32 %v6338_v25, %v6340_v43  ;;  %v9307_v43 = vld [vmem:[#allocation8 + $0x540] sm:$0xff]  }
 0x315   : > { %8265 = vmatprep.subr.bf16.mxu0 %v9232_v46  ;;  %v9271_v46 = vld [vmem:[#allocation8 + $0x448] sm:$0xff]   ;;  %v10336_v44 = vmax.f32 %v6149_v10, %v6151_v34  ;;  %v9310_v34 = vld [vmem:[#allocation8 + $0x580] sm:$0xff]  }
 0x316   : > { %8244 = vmatpush3.bf16.msra.mxu1 %v9233_v15  ;;  %v9272_v15 = vld [vmem:[#allocation8 + $0x4c8] sm:$0xff]   ;;  %v6343_v54 = vrot.slane %v6341_v5, 2 }
 0x317   : > { %8245 = vmatprep.subr.bf16.mxu1 %v9235_v28  ;;  %v9273_v28 = vld [vmem:[#allocation8 + $0x408] sm:$0xff]  }
 0x318   : > { %8266 = vmatpush3.bf16.msra.mxu0 %v9234_v31  ;;  %v9274_v31 = vld [vmem:[#allocation8 + $0x488] sm:$0xff]   ;;  %v10338_v32 = vmax.f32 %v6341_v5, %v6343_v54  ;;  %v9312_v54 = vld [vmem:[#allocation8 + $0x6f8] sm:$0xff]  }
 0x319   : > { %8267 = vmatprep.subr.bf16.mxu0 %v9236_v55  ;;  %v9276_v55 = vld [vmem:[#allocation8 + $0x4c0] sm:$0xff]  }
 0x31a   : > { %8246 = vmatpush3.bf16.msra.mxu1 %v9237_v37  ;;  %v9277_v37 = vld [vmem:[#allocation8 + $0x400] sm:$0xff]  }
 0x31b   : > { %8247 = vmatprep.subr.bf16.mxu1 %v9239_v50  ;;  %v5774_v50 = vrot.slane %v10324_v22, %v10210_v24 }
 0x31c   : > { %8268 = vmatpush3.bf16.msra.mxu0 %v9238_v12  ;;  %v9279_v12 = vld [vmem:[#allocation8 + $0x578] sm:$0xff]  }
 0x31d   : > { %8269 = vmatprep.subr.bf16.mxu0 %v9240_v7  ;;  %v6162_v7 = vrot.slane %v10336_v44, %v10220_v36 }
 0x31e   : > { %8248 = vmatpush3.bf16.msra.mxu1 %v9241_v35  ;;  %v5966_v35 = vrot.slane %v10326_v8, %v10210_v24  ;;  %v9285_v8 = vld [vmem:[#allocation8 + $0x530] sm:$0xff]  }
 0x31f   : > { %8249 = vmatprep.subr.bf16.mxu1 %v9243_v48  ;;  %v9281_v48 = vld [vmem:[#allocation8 + $0x538] sm:$0xff]   ;;  %v6166_v22 = vpack.c.bf16 %v6162_v7, %v6162_v7 }
 0x320   : > { %8270 = vmatpush3.bf16.msra.mxu0 %v9242_v26  ;;  %v6354_v26 = vrot.slane %v10338_v32, %v10220_v36 }
 0x321   : > { %8271 = vmatprep.subr.bf16.mxu0 %v9244_v56  ;;  %v5781_v56 = vpack.c.bf16 %v5774_v50, %v5774_v50  ;;  %v9314_v50 = vld [vmem:[#allocation8 + $0x6b8] sm:$0xff]  }
 0x322   : > { %8250 = vmatpush3.bf16.msra.mxu1 %v9245_v45  ;;  %v9283_v45 = vld [vmem:[#allocation8 + $0x570] sm:$0xff]   ;;  %v6358_v60 = vpack.c.bf16 %v6354_v26, %v6354_v26  ;;  %v9321_v26 = vld [vmem:[#allocation8 + $0x628] sm:$0xff]  }
 0x323   : > { %8279 = vmatprep.subr.bf16.mxu1 %v9247_v52  ;;  %v5973_v52 = vpack.c.bf16 %v5966_v35, %v5966_v35  ;;  %v9319_v35 = vld [vmem:[#allocation8 + $0x668] sm:$0xff]  }
 0x324   : > { %8272 = vmatpush3.bf16.msra.mxu0 %v9246_v4  ;;  %v9284_v4 = vld [vmem:[#allocation8 + $0x5f0] sm:$0xff]  }
 0x325   : > { %5561 = vmatmul.mubr.bf16.vlgmr.msra.gmra.mxu1 %v5397_v23  ;;  %8301 = vmatprep.subr.bf16.mxu0 %v9248_v0  ;;  %v9286_v0 = vld [vmem:[#allocation8 + $0x5b0] sm:$0xff]   ;;  %v9291_v23 = vld [vmem:[#allocation8 + $0x560] sm:$0xff]  }
 0x326   : > { %8280 = vmatpush3.bf16.msra.mxu1 %v9249_v30  ;;  %5944 = vmatprep.mubr.bf16.mxu1 %v5782_v18  ;;  %v9288_v30 = vld [vmem:[#allocation8 + $0x5e8] sm:$0xff]   ;;  %v9292_v18 = vld [vmem:[#allocation8 + $0x5e0] sm:$0xff]  }
 0x327   : > { %5753 = vmatmul.mubr.bf16.vlgmr.msra.gmra.mxu0 %v5589_v59  ;;  %8281 = vmatprep.subr.bf16.mxu1 %v9251_v47  ;;  %v9290_v47 = vld [vmem:[#allocation8 + $0x5a8] sm:$0xff]   ;;  %v9295_v59 = vld [vmem:[#allocation8 + $0x558] sm:$0xff]  }
 0x328   : > { %8302 = vmatpush3.bf16.msra.mxu0 %v9250_v57  ;;  %6136 = vmatprep.mubr.bf16.mxu0 %v5974_v21  ;;  %v9293_v57 = vld [vmem:[#allocation8 + $0x520] sm:$0xff]  }
 0x329   : > { %8303 = vmatprep.subr.bf16.mxu0 %v9252_v33  ;;  %v9294_v33 = vld [vmem:[#allocation8 + $0x5a0] sm:$0xff]  }
 0x32a   : > { %8282 = vmatpush3.bf16.msra.mxu1 %v9253_v20  ;;  %v6530_v21 = vld [vmem:[#allocation2 + $0x60] ss:$8 sm:$0xf] }
 0x32b   : > { %8283 = vmatprep.subr.bf16.mxu1 %v9255_v51  ;;  %v9296_v20 = vld [vmem:[#allocation8 + $0x5d8] sm:$0xff]  }
 0x32c   : > { %8304 = vmatpush3.bf16.msra.mxu0 %v9254_v1  ;;  %v6532_v51 = vld [vmem:[#allocation2 + $0x61] ss:$8 sm:$0xf] }
 0x32d   : > { %8305 = vmatprep.subr.bf16.mxu0 %v9256_v13  ;;  %v9297_v1 = vld [vmem:[#allocation8 + $0x518] sm:$0xff]  }
 0x32e   : > { %8284 = vmatpush3.bf16.msra.mxu1 %v9257_v16  ;;  %v6722_v13 = vld [vmem:[#allocation2 + $0x62] ss:$8 sm:$0xf] }
 0x32f   : > { %8285 = vmatprep.subr.bf16.mxu1 %v9259_v63  ;;  %v9299_v16 = vld [vmem:[#allocation8 + $0x550] sm:$0xff]  }
 0x330   : > { %8306 = vmatpush3.bf16.msra.mxu0 %v9258_v53  ;;  %v6724_v63 = vld [vmem:[#allocation2 + $0x63] ss:$8 sm:$0xf] }
 0x331   : > { %8307 = vmatprep.subr.bf16.mxu0 %v9260_v58  ;;  %v9298_v53 = vld [vmem:[#allocation8 + $0x598] sm:$0xff]   ;;  %v6533_v58 = vmax.f32 %v6530_v21, %v6532_v51  ;;  %v9335_v21 = vld [vmem:[#allocation8 + $0x648] sm:$0xff]  }
 0x332   : > { %8286 = vmatpush3.bf16.msra.mxu1 %v9261_v38  ;;  %v9300_v38 = vld [vmem:[#allocation8 + $0x5d0] sm:$0xff]  }
 0x333   : > { %8287 = vmatprep.subr.bf16.mxu1 %v9263_v14  ;;  %v9301_v14 = vld [vmem:[#allocation8 + $0x510] sm:$0xff]   ;;  %v6535_v41 = vrot.slane %v6533_v58, 2 }
 0x334   : > { %8308 = vmatpush3.bf16.msra.mxu0 %v9262_v19  ;;  %v6725_v19 = vmax.f32 %v6722_v13, %v6724_v63  ;;  %v9337_v13 = vld [vmem:[#allocation8 + $0x608] sm:$0xff]   ;;  %v9339_v63 = vld [vmem:[#allocation8 + $0x640] sm:$0xff]  }
 0x335   : > { %8309 = vmatprep.subr.bf16.mxu0 %v9264_v40  ;;  %v9303_v40 = vld [vmem:[#allocation8 + $0x548] sm:$0xff]   ;;  %v10348_v10 = vmax.f32 %v6533_v58, %v6535_v41  ;;  %v9342_v41 = vld [vmem:[#allocation8 + $0x680] sm:$0xff]  }
 0x336   : > { %8288 = vmatpush3.bf16.msra.mxu1 %v9265_v3  ;;  %v9304_v3 = vld [vmem:[#allocation8 + $0x5c8] sm:$0xff]   ;;  %v6727_v25 = vrot.slane %v6725_v19, 2 }
 0x337   : > { %8289 = vmatprep.subr.bf16.mxu1 %v9267_v17  ;;  %v9305_v17 = vld [vmem:[#allocation8 + $0x508] sm:$0xff]  }
 0x338   : > { %8310 = vmatpush3.bf16.msra.mxu0 %v9266_v6  ;;  %v9306_v6 = vld [vmem:[#allocation8 + $0x588] sm:$0xff]   ;;  %v10350_v5 = vmax.f32 %v6725_v19, %v6727_v25  ;;  %v9344_v25 = vld [vmem:[#allocation8 + $0x7f8] sm:$0xff]  }
 0x339   : > { %8311 = vmatprep.subr.bf16.mxu0 %v9268_v11  ;;  %v9308_v11 = vld [vmem:[#allocation8 + $0x5c0] sm:$0xff]  }
 0x33a   : > { %8290 = vmatpush3.bf16.msra.mxu1 %v9269_v42  ;;  %v9309_v42 = vld [vmem:[#allocation8 + $0x500] sm:$0xff]  }
 0x33b   : > { %8291 = vmatprep.subr.bf16.mxu1 %v9271_v46  ;;  %v6158_v46 = vrot.slane %v10336_v44, %v10210_v24 }
 0x33c   : > { %8312 = vmatpush3.bf16.msra.mxu0 %v9270_v49  ;;  %v9311_v49 = vld [vmem:[#allocation8 + $0x678] sm:$0xff]  }
 0x33d   : > { %8313 = vmatprep.subr.bf16.mxu0 %v9272_v15  ;;  %v6546_v15 = vrot.slane %v10348_v10, %v10220_v36 }
 0x33e   : > { %8292 = vmatpush3.bf16.msra.mxu1 %v9273_v28  ;;  %v6350_v28 = vrot.slane %v10338_v32, %v10210_v24  ;;  %v9317_v32 = vld [vmem:[#allocation8 + $0x630] sm:$0xff]  }
 0x33f   : > { %8293 = vmatprep.subr.bf16.mxu1 %v9275_v2  ;;  %v9313_v2 = vld [vmem:[#allocation8 + $0x638] sm:$0xff]   ;;  %v6550_v44 = vpack.c.bf16 %v6546_v15, %v6546_v15  ;;  %v9348_v15 = vld [vmem:[#allocation8 + $0x7f0] sm:$0xff]  }
 0x340   : > { %8314 = vmatpush3.bf16.msra.mxu0 %v9274_v31  ;;  %v6738_v31 = vrot.slane %v10350_v5, %v10220_v36 }
 0x341   : > { %8315 = vmatprep.subr.bf16.mxu0 %v9276_v55  ;;  %v6165_v55 = vpack.c.bf16 %v6158_v46, %v6158_v46  ;;  %v9346_v46 = vld [vmem:[#allocation8 + $0x7b8] sm:$0xff]  }
 0x342   : > { %8294 = vmatpush3.bf16.msra.mxu1 %v9277_v37  ;;  %v9315_v37 = vld [vmem:[#allocation8 + $0x670] sm:$0xff]   ;;  %v6742_v7 = vpack.c.bf16 %v6738_v31, %v6738_v31 }
 0x343   : > { %8323 = vmatprep.subr.bf16.mxu1 %v9279_v12  ;;  %v6357_v12 = vpack.c.bf16 %v6350_v28, %v6350_v28  ;;  %v9349_v28 = vld [vmem:[#allocation8 + $0x730] sm:$0xff]  }
 0x344   : > { %8316 = vmatpush3.bf16.msra.mxu0 %v9278_v29  ;;  %v9316_v29 = vld [vmem:[#allocation8 + $0x6f0] sm:$0xff]  }
 0x345   : > { %5945 = vmatmul.mubr.bf16.vlgmr.msra.gmra.mxu1 %v5781_v56  ;;  %8345 = vmatprep.subr.bf16.mxu0 %v9280_v27  ;;  %v9318_v27 = vld [vmem:[#allocation8 + $0x6b0] sm:$0xff]   ;;  %v9323_v56 = vld [vmem:[#allocation8 + $0x660] sm:$0xff]  }
 0x346   : > { %8324 = vmatpush3.bf16.msra.mxu1 %v9281_v48  ;;  %6328 = vmatprep.mubr.bf16.mxu1 %v6166_v22  ;;  %v9320_v48 = vld [vmem:[#allocation8 + $0x6e8] sm:$0xff]   ;;  %v9324_v22 = vld [vmem:[#allocation8 + $0x6e0] sm:$0xff]  }
 0x347   : > { %6137 = vmatmul.mubr.bf16.vlgmr.msra.gmra.mxu0 %v5973_v52  ;;  %8325 = vmatprep.subr.bf16.mxu1 %v9283_v45  ;;  %v9322_v45 = vld [vmem:[#allocation8 + $0x6a8] sm:$0xff]   ;;  %v9327_v52 = vld [vmem:[#allocation8 + $0x658] sm:$0xff]  }
 0x348   : > { %8346 = vmatpush3.bf16.msra.mxu0 %v9282_v62  ;;  %6520 = vmatprep.mubr.bf16.mxu0 %v6358_v60  ;;  %v9325_v62 = vld [vmem:[#allocation8 + $0x620] sm:$0xff]  }
 0x349   : > { %8347 = vmatprep.subr.bf16.mxu0 %v9284_v4  ;;  %v9326_v4 = vld [vmem:[#allocation8 + $0x6a0] sm:$0xff]  }
 0x34a   : > { %8326 = vmatpush3.bf16.msra.mxu1 %v9285_v8  ;;  %v6914_v60 = vld [vmem:[#allocation2 + $0x64] ss:$8 sm:$0xf] }
 0x34b   : > { %8327 = vmatprep.subr.bf16.mxu1 %v9287_v9  ;;  %v9328_v8 = vld [vmem:[#allocation8 + $0x6d8] sm:$0xff]  }
 0x34c   : > { %8348 = vmatpush3.bf16.msra.mxu0 %v9286_v0  ;;  %v6916_v9 = vld [vmem:[#allocation2 + $0x65] ss:$8 sm:$0xf] }
 0x34d   : > { %8349 = vmatprep.subr.bf16.mxu0 %v9288_v30  ;;  %v9329_v0 = vld [vmem:[#allocation8 + $0x618] sm:$0xff]  }
 0x34e   : > { %8328 = vmatpush3.bf16.msra.mxu1 %v9289_v39  ;;  %v7106_v30 = vld [vmem:[#allocation2 + $0x66] ss:$8 sm:$0xf] }
 0x34f   : > { %8329 = vmatprep.subr.bf16.mxu1 %v9291_v23  ;;  %v9331_v39 = vld [vmem:[#allocation8 + $0x650] sm:$0xff]  }
 0x350   : > { %8350 = vmatpush3.bf16.msra.mxu0 %v9290_v47  ;;  %v7108_v23 = vld [vmem:[#allocation2 + $0x67] ss:$8 sm:$0xf] }
 0x351   : > { %8351 = vmatprep.subr.bf16.mxu0 %v9292_v18  ;;  %v9330_v47 = vld [vmem:[#allocation8 + $0x698] sm:$0xff]   ;;  %v6917_v18 = vmax.f32 %v6914_v60, %v6916_v9  ;;  %v9363_v60 = vld [vmem:[#allocation8 + $0x750] sm:$0xff]  }
 0x352   : > { %8330 = vmatpush3.bf16.msra.mxu1 %v9293_v57  ;;  %v9332_v57 = vld [vmem:[#allocation8 + $0x6d0] sm:$0xff]  }
 0x353   : > { %8331 = vmatprep.subr.bf16.mxu1 %v9295_v59  ;;  %v9333_v59 = vld [vmem:[#allocation8 + $0x610] sm:$0xff]   ;;  %v6919_v51 = vrot.slane %v6917_v18, 2 }
 0x354   : > { %8352 = vmatpush3.bf16.msra.mxu0 %v9294_v33  ;;  %v7109_v33 = vmax.f32 %v7106_v30, %v7108_v23  ;;  %v9364_v9 = vld [vmem:[#allocation8 + $0x7d0] sm:$0xff]   ;;  %v9367_v30 = vld [vmem:[#allocation8 + $0x748] sm:$0xff]  }
 0x355   : > { %8353 = vmatprep.subr.bf16.mxu0 %v9296_v20  ;;  %v9334_v20 = vld [vmem:[#allocation8 + $0x690] sm:$0xff]   ;;  %v10360_v58 = vmax.f32 %v6917_v18, %v6919_v51  ;;  %v9368_v23 = vld [vmem:[#allocation8 + $0x7c8] sm:$0xff]   ;;  %v9371_v18 = vld [vmem:[#allocation8 + $0x740] sm:$0xff]  }
 0x356   : > { %8332 = vmatpush3.bf16.msra.mxu1 %v9297_v1  ;;  %v9336_v1 = vld [vmem:[#allocation8 + $0x6c8] sm:$0xff]  }
 0x357   : > { %8333 = vmatprep.subr.bf16.mxu1 %v9299_v16  ;;  %v7111_v16 = vrot.slane %v7109_v33, 2 }
 0x358   : > { %8354 = vmatpush3.bf16.msra.mxu0 %v9298_v53  ;;  %v9338_v53 = vld [vmem:[#allocation8 + $0x688] sm:$0xff]  }
 0x359   : > { %8355 = vmatprep.subr.bf16.mxu0 %v9300_v38  ;;  %v9340_v38 = vld [vmem:[#allocation8 + $0x6c0] sm:$0xff]   ;;  %v10362_v19 = vmax.f32 %v7109_v33, %v7111_v16 }
 0x35a   : > { %8334 = vmatpush3.bf16.msra.mxu1 %v9301_v14  ;;  %v9341_v14 = vld [vmem:[#allocation8 + $0x600] sm:$0xff]  }
 0x35b   : > { %8335 = vmatprep.subr.bf16.mxu1 %v9303_v40  ;;  %v6542_v40 = vrot.slane %v10348_v10, %v10210_v24  ;;  %v9373_v33 = vld [vmem:[#allocation8 + $0x700] sm:$0xff]   ;;  %v7118_v51 = vrot.slane %v10362_v19, %v10210_v24 }
 0x35c   : > { %8356 = vmatpush3.bf16.msra.mxu0 %v9302_v61  ;;  %v9343_v61 = vld [vmem:[#allocation8 + $0x778] sm:$0xff]  }
 0x35d   : > { %8357 = vmatprep.subr.bf16.mxu0 %v9304_v3  ;;  %v6930_v3 = vrot.slane %v10360_v58, %v10220_v36  ;;  %v7125_v16 = vpack.c.bf16 %v7118_v51, %v7118_v51 }
 0x35e   : > { %8336 = vmatpush3.bf16.msra.mxu1 %v9305_v17  ;;  %v6734_v17 = vrot.slane %v10350_v5, %v10210_v24 }
 0x35f   : > { %8337 = vmatprep.subr.bf16.mxu1 %v9307_v43  ;;  %v9345_v43 = vld [vmem:[#allocation8 + $0x738] sm:$0xff]   ;;  %v6934_v10 = vpack.c.bf16 %v6930_v3, %v6930_v3 }
 0x360   : > { %8358 = vmatpush3.bf16.msra.mxu0 %v9306_v6  ;;  %v7122_v6 = vrot.slane %v10362_v19, %v10220_v36  ;;  %v9351_v36 = vld [vmem:[#allocation8 + $0x768] sm:$0xff]  }
 0x361   : > { %8359 = vmatprep.subr.bf16.mxu0 %v9308_v11  ;;  %v6549_v11 = vpack.c.bf16 %v6542_v40, %v6542_v40 }
 0x362   : > { %8338 = vmatpush3.bf16.msra.mxu1 %v9309_v42  ;;  %v9347_v42 = vld [vmem:[#allocation8 + $0x770] sm:$0xff]   ;;  %v7126_v5 = vpack.c.bf16 %v7122_v6, %v7122_v6 }
 0x363   : > { %8367 = vmatprep.subr.bf16.mxu1 %v9311_v49  ;;  %v6741_v49 = vpack.c.bf16 %v6734_v17, %v6734_v17 }
 0x364   : > { %8360 = vmatpush3.bf16.msra.mxu0 %v9310_v34 }
 0x365   : > { %6329 = vmatmul.mubr.bf16.vlgmr.msra.gmra.mxu1 %v6165_v55  ;;  %8389 = vmatprep.subr.bf16.mxu0 %v9312_v54  ;;  %v9350_v55 = vld [vmem:[#allocation8 + $0x7b0] sm:$0xff]  }
 0x366   : > { %8368 = vmatpush3.bf16.msra.mxu1 %v9313_v2  ;;  %6712 = vmatprep.mubr.bf16.mxu1 %v6550_v44 }
 0x367   : > { %6521 = vmatmul.mubr.bf16.vlgmr.msra.gmra.mxu0 %v6357_v12  ;;  %8369 = vmatprep.subr.bf16.mxu1 %v9315_v37 }
 0x368   : > { %8390 = vmatpush3.bf16.msra.mxu0 %v9314_v50  ;;  %6904 = vmatprep.mubr.bf16.mxu0 %v6742_v7  ;;  %v9352_v50 = vld [vmem:[#allocation8 + $0x7e8] sm:$0xff]  }
 0x369   : > { %8391 = vmatprep.subr.bf16.mxu0 %v9316_v29  ;;  %v9353_v29 = vld [vmem:[#allocation8 + $0x728] sm:$0xff]  }
 0x36a   : > { %8370 = vmatpush3.bf16.msra.mxu1 %v9317_v32 }
 0x36b   : > { %8371 = vmatprep.subr.bf16.mxu1 %v9319_v35  ;;  %v9355_v35 = vld [vmem:[#allocation8 + $0x760] sm:$0xff]  }
 0x36c   : > { %8392 = vmatpush3.bf16.msra.mxu0 %v9318_v27 }
 0x36d   : > { %8393 = vmatprep.subr.bf16.mxu0 %v9320_v48  ;;  %v9354_v48 = vld [vmem:[#allocation8 + $0x7a8] sm:$0xff]  }
 0x36e   : > { %8372 = vmatpush3.bf16.msra.mxu1 %v9321_v26 }
 0x36f   : > { %8373 = vmatprep.subr.bf16.mxu1 %v9323_v56  ;;  %v9356_v56 = vld [vmem:[#allocation8 + $0x7e0] sm:$0xff]  }
 0x370   : > { %8394 = vmatpush3.bf16.msra.mxu0 %v9322_v45  ;;  %v9357_v45 = vld [vmem:[#allocation8 + $0x720] sm:$0xff]  }
 0x371   : > { %8395 = vmatprep.subr.bf16.mxu0 %v9324_v22  ;;  %v9359_v22 = vld [vmem:[#allocation8 + $0x758] sm:$0xff]  }
 0x372   : > { %8374 = vmatpush3.bf16.msra.mxu1 %v9325_v62  ;;  %v9358_v62 = vld [vmem:[#allocation8 + $0x7a0] sm:$0xff]  }
 0x373   : > { %8375 = vmatprep.subr.bf16.mxu1 %v9327_v52  ;;  %v9360_v52 = vld [vmem:[#allocation8 + $0x7d8] sm:$0xff]  }
 0x374   : > { %8396 = vmatpush3.bf16.msra.mxu0 %v9326_v4  ;;  %v9361_v4 = vld [vmem:[#allocation8 + $0x718] sm:$0xff]  }
 0x375   : > { %8397 = vmatprep.subr.bf16.mxu0 %v9328_v8  ;;  %v9362_v8 = vld [vmem:[#allocation8 + $0x798] sm:$0xff]  }
 0x376   : > { %8376 = vmatpush3.bf16.msra.mxu1 %v9329_v0  ;;  %v9365_v0 = vld [vmem:[#allocation8 + $0x710] sm:$0xff]  }
 0x377   : > { %8377 = vmatprep.subr.bf16.mxu1 %v9331_v39  ;;  %v9366_v39 = vld [vmem:[#allocation8 + $0x790] sm:$0xff]  }
 0x378   : > { %8398 = vmatpush3.bf16.msra.mxu0 %v9330_v47  ;;  %v9369_v47 = vld [vmem:[#allocation8 + $0x708] sm:$0xff]  }
 0x379   : > { %8399 = vmatprep.subr.bf16.mxu0 %v9332_v57  ;;  %v9370_v57 = vld [vmem:[#allocation8 + $0x788] sm:$0xff]  }
 0x37a   : > { %8378 = vmatpush3.bf16.msra.mxu1 %v9333_v59  ;;  %v9372_v59 = vld [vmem:[#allocation8 + $0x7c0] sm:$0xff]  }
 0x37b   : > { %8379 = vmatprep.subr.bf16.mxu1 %v9335_v21  ;;  %v6926_v21 = vrot.slane %v10360_v58, %v10210_v24 }
 0x37c   : > { %8400 = vmatpush3.bf16.msra.mxu0 %v9334_v20  ;;  %v9374_v20 = vld [vmem:[#allocation8 + $0x780] sm:$0xff]  }
 0x37d   : > { %8401 = vmatprep.subr.bf16.mxu0 %v9336_v1  ;;  %v6933_v1 = vpack.c.bf16 %v6926_v21, %v6926_v21 }
 0x37e   : > { %8380 = vmatpush3.bf16.msra.mxu1 %v9337_v13 }
 0x37f   : > { %8381 = vmatprep.subr.bf16.mxu1 %v9339_v63 }
 0x380   : > { %8402 = vmatpush3.bf16.msra.mxu0 %v9338_v53 }
 0x381   : > { %8403 = vmatprep.subr.bf16.mxu0 %v9340_v38 }
 0x382   : > { %8382 = vmatpush3.bf16.msra.mxu1 %v9341_v14 }
 0x383   : > { %8411 = vmatprep.subr.bf16.mxu1 %v9343_v61 }
 0x384   : > { %8404 = vmatpush3.bf16.msra.mxu0 %v9342_v41 }
 0x385   : > { %6713 = vmatmul.mubr.bf16.vlgmr.msra.gmra.mxu1 %v6549_v11  ;;  %8433 = vmatprep.subr.bf16.mxu0 %v9344_v25  ;;  %v8119_v34 = vpop.f32.mrf.mxu1 }
 0x386   : > { %8412 = vmatpush3.bf16.msra.mxu1 %v9345_v43  ;;  %7096 = vmatprep.mubr.bf16.mxu1 %v6934_v10 }
 0x387   : > { %6905 = vmatmul.mubr.bf16.vlgmr.msra.gmra.mxu0 %v6741_v49  ;;  %v8141_v54 = vpop.f32.mrf.mxu0  ;;  %v8120_v2 = vpop.f32.mrf.mxu1  ;;  %8413 = vmatprep.subr.bf16.mxu1 %v9347_v42 }
 0x388   : > { %8434 = vmatpush3.bf16.msra.mxu0 %v9346_v46  ;;  %7288 = vmatprep.mubr.bf16.mxu0 %v7126_v5  ;;  %v8121_v31 = vadd.f32 %v8120_v2, %v8119_v34 }
 0x389   : > { %v8142_v37 = vpop.f32.mrf.mxu0  ;;  %8435 = vmatprep.subr.bf16.mxu0 %v9348_v15  ;;  %v8122_v44 = vpop.f32.mrf.mxu1 }
 0x38a   : > { %v8143_v12 = vadd.f32 %v8142_v37, %v8141_v54  ;;  %8414 = vmatpush3.bf16.msra.mxu1 %v9349_v28 }
 0x38b   : > { %v8144_v7 = vpop.f32.mrf.mxu0  ;;  %v8123_v32 = vpop.f32.mrf.mxu1  ;;  %8415 = vmatprep.subr.bf16.mxu1 %v9351_v36 }
 0x38c   : > { %v4604_v27 = vadd.f32 %v8143_v12, %v8121_v31  ;;  %8436 = vmatpush3.bf16.msra.mxu0 %v9350_v55 }
 0x38d   : > { %v8145_v26 = vpop.f32.mrf.mxu0  ;;  %8437 = vmatprep.subr.bf16.mxu0 %v9352_v50 }
 0x38e   : > { %8416 = vmatpush3.bf16.msra.mxu1 %v9353_v29 }
 0x38f   : > { %8417 = vmatprep.subr.bf16.mxu1 %v9355_v35 }
 0x390   : > { %8438 = vmatpush3.bf16.msra.mxu0 %v9354_v48 }
 0x391   : > { %8439 = vmatprep.subr.bf16.mxu0 %v9356_v56 }
 0x392   : > { %8418 = vmatpush3.bf16.msra.mxu1 %v9357_v45 }
 0x393   : > { %8419 = vmatprep.subr.bf16.mxu1 %v9359_v22 }
 0x394   : > { %8440 = vmatpush3.bf16.msra.mxu0 %v9358_v62 }
 0x395   : > { %8441 = vmatprep.subr.bf16.mxu0 %v9360_v52 }
 0x396   : > { %8420 = vmatpush3.bf16.msra.mxu1 %v9361_v4 }
 0x397   : > { %8421 = vmatprep.subr.bf16.mxu1 %v9363_v60 }
 0x398   : > { %8442 = vmatpush3.bf16.msra.mxu0 %v9362_v8 }
 0x399   : > { %8443 = vmatprep.subr.bf16.mxu0 %v9364_v9 }
 0x39a   : > { %8422 = vmatpush3.bf16.msra.mxu1 %v9365_v0 }
 0x39b   : > { %8423 = vmatprep.subr.bf16.mxu1 %v9367_v30 }
 0x39c   : > { %8444 = vmatpush3.bf16.msra.mxu0 %v9366_v39 }
 0x39d   : > { %8445 = vmatprep.subr.bf16.mxu0 %v9368_v23 }
 0x39e   : > { %8424 = vmatpush3.bf16.msra.mxu1 %v9369_v47 }
 0x39f   : > { %8425 = vmatprep.subr.bf16.mxu1 %v9371_v18 }
 0x3a0   : > { %8446 = vmatpush3.bf16.msra.mxu0 %v9370_v57 }
 0x3a1   : > { %8447 = vmatprep.subr.bf16.mxu0 %v9372_v59 }
 0x3a2   : > { %8426 = vmatpush3.bf16.msra.mxu1 %v9373_v33 }
 0x3a4   : > { %8448 = vmatpush3.bf16.msra.mxu0 %v9374_v20 }
 0x3a5   : > { %v8163_v13 = vpop.f32.mrf.mxu1  ;;  %7097 = vmatmul.mubr.bf16.vlgmr.msra.gmra.mxu1 %v6933_v1 }
 0x3a7   : > { %v8185_v63 = vpop.f32.mrf.mxu0  ;;  %7289 = vmatmul.mubr.bf16.vlgmr.msra.gmra.mxu0 %v7125_v16  ;;  %v8164_v53 = vpop.f32.mrf.mxu1 }
 0x3a8   : > { %v8165_v38 = vadd.f32 %v8164_v53, %v8163_v13 }
 0x3a9   : > { %v8186_v14 = vpop.f32.mrf.mxu0  ;;  %v8166_v40 = vpop.f32.mrf.mxu1 }
 0x3aa   : > { %v4800_v61 = vadd.f32 %v8165_v38, %v4604_v27  ;;  %v8187_v58 = vadd.f32 %v8186_v14, %v8185_v63 }
 0x3ab   : > { %v8188_v41 = vpop.f32.mrf.mxu0  ;;  %v8167_v3 = vpop.f32.mrf.mxu1 }
 0x3ac   : > { %v4992_v17 = vadd.f32 %v8187_v58, %v4800_v61 }
 0x3ad   : > { %v8189_v25 = vpop.f32.mrf.mxu0 }
 0x3c5   : > { %v8207_v43 = vpop.f32.mrf.mxu1 }
 0x3c7   : > { %v8229_v24 = vpop.f32.mrf.mxu0  ;;  %v8208_v19 = vpop.f32.mrf.mxu1 }
 0x3c8   : > { %v8209_v6 = vadd.f32 %v8208_v19, %v8207_v43 }
 0x3c9   : > { %v8230_v11 = vpop.f32.mrf.mxu0  ;;  %v8210_v42 = vpop.f32.mrf.mxu1 }
 0x3ca   : > { %v5184_v10 = vadd.f32 %v8209_v6, %v4992_v17  ;;  %v8231_v46 = vadd.f32 %v8230_v11, %v8229_v24  ;;  %v7297_v11 = vld [vmem:[#allocation9] sm:$0x1] }
 0x3cb   : > { %v8232_v49 = vpop.f32.mrf.mxu0  ;;  %v8211_v34 = vpop.f32.mrf.mxu1 }
 0x3cc   : > { %v5376_v15 = vadd.f32 %v8231_v46, %v5184_v10 }
 0x3cd   : > { %v8233_v5 = vpop.f32.mrf.mxu0 }
 0x3e5   : > { %v8251_v28 = vpop.f32.mrf.mxu1 }
 0x3e7   : > { %v8273_v54 = vpop.f32.mrf.mxu0  ;;  %v8252_v2 = vpop.f32.mrf.mxu1 }
 0x3e8   : > { %v8253_v36 = vadd.f32 %v8252_v2, %v8251_v28 }
 0x3e9   : > { %v8274_v31 = vpop.f32.mrf.mxu0  ;;  %v8254_v55 = vpop.f32.mrf.mxu1 }
 0x3ea   : > { %v5568_v37 = vadd.f32 %v8253_v36, %v5376_v15  ;;  %v8275_v44 = vadd.f32 %v8274_v31, %v8273_v54 }
 0x3eb   : > { %v8276_v50 = vpop.f32.mrf.mxu0  ;;  %v8255_v12 = vpop.f32.mrf.mxu1 }
 0x3ec   : > { %v5760_v29 = vadd.f32 %v8275_v44, %v5568_v37 }
 0x3ed   : > { %v8277_v7 = vpop.f32.mrf.mxu0 }
 0x405   : > { %v8295_v32 = vpop.f32.mrf.mxu1 }
 0x407   : > { %v8317_v35 = vpop.f32.mrf.mxu0  ;;  %v8296_v27 = vpop.f32.mrf.mxu1 }
 0x408   : > { %v8297_v48 = vadd.f32 %v8296_v27, %v8295_v32 }
 0x409   : > { %v8318_v26 = vpop.f32.mrf.mxu0  ;;  %v8298_v56 = vpop.f32.mrf.mxu1 }
 0x40a   : > { %v5952_v45 = vadd.f32 %v8297_v48, %v5760_v29  ;;  %v8319_v22 = vadd.f32 %v8318_v26, %v8317_v35 }
 0x40b   : > { %v8320_v62 = vpop.f32.mrf.mxu0  ;;  %v8299_v52 = vpop.f32.mrf.mxu1 }
 0x40c   : > { %v6144_v4 = vadd.f32 %v8319_v22, %v5952_v45 }
 0x40d   : > { %v8321_v60 = vpop.f32.mrf.mxu0 }
 0x425   : > { %v8339_v8 = vpop.f32.mrf.mxu1 }
 0x427   : > { %v8361_v9 = vpop.f32.mrf.mxu0  ;;  %v8340_v0 = vpop.f32.mrf.mxu1 }
 0x428   : > { %v8341_v16 = vadd.f32 %v8340_v0, %v8339_v8 }
 0x429   : > { %v8362_v30 = vpop.f32.mrf.mxu0  ;;  %v8342_v39 = vpop.f32.mrf.mxu1 }
 0x42a   : > { %v6336_v63 = vadd.f32 %v8341_v16, %v6144_v4  ;;  %v8363_v53 = vadd.f32 %v8362_v30, %v8361_v9 }
 0x42b   : > { %v8364_v23 = vpop.f32.mrf.mxu0  ;;  %v8343_v47 = vpop.f32.mrf.mxu1 }
 0x42c   : > { %v6528_v14 = vadd.f32 %v8363_v53, %v6336_v63 }
 0x42d   : > { %v8365_v18 = vpop.f32.mrf.mxu0 }
 0x445   : > { %v8383_v57 = vpop.f32.mrf.mxu1 }
 0x447   : > { %v8405_v59 = vpop.f32.mrf.mxu0  ;;  %v8384_v33 = vpop.f32.mrf.mxu1 }
 0x448   : > { %v8385_v38 = vadd.f32 %v8384_v33, %v8383_v57 }
 0x449   : > { %v8406_v21 = vpop.f32.mrf.mxu0  ;;  %v8386_v20 = vpop.f32.mrf.mxu1 }
 0x44a   : > { %v6720_v40 = vadd.f32 %v8385_v38, %v6528_v14  ;;  %v8407_v58 = vadd.f32 %v8406_v21, %v8405_v59 }
 0x44b   : > { %v8408_v51 = vpop.f32.mrf.mxu0  ;;  %v8387_v1 = vpop.f32.mrf.mxu1 }
 0x44c   : > { %v6912_v17 = vadd.f32 %v8407_v58, %v6720_v40 }
 0x44d   : > { %v8409_v13 = vpop.f32.mrf.mxu0 }
 0x465   : > { %v8427_v61 = vpop.f32.mrf.mxu1 }
 0x467   : > { %v8449_v41 = vpop.f32.mrf.mxu0  ;;  %v8428_v3 = vpop.f32.mrf.mxu1 }
 0x468   : > { %v8429_v25 = vadd.f32 %v8428_v3, %v8427_v61 }
 0x469   : > { %v8450_v43 = vpop.f32.mrf.mxu0  ;;  %v8430_v24 = vpop.f32.mrf.mxu1 }
 0x46a   : > { %v7104_v19 = vadd.f32 %v8429_v25, %v6912_v17  ;;  %v8451_v6 = vadd.f32 %v8450_v43, %v8449_v41 }
 0x46b   : > { %v8452_v42 = vpop.f32.mrf.mxu0  ;;  %v8431_v10 = vpop.f32.mrf.mxu1 }
 0x46c   : > { %v7296_v46 = vadd.f32 %v8451_v6, %v7104_v19 }
 0x46d   : > { %v8453_v49 = vpop.f32.mrf.mxu0 }
 0x46e   : > { %v7298_v34 = vadd.f32 %v7297_v11, %v7296_v46 }
 0x470   : > { %7299 = vst [vmem:[%s271_s8] sm:$0x1] %v7298_v34 }
 0x471   : > { %9493 = shalt.err (!%p9490_p4)
}
 0x472   : > { %s9494_s30 = scalar_lea.hbm %s7311_s14, 16  ;;  %s9498_s25 = scalar_lea.hbm %s10415_s5, 32 }
 0x473   : > { %p9495_p13 = scmp.ne.s32.totalorder %s7311_s14, %s9494_s30  ;;  %p9499_p6 = scmp.lt.s32.totalorder %s7311_s14, %s10415_s5 }
 0x474   : > { %p9500_p12 = scmp.lt.s32.totalorder %s9498_s25, %s9494_s30 }
 0x475   : > { %p9496_p7 = pnand %p9495_p13, %p10460_p11 }
 0x476   : > { %p9501_p10 = por %p9500_p12, %p9499_p6 }
 0x477   : > { %p9497_p5 = pneg %p9496_p7 }
 0x479   : > { %p9502_p8 = pnand %p9501_p10, %p9497_p5 }
 0x47b   : > { %9505 = shalt.err (!%p9502_p8)
}
 0x47c   : > { %8472 = dma.vmem_to_hbm [thread:$0]  (%p10460_p11), %s7314_s11, 16, %s7311_s14, %s7301_s15  }
 0x47d PF: > { %p8499_p0 = scmp.ge.s32.totalorder %s9552_s21, 2  ;;  %s7325_s7 = sand.u32 1, %s9540_s18  }
 0x47e   : > { %p10461_p1 = scmp.ne.s32.totalorder %s10420_s29, 0  ;;  %s7326_s8 = scalar_lea.sflag [#allocation5], %s7325_s7 }
 0x480   : > { %p8488_p2 = pnand %p8499_p0, %p10461_p1 }
 0x482   : > { %p8489_p9 = pneg %p8488_p2 }
 0x484   : > { %9535 = dma.done.wait (%p8489_p9), %s7326_s8, 16  }
 0x485   : > { %9537 = vsyncadd (%p8489_p9), %s7326_s8, 4294967280  ;;  %p18_p3 = scmp.ge.s32.totalorder %s9619_s24, 4   ;;  %s10462_s18 = smov %s9544_s19 }
 0x486   : > { %s10463_s19 = smov %s9548_s20  ;;  %s10464_s20 = smov %s9630_s27 }
 0x487   : > { %s10465_s21 = smov %s9619_s24  ;;  %20 = sbr.rel (!%p18_p3) target bundleno = 6 (0x6), region = 142 }
 0x48c   :  { %7330 = vsyncpa [#allocation4], 1 }
 0x48d   :  { %7332 = vsyncpa [#allocation4 + $0x1], 1 }
 0x48e   :  { %7333 = vsyncpa [#allocation7], 1 }
 0x48f   :  { %7334 = vsyncpa [#allocation10], 1 }
 0x490   :  { %7335 = vsyncpa [#allocation5], 1 }
 0x491   :  { %7337 = vsyncpa [#allocation5 + $0x1], 1 }

</bundles_post_ra>
